<compile_context>
chip_gen: v7x
topology: tpu7x:2x2x1
jax: 0.10.0
libtpu: 0.0.40
codegen_flags: <defaults>
</compile_context>

<pallas_src>
import functools

import numpy as np
import jax
import jax.numpy as jnp
from jax.experimental import pallas as pl
from jax.experimental.pallas import tpu as pltpu

K_EXPERTS = 4        # Dynamic_conv2d default K
TEMPERATURE = 34.0   # Dynamic_conv2d default temperature
RATIO = 0.25         # attention2d hidden ratio
BN_EPS = 1e-5
LPAD = 16            # left pad of the in-VMEM padded image: sublane-aligned for bf16 (16,128) tiles
RPAD = 16            # right pad (only 1 column is read; 16 keeps all halo zero-stores tile-aligned
                     # and costs no extra VMEM because the layout pads the sublane dim to 48 anyway)


# ---------------------------------------------------------------- kernel -----

def _dyn_conv3x3_kernel(attn_ref, x_ref, w_ref, scale_ref, bias_ref, *rest,
                        has_identity, emit_pool):
    # attn (SMEM): (B, K) f32 softmax attention over experts
    # x:   (1, H, W, Cin)        full image of sample b (f32 for conv1, bf16 for conv2)
    # w:   (K, 9*Cin, Cout) bf16 expert weights (constant block index -> fetched once)
    # scale/bias: (1, Cout) f32  folded BatchNorm
    # [identity]: (1, TH*W, Cout) f32 residual tile
    # out: (1, TH*W, Cout)
    # [psum]: (1, 1, Cout) f32   fused global-sum of the stored activations (for attention-2)
    idx = 0
    id_ref = rest[idx] if has_identity else None
    idx += int(has_identity)
    o_ref = rest[idx]
    idx += 1
    psum_ref = rest[idx] if emit_pool else None
    idx += int(emit_pool)
    xpad_scr, wmix_scr = rest[idx], rest[idx + 1]

    b = pl.program_id(0)
    t = pl.program_id(1)
    H, W, Cin = x_ref.shape[1], x_ref.shape[2], x_ref.shape[3]
    THW, Cout = o_ref.shape[1], o_ref.shape[2]
    TH = THW // W
    Wp = LPAD + W + RPAD

    @pl.when(t == 0)
    def _prologue():
        # (a) expert-weight mix hoisted out of the tap loop: once per sample, cached bf16 in VMEM.
        wmix = (attn_ref[b, 0] * w_ref[0] + attn_ref[b, 1] * w_ref[1]
                + attn_ref[b, 2] * w_ref[2] + attn_ref[b, 3] * w_ref[3])
        wmix_scr[...] = wmix.astype(wmix_scr.dtype)
        # (b) zero ONLY the halo of the padded image (taps read rows [0,H+2) x cols [LPAD-1, LPAD+W]).
        zlr = jnp.zeros((H + 2, LPAD, Cin), xpad_scr.dtype)
        xpad_scr[pl.ds(0, H + 2), pl.ds(0, LPAD), :] = zlr               # left pad block
        xpad_scr[pl.ds(0, H + 2), pl.ds(LPAD + W, RPAD), :] = zlr        # right pad block
        ztb = jnp.zeros((1, Wp, Cin), xpad_scr.dtype)
        xpad_scr[pl.ds(0, 1), pl.ds(0, Wp), :] = ztb                     # top halo row
        xpad_scr[pl.ds(H + 1, 1), pl.ds(0, Wp), :] = ztb                 # bottom halo row
        # (c) cast the sample image to bf16 ONCE into the sublane-aligned interior.
        xpad_scr[pl.ds(1, H), pl.ds(LPAD, W), :] = x_ref[0].astype(xpad_scr.dtype)
        if emit_pool:
            psum_ref[...] = jnp.zeros(psum_ref.shape, psum_ref.dtype)

    # Value-level im2col: 9 shifted windows, each reshaped (TH, W, Cin)->(TH*W, Cin) (safe
    # leading-dim collapse), concatenated along lanes -> single K=9*Cin MXU matmul.
    row0 = t * TH
    taps = [xpad_scr[pl.ds(row0 + ky, TH), pl.ds(LPAD - 1 + kx, W), :].reshape(THW, Cin)
            for ky in range(3) for kx in range(3)]
    lhs = jnp.concatenate(taps, axis=-1)                                 # (TH*W, 9*Cin) bf16
    acc = jnp.dot(lhs, wmix_scr[...], preferred_element_type=jnp.float32)

    y = acc * scale_ref[...] + bias_ref[...]                             # folded BN, f32 epilogue
    if has_identity:
        y = y + id_ref[0].astype(jnp.float32)                            # residual add before ReLU
    y = jnp.maximum(y, 0.0)
    y_out = y.astype(o_ref.dtype)
    o_ref[0] = y_out
    if emit_pool:
        # fused global-average-pool partial sums of the values actually stored (bf16-rounded),
        # so the next attention never re-reads the full activation from HBM.
        psum_ref[...] += jnp.sum(y_out.astype(jnp.float32), axis=0, keepdims=True)[None]


# --------------------------------------------------------------- wrappers ----

def _attention(pooled, att):
    # attention2d MLP + softmax.  Tiny (M=B, K<=C, N=4): left as plain (fused) XLA ops instead of
    # dedicated pallas_call launches, per the perf review.
    h = jnp.maximum(jnp.dot(pooled, att['w1'], precision='highest'), 0.0)
    logits = (jnp.dot(h, att['w2'], precision='highest') + att['b2']) * (1.0 / TEMPERATURE)
    return jax.nn.softmax(logits, axis=-1)


def _dyn_conv3x3(attn, x_nhwc, w, bn_scale, bn_bias, *, identity_flat=None,
                 out_dtype=jnp.float32, emit_pool=False, tile_h=None):
    B, H, W, Cin = x_nhwc.shape
    Cout = w.shape[-1]
    if tile_h is not None:
        TH = tile_h
    elif H * W <= 1024:
        TH = H                      # small image: grid collapses to (B, 1)
    elif H % 8 == 0:
        TH = 8
    else:
        TH = H                      # TODO(synk): odd H falls back to whole-image tiles
    T = H // TH
    w_flat = w.reshape(K_EXPERTS, 9 * Cin, Cout)     # (K,3,3,Cin,Cout) -> (K, 9*Cin, Cout)

    in_specs = [pl.BlockSpec(memory_space=pltpu.MemorySpace.SMEM),            # attn (B, K)
                pl.BlockSpec((1, H, W, Cin), lambda b, t: (b, 0, 0, 0)),      # full image / sample
                # constant block index => fetched once; only the double buffer is paid in VMEM.
                pl.BlockSpec((K_EXPERTS, 9 * Cin, Cout), lambda b, t: (0, 0, 0)),
                pl.BlockSpec((1, Cout), lambda b, t: (0, 0)),
                pl.BlockSpec((1, Cout), lambda b, t: (0, 0))]
    args = [attn, x_nhwc, w_flat, bn_scale, bn_bias]
    if identity_flat is not None:
        in_specs.append(pl.BlockSpec((1, TH * W, Cout), lambda b, t: (b, t, 0)))
        args.append(identity_flat)

    out_shape = [jax.ShapeDtypeStruct((B, H * W, Cout), out_dtype)]
    out_specs = [pl.BlockSpec((1, TH * W, Cout), lambda b, t: (b, t, 0))]
    if emit_pool:
        out_shape.append(jax.ShapeDtypeStruct((B, 1, Cout), jnp.float32))
        out_specs.append(pl.BlockSpec((1, 1, Cout), lambda b, t: (b, 0, 0)))

    kernel = functools.partial(_dyn_conv3x3_kernel,
                               has_identity=identity_flat is not None,
                               emit_pool=emit_pool)
    return pl.pallas_call(
        kernel,
        out_shape=tuple(out_shape) if emit_pool else out_shape[0],
        grid=(B, T),
        in_specs=in_specs,
        out_specs=tuple(out_specs) if emit_pool else out_specs[0],
        scratch_shapes=[
            pltpu.VMEM((H + 2, LPAD + W + RPAD, Cin), jnp.bfloat16),   # padded image, bf16
            pltpu.VMEM((9 * Cin, Cout), jnp.bfloat16),                 # mixed weights
        ],
        compiler_params=pltpu.CompilerParams(
            # batch axis parallel (megacore shardable); row-tile axis MUST stay arbitrary
            # (per-sample scratches + pooled partial-sum accumulation depend on it).
            dimension_semantics=("parallel", "arbitrary"),
            vmem_limit_bytes=32 * 1024 * 1024),
    )(*args)


def basic_block_forward(x_nchw, params):
    """BasicBlock forward (stride=1, downsample=None). x: (B, C, H, W) f32 -> (B, C, H, W) f32."""
    B, C, H, W = x_nchw.shape
    # TODO(synk): when chaining blocks, keep activations NHWC and convert only at network edges;
    #             the NCHW boundary is kept here because it is the module's public layout.
    x = jnp.transpose(x_nchw, (0, 2, 3, 1))                     # NHWC f32 (also the residual)
    x_flat = x.reshape(B, H * W, C)

    a1 = _attention(jnp.mean(x, axis=(1, 2)), params['att1'])   # attention over pooled z (XLA)
    h1_flat, pool1 = _dyn_conv3x3(a1, x, params['w1'],
                                  params['bn1_scale'], params['bn1_bias'],
                                  out_dtype=jnp.bfloat16, emit_pool=True)

    pooled1 = pool1[:, 0, :] * (1.0 / (H * W))                  # fused pooling: h1 not re-read
    a2 = _attention(pooled1, params['att2'])
    h1 = h1_flat.reshape(B, H, W, C)
    out_flat = _dyn_conv3x3(a2, h1, params['w2'],
                            params['bn2_scale'], params['bn2_bias'],
                            identity_flat=x_flat, out_dtype=jnp.float32, emit_pool=False)
    return jnp.transpose(out_flat.reshape(B, H, W, C), (0, 3, 1, 2))


# ---------------------------------------------------------------- params -----

def _init_dyn_conv3x3(key, cin, cout):
    k1, k2, k3, k4 = jax.random.split(key, 4)
    hidden = int(cin * RATIO) + 1
    att = {'w1': 0.3 * jax.random.normal(k1, (cin, hidden), jnp.float32),
           'w2': 0.3 * jax.random.normal(k2, (hidden, K_EXPERTS), jnp.float32),
           'b2': 0.1 * jax.random.normal(k3, (1, K_EXPERTS), jnp.float32)}
    w = (0.1 * jax.random.normal(k4, (K_EXPERTS, 3, 3, cin, cout), jnp.float32)
         ).astype(jnp.bfloat16)                                  # experts stored in bf16
    return att, w


def _init_bn(key, c):
    k1, k2, k3, k4 = jax.random.split(key, 4)
    gamma = 1.0 + 0.1 * jax.random.normal(k1, (1, c), jnp.float32)
    beta = 0.1 * jax.random.normal(k2, (1, c), jnp.float32)
    mean = 0.1 * jax.random.normal(k3, (1, c), jnp.float32)
    var = jax.random.uniform(k4, (1, c), jnp.float32, 0.5, 1.5)
    scale = gamma / jnp.sqrt(var + BN_EPS)
    bias = beta - mean * scale
    return scale, bias


def init_params(key, planes):
    # BasicBlock: conv3x3(planes->planes)+BN+ReLU, conv3x3(planes->planes)+BN, +identity, ReLU
    ks = jax.random.split(key, 4)
    att1, w1 = _init_dyn_conv3x3(ks[0], planes, planes)
    bn1_s, bn1_b = _init_bn(ks[1], planes)
    att2, w2 = _init_dyn_conv3x3(ks[2], planes, planes)
    bn2_s, bn2_b = _init_bn(ks[3], planes)
    return dict(att1=att1, w1=w1, bn1_scale=bn1_s, bn1_bias=bn1_b,
                att2=att2, w2=w2, bn2_scale=bn2_s, bn2_bias=bn2_b)


# ----------------------------------------------------------- JAX reference ---

def _ref_dyn_conv3x3(attn, x_nhwc, w, scale, bias, identity=None):
    # Mirrors the kernel's numerics: bf16 matmul operands, f32 accumulation, f32 epilogue.
    B, H, W, Cin = x_nhwc.shape
    Cout = w.shape[-1]
    w_mix = jnp.einsum('bk,kyxio->byxio', attn, w.astype(jnp.float32)).astype(jnp.bfloat16)
    xp = jnp.pad(x_nhwc.astype(jnp.bfloat16), ((0, 0), (1, 1), (1, 1), (0, 0)))
    acc = jnp.zeros((B, H * W, Cout), jnp.float32)
    for ky in range(3):
        for kx in range(3):
            patch = xp[:, ky:ky + H, kx:kx + W, :].reshape(B, H * W, Cin)
            acc = acc + jnp.einsum('bpi,bio->bpo', patch, w_mix[:, ky, kx],
                                   preferred_element_type=jnp.float32)
    y = acc * scale + bias
    if identity is not None:
        y = y + identity.reshape(B, H * W, Cout).astype(jnp.float32)
    return jnp.maximum(y, 0.0).reshape(B, H, W, Cout)


def ref_forward(x_nchw, params):
    B, C, H, W = x_nchw.shape
    x = jnp.transpose(x_nchw, (0, 2, 3, 1))
    a1 = _attention(jnp.mean(x, axis=(1, 2)), params['att1'])
    h1 = _ref_dyn_conv3x3(a1, x, params['w1'], params['bn1_scale'], params['bn1_bias'])
    h1 = h1.astype(jnp.bfloat16)                               # kernel stores layer-1 act in bf16
    a2 = _attention(jnp.mean(h1.astype(jnp.float32), axis=(1, 2)), params['att2'])
    out = _ref_dyn_conv3x3(a2, h1, params['w2'], params['bn2_scale'], params['bn2_bias'],
                           identity=x)
    return jnp.transpose(out, (0, 3, 1, 2))


# ------------------------------------------------------------------- main ----

if __name__ == "__main__":
    key = jax.random.PRNGKey(0)
    kx_, kp = jax.random.split(key)

    B, C, H, W = 2, 64, 16, 16          # BasicBlock: in_planes == out_planes (expansion = 1)
    x = jax.random.normal(kx_, (B, C, H, W), jnp.float32)
    params = init_params(kp, C)

    out = jax.block_until_ready(basic_block_forward(x, params))
    ref = jax.block_until_ready(ref_forward(x, params))

    assert out.shape == (B, C, H, W)
    np.testing.assert_allclose(np.asarray(out), np.asarray(ref), atol=1e-2, rtol=1e-2)
    print("KERNEL_OK")
</pallas_src>

<mosaic_0001>
module attributes {stable_mosaic.version = 11 : i64} {
  func.func @_dyn_conv3x3_kernel(%arg0: i32, %arg1: i32, %arg2: memref<2x4xf32, #tpu.memory_space<smem>>, %arg3: memref<1x16x16x64xf32, #tpu.memory_space<vmem>>, %arg4: memref<4x576x64xbf16, #tpu.memory_space<vmem>>, %arg5: memref<1x64xf32, #tpu.memory_space<vmem>>, %arg6: memref<1x64xf32, #tpu.memory_space<vmem>>, %arg7: memref<1x256x64xbf16, #tpu.memory_space<vmem>>, %arg8: memref<1x1x64xf32, #tpu.memory_space<vmem>>, %arg9: memref<18x48x64xbf16, #tpu.memory_space<vmem>>, %arg10: memref<576x64xbf16, #tpu.memory_space<vmem>>) attributes {dimension_semantics = [#tpu.dimension_semantics<parallel>, #tpu.dimension_semantics<arbitrary>], iteration_bounds = array<i64: 2, 1>, scalar_prefetch = 0 : i64, scratch_operands = 2 : i64, tpu.core_type = #tpu.core_type<tc>, window_params = [{transform_indices = @transform_0, window_bounds = array<i64: 2, 4>}, {transform_indices = @transform_1, window_bounds = array<i64: 1, 16, 16, 64>}, {pipeline_mode = #tpu.pipeline_mode<synchronous>, transform_indices = @transform_2, window_bounds = array<i64: 4, 576, 64>}, {pipeline_mode = #tpu.pipeline_mode<synchronous>, transform_indices = @transform_3, window_bounds = array<i64: 1, 64>}, {pipeline_mode = #tpu.pipeline_mode<synchronous>, transform_indices = @transform_4, window_bounds = array<i64: 1, 64>}, {transform_indices = @transform_5, window_bounds = array<i64: 1, 256, 64>}, {transform_indices = @transform_6, window_bounds = array<i64: 1, 1, 64>}]} {
    %c0_i32 = arith.constant 0 : i32
    %0 = arith.cmpi eq, %arg1, %c0_i32 : i32
    %1 = arith.extui %0 : i1 to i32
    %c0_i32_0 = arith.constant 0 : i32
    %2 = arith.cmpi ne, %1, %c0_i32_0 : i32
    scf.if %2 {
      %62 = arith.index_cast %arg0 : i32 to index
      %c0_39 = arith.constant 0 : index
      %63 = memref.load %arg2[%62, %c0_39] : memref<2x4xf32, #tpu.memory_space<smem>>
      %c0_40 = arith.constant 0 : index
      %c0_41 = arith.constant 0 : index
      %c0_42 = arith.constant 0 : index
      %64 = vector.load %arg4[%c0_40, %c0_41, %c0_42] : memref<4x576x64xbf16, #tpu.memory_space<vmem>>, vector<1x576x64xbf16>
      %65 = vector.shape_cast %64 : vector<1x576x64xbf16> to vector<576x64xbf16>
      %66 = arith.extf %65 : vector<576x64xbf16> to vector<576x64xf32>
      %67 = vector.broadcast %63 : f32 to vector<576x64xf32>
      %68 = arith.mulf %67, %66 : vector<576x64xf32>
      %69 = arith.index_cast %arg0 : i32 to index
      %c1 = arith.constant 1 : index
      %70 = memref.load %arg2[%69, %c1] : memref<2x4xf32, #tpu.memory_space<smem>>
      %c1_43 = arith.constant 1 : index
      %c0_44 = arith.constant 0 : index
      %c0_45 = arith.constant 0 : index
      %71 = vector.load %arg4[%c1_43, %c0_44, %c0_45] : memref<4x576x64xbf16, #tpu.memory_space<vmem>>, vector<1x576x64xbf16>
      %72 = vector.shape_cast %71 : vector<1x576x64xbf16> to vector<576x64xbf16>
      %73 = arith.extf %72 : vector<576x64xbf16> to vector<576x64xf32>
      %74 = vector.broadcast %70 : f32 to vector<576x64xf32>
      %75 = arith.mulf %74, %73 : vector<576x64xf32>
      %76 = arith.addf %68, %75 : vector<576x64xf32>
      %77 = arith.index_cast %arg0 : i32 to index
      %c2 = arith.constant 2 : index
      %78 = memref.load %arg2[%77, %c2] : memref<2x4xf32, #tpu.memory_space<smem>>
      %c2_46 = arith.constant 2 : index
      %c0_47 = arith.constant 0 : index
      %c0_48 = arith.constant 0 : index
      %79 = vector.load %arg4[%c2_46, %c0_47, %c0_48] : memref<4x576x64xbf16, #tpu.memory_space<vmem>>, vector<1x576x64xbf16>
      %80 = vector.shape_cast %79 : vector<1x576x64xbf16> to vector<576x64xbf16>
      %81 = arith.extf %80 : vector<576x64xbf16> to vector<576x64xf32>
      %82 = vector.broadcast %78 : f32 to vector<576x64xf32>
      %83 = arith.mulf %82, %81 : vector<576x64xf32>
      %84 = arith.addf %76, %83 : vector<576x64xf32>
      %85 = arith.index_cast %arg0 : i32 to index
      %c3 = arith.constant 3 : index
      %86 = memref.load %arg2[%85, %c3] : memref<2x4xf32, #tpu.memory_space<smem>>
      %c3_49 = arith.constant 3 : index
      %c0_50 = arith.constant 0 : index
      %c0_51 = arith.constant 0 : index
      %87 = vector.load %arg4[%c3_49, %c0_50, %c0_51] : memref<4x576x64xbf16, #tpu.memory_space<vmem>>, vector<1x576x64xbf16>
      %88 = vector.shape_cast %87 : vector<1x576x64xbf16> to vector<576x64xbf16>
      %89 = arith.extf %88 : vector<576x64xbf16> to vector<576x64xf32>
      %90 = vector.broadcast %86 : f32 to vector<576x64xf32>
      %91 = arith.mulf %90, %89 : vector<576x64xf32>
      %92 = arith.addf %84, %91 : vector<576x64xf32>
      %93 = arith.truncf %92 : vector<576x64xf32> to vector<576x64xbf16>
      %c0_52 = arith.constant 0 : index
      %c0_53 = arith.constant 0 : index
      %94 = vector.load %arg10[%c0_52, %c0_53] : memref<576x64xbf16, #tpu.memory_space<vmem>>, vector<576x64xbf16>
      tpu.vector_store %arg10[%c0_52, %c0_53], %93 {strides = array<i32>} : memref<576x64xbf16, #tpu.memory_space<vmem>>, vector<576x64xbf16>,
      %cst_54 = arith.constant 0.000000e+00 : bf16
      %95 = vector.broadcast %cst_54 : bf16 to vector<18x16x64xbf16>
      %c0_55 = arith.constant 0 : index
      %c0_56 = arith.constant 0 : index
      %c0_57 = arith.constant 0 : index
      %96 = vector.load %arg9[%c0_55, %c0_56, %c0_57] : memref<18x48x64xbf16, #tpu.memory_space<vmem>>, vector<18x16x64xbf16>
      tpu.vector_store %arg9[%c0_55, %c0_56, %c0_57], %95 {strides = array<i32>} : memref<18x48x64xbf16, #tpu.memory_space<vmem>>, vector<18x16x64xbf16>,
      %c0_58 = arith.constant 0 : index
      %c32 = arith.constant 32 : index
      %c0_59 = arith.constant 0 : index
      %97 = vector.load %arg9[%c0_58, %c32, %c0_59] : memref<18x48x64xbf16, #tpu.memory_space<vmem>>, vector<18x16x64xbf16>
      tpu.vector_store %arg9[%c0_58, %c32, %c0_59], %95 {strides = array<i32>} : memref<18x48x64xbf16, #tpu.memory_space<vmem>>, vector<18x16x64xbf16>,
      %cst_60 = arith.constant 0.000000e+00 : bf16
      %98 = vector.broadcast %cst_60 : bf16 to vector<1x48x64xbf16>
      %c0_61 = arith.constant 0 : index
      %c0_62 = arith.constant 0 : index
      %c0_63 = arith.constant 0 : index
      %99 = vector.load %arg9[%c0_61, %c0_62, %c0_63] : memref<18x48x64xbf16, #tpu.memory_space<vmem>>, vector<1x48x64xbf16>
      tpu.vector_store %arg9[%c0_61, %c0_62, %c0_63], %98 {strides = array<i32>} : memref<18x48x64xbf16, #tpu.memory_space<vmem>>, vector<1x48x64xbf16>,
      %c17_64 = arith.constant 17 : index
      %c0_65 = arith.constant 0 : index
      %c0_66 = arith.constant 0 : index
      %100 = vector.load %arg9[%c17_64, %c0_65, %c0_66] : memref<18x48x64xbf16, #tpu.memory_space<vmem>>, vector<1x48x64xbf16>
      tpu.vector_store %arg9[%c17_64, %c0_65, %c0_66], %98 {strides = array<i32>} : memref<18x48x64xbf16, #tpu.memory_space<vmem>>, vector<1x48x64xbf16>,
      %c0_67 = arith.constant 0 : index
      %c0_68 = arith.constant 0 : index
      %c0_69 = arith.constant 0 : index
      %c0_70 = arith.constant 0 : index
      %101 = vector.load %arg3[%c0_67, %c0_68, %c0_69, %c0_70] : memref<1x16x16x64xf32, #tpu.memory_space<vmem>>, vector<1x16x16x64xf32>
      %102 = vector.shape_cast %101 : vector<1x16x16x64xf32> to vector<16x16x64xf32>
      %103 = arith.truncf %102 : vector<16x16x64xf32> to vector<16x16x64xbf16>
      %c1_71 = arith.constant 1 : index
      %c16_72 = arith.constant 16 : index
      %c0_73 = arith.constant 0 : index
      %104 = vector.load %arg9[%c1_71, %c16_72, %c0_73] : memref<18x48x64xbf16, #tpu.memory_space<vmem>>, vector<16x16x64xbf16>
      tpu.vector_store %arg9[%c1_71, %c16_72, %c0_73], %103 {strides = array<i32>} : memref<18x48x64xbf16, #tpu.memory_space<vmem>>, vector<16x16x64xbf16>,
      %cst_74 = arith.constant 0.000000e+00 : f32
      %105 = vector.broadcast %cst_74 : f32 to vector<1x1x64xf32>
      %c0_75 = arith.constant 0 : index
      %c0_76 = arith.constant 0 : index
      %c0_77 = arith.constant 0 : index
      %106 = vector.load %arg8[%c0_75, %c0_76, %c0_77] : memref<1x1x64xf32, #tpu.memory_space<vmem>>, vector<1x1x64xf32>
      tpu.vector_store %arg8[%c0_75, %c0_76, %c0_77], %105 {strides = array<i32>} : memref<1x1x64xf32, #tpu.memory_space<vmem>>, vector<1x1x64xf32>,
    } else {
    }
    %c16_i32 = arith.constant 16 : i32
    %3 = arith.muli %arg1, %c16_i32 : i32
    %c0_i32_1 = arith.constant 0 : i32
    %4 = arith.addi %3, %c0_i32_1 : i32
    %5 = arith.index_cast %4 : i32 to index
    %c15 = arith.constant 15 : index
    %c0 = arith.constant 0 : index
    %6 = vector.load %arg9[%5, %c15, %c0] : memref<18x48x64xbf16, #tpu.memory_space<vmem>>, vector<16x16x64xbf16>
    %7 = vector.shape_cast %6 : vector<16x16x64xbf16> to vector<256x64xbf16>
    %c0_i32_2 = arith.constant 0 : i32
    %8 = arith.addi %3, %c0_i32_2 : i32
    %9 = arith.index_cast %8 : i32 to index
    %c16 = arith.constant 16 : index
    %c0_3 = arith.constant 0 : index
    %10 = vector.load %arg9[%9, %c16, %c0_3] : memref<18x48x64xbf16, #tpu.memory_space<vmem>>, vector<16x16x64xbf16>
    %11 = vector.shape_cast %10 : vector<16x16x64xbf16> to vector<256x64xbf16>
    %c0_i32_4 = arith.constant 0 : i32
    %12 = arith.addi %3, %c0_i32_4 : i32
    %13 = arith.index_cast %12 : i32 to index
    %c17 = arith.constant 17 : index
    %c0_5 = arith.constant 0 : index
    %14 = vector.load %arg9[%13, %c17, %c0_5] : memref<18x48x64xbf16, #tpu.memory_space<vmem>>, vector<16x16x64xbf16>
    %15 = vector.shape_cast %14 : vector<16x16x64xbf16> to vector<256x64xbf16>
    %c1_i32 = arith.constant 1 : i32
    %16 = arith.addi %3, %c1_i32 : i32
    %17 = arith.index_cast %16 : i32 to index
    %c15_6 = arith.constant 15 : index
    %c0_7 = arith.constant 0 : index
    %18 = vector.load %arg9[%17, %c15_6, %c0_7] : memref<18x48x64xbf16, #tpu.memory_space<vmem>>, vector<16x16x64xbf16>
    %19 = vector.shape_cast %18 : vector<16x16x64xbf16> to vector<256x64xbf16>
    %c1_i32_8 = arith.constant 1 : i32
    %20 = arith.addi %3, %c1_i32_8 : i32
    %21 = arith.index_cast %20 : i32 to index
    %c16_9 = arith.constant 16 : index
    %c0_10 = arith.constant 0 : index
    %22 = vector.load %arg9[%21, %c16_9, %c0_10] : memref<18x48x64xbf16, #tpu.memory_space<vmem>>, vector<16x16x64xbf16>
    %23 = vector.shape_cast %22 : vector<16x16x64xbf16> to vector<256x64xbf16>
    %c1_i32_11 = arith.constant 1 : i32
    %24 = arith.addi %3, %c1_i32_11 : i32
    %25 = arith.index_cast %24 : i32 to index
    %c17_12 = arith.constant 17 : index
    %c0_13 = arith.constant 0 : index
    %26 = vector.load %arg9[%25, %c17_12, %c0_13] : memref<18x48x64xbf16, #tpu.memory_space<vmem>>, vector<16x16x64xbf16>
    %27 = vector.shape_cast %26 : vector<16x16x64xbf16> to vector<256x64xbf16>
    %c2_i32 = arith.constant 2 : i32
    %28 = arith.addi %3, %c2_i32 : i32
    %29 = arith.index_cast %28 : i32 to index
    %c15_14 = arith.constant 15 : index
    %c0_15 = arith.constant 0 : index
    %30 = vector.load %arg9[%29, %c15_14, %c0_15] : memref<18x48x64xbf16, #tpu.memory_space<vmem>>, vector<16x16x64xbf16>
    %31 = vector.shape_cast %30 : vector<16x16x64xbf16> to vector<256x64xbf16>
    %c2_i32_16 = arith.constant 2 : i32
    %32 = arith.addi %3, %c2_i32_16 : i32
    %33 = arith.index_cast %32 : i32 to index
    %c16_17 = arith.constant 16 : index
    %c0_18 = arith.constant 0 : index
    %34 = vector.load %arg9[%33, %c16_17, %c0_18] : memref<18x48x64xbf16, #tpu.memory_space<vmem>>, vector<16x16x64xbf16>
    %35 = vector.shape_cast %34 : vector<16x16x64xbf16> to vector<256x64xbf16>
    %c2_i32_19 = arith.constant 2 : i32
    %36 = arith.addi %3, %c2_i32_19 : i32
    %37 = arith.index_cast %36 : i32 to index
    %c17_20 = arith.constant 17 : index
    %c0_21 = arith.constant 0 : index
    %38 = vector.load %arg9[%37, %c17_20, %c0_21] : memref<18x48x64xbf16, #tpu.memory_space<vmem>>, vector<16x16x64xbf16>
    %39 = vector.shape_cast %38 : vector<16x16x64xbf16> to vector<256x64xbf16>
    %40 = tpu.concatenate %7, %11, %15, %19, %23, %27, %31, %35, %39 in 1 : vector<256x64xbf16>, vector<256x64xbf16>, vector<256x64xbf16>, vector<256x64xbf16>, vector<256x64xbf16>, vector<256x64xbf16>, vector<256x64xbf16>, vector<256x64xbf16>, vector<256x64xbf16> -> vector<256x576xbf16>
    %c0_22 = arith.constant 0 : index
    %c0_23 = arith.constant 0 : index
    %41 = vector.load %arg10[%c0_22, %c0_23] : memref<576x64xbf16, #tpu.memory_space<vmem>>, vector<576x64xbf16>
    %cst = arith.constant dense<0.000000e+00> : vector<256x64xf32>
    %42 = tpu.matmul %40, %41, %cst {dimension_numbers = #tpu.dot_dimension_numbers<[1], [0], [0], [1], [0, 0, 1, 1], [], []>} : vector<256x576xbf16>, vector<576x64xbf16>, vector<256x64xf32> -> vector<256x64xf32>
    %c0_24 = arith.constant 0 : index
    %c0_25 = arith.constant 0 : index
    %43 = vector.load %arg5[%c0_24, %c0_25] : memref<1x64xf32, #tpu.memory_space<vmem>>, vector<1x64xf32>
    %44 = vector.broadcast %43 : vector<1x64xf32> to vector<256x64xf32>
    %45 = arith.mulf %42, %44 : vector<256x64xf32>
    %c0_26 = arith.constant 0 : index
    %c0_27 = arith.constant 0 : index
    %46 = vector.load %arg6[%c0_26, %c0_27] : memref<1x64xf32, #tpu.memory_space<vmem>>, vector<1x64xf32>
    %47 = vector.broadcast %46 : vector<1x64xf32> to vector<256x64xf32>
    %48 = arith.addf %45, %47 : vector<256x64xf32>
    %cst_28 = arith.constant 0.000000e+00 : f32
    %49 = vector.broadcast %cst_28 : f32 to vector<256x64xf32>
    %50 = arith.maximumf %48, %49 : vector<256x64xf32>
    %51 = arith.truncf %50 : vector<256x64xf32> to vector<256x64xbf16>
    %c0_29 = arith.constant 0 : index
    %c0_30 = arith.constant 0 : index
    %c0_31 = arith.constant 0 : index
    %52 = vector.load %arg7[%c0_29, %c0_30, %c0_31] : memref<1x256x64xbf16, #tpu.memory_space<vmem>>, vector<1x256x64xbf16>
    %53 = vector.shape_cast %52 : vector<1x256x64xbf16> to vector<256x64xbf16>
    %54 = vector.shape_cast %51 : vector<256x64xbf16> to vector<1x256x64xbf16>
    tpu.vector_store %arg7[%c0_29, %c0_30, %c0_31], %54 {strides = array<i32>} : memref<1x256x64xbf16, #tpu.memory_space<vmem>>, vector<1x256x64xbf16>,
    %c0_32 = arith.constant 0 : index
    %c0_33 = arith.constant 0 : index
    %c0_34 = arith.constant 0 : index
    %55 = vector.load %arg8[%c0_32, %c0_33, %c0_34] : memref<1x1x64xf32, #tpu.memory_space<vmem>>, vector<1x1x64xf32>
    %56 = arith.extf %51 : vector<256x64xbf16> to vector<256x64xf32>
    %cst_35 = arith.constant dense<0.000000e+00> : vector<64xf32>
    %57 = vector.multi_reduction <add>, %56, %cst_35 [0] : vector<256x64xf32> to vector<64xf32>
    %58 = vector.shape_cast %57 : vector<64xf32> to vector<1x64xf32>
    %59 = vector.shape_cast %58 : vector<1x64xf32> to vector<1x1x64xf32>
    %60 = arith.addf %55, %59 : vector<1x1x64xf32>
    %c0_36 = arith.constant 0 : index
    %c0_37 = arith.constant 0 : index
    %c0_38 = arith.constant 0 : index
    %61 = vector.load %arg8[%c0_36, %c0_37, %c0_38] : memref<1x1x64xf32, #tpu.memory_space<vmem>>, vector<1x1x64xf32>
    tpu.vector_store %arg8[%c0_36, %c0_37, %c0_38], %60 {strides = array<i32>} : memref<1x1x64xf32, #tpu.memory_space<vmem>>, vector<1x1x64xf32>,
    return
  }
  func.func @transform_0(%arg0: i32, %arg1: i32) -> (i32, i32) {
    %c0_i32 = arith.constant 0 : i32
    %c0_i32_0 = arith.constant 0 : i32
    %c0_i32_1 = arith.constant 0 : i32
    return %c0_i32, %c0_i32_0 : i32, i32
  }
  func.func @transform_1(%arg0: i32, %arg1: i32) -> (i32, i32, i32, i32) {
    %c0_i32 = arith.constant 0 : i32
    %c0_i32_0 = arith.constant 0 : i32
    %c0_i32_1 = arith.constant 0 : i32
    %c0_i32_2 = arith.constant 0 : i32
    return %arg0, %c0_i32, %c0_i32_0, %c0_i32_1 : i32, i32, i32, i32
  }
  func.func @transform_2(%arg0: i32, %arg1: i32) -> (i32, i32, i32) {
    %c0_i32 = arith.constant 0 : i32
    %c0_i32_0 = arith.constant 0 : i32
    %c0_i32_1 = arith.constant 0 : i32
    %c0_i32_2 = arith.constant 0 : i32
    return %c0_i32, %c0_i32_0, %c0_i32_1 : i32, i32, i32
  }
  func.func @transform_3(%arg0: i32, %arg1: i32) -> (i32, i32) {
    %c0_i32 = arith.constant 0 : i32
    %c0_i32_0 = arith.constant 0 : i32
    %c0_i32_1 = arith.constant 0 : i32
    return %c0_i32, %c0_i32_0 : i32, i32
  }
  func.func @transform_4(%arg0: i32, %arg1: i32) -> (i32, i32) {
    %c0_i32 = arith.constant 0 : i32
    %c0_i32_0 = arith.constant 0 : i32
    %c0_i32_1 = arith.constant 0 : i32
    return %c0_i32, %c0_i32_0 : i32, i32
  }
  func.func @transform_5(%arg0: i32, %arg1: i32) -> (i32, i32, i32) {
    %c0_i32 = arith.constant 0 : i32
    %c0_i32_0 = arith.constant 0 : i32
    return %arg0, %arg1, %c0_i32 : i32, i32, i32
  }
  func.func @transform_6(%arg0: i32, %arg1: i32) -> (i32, i32, i32) {
    %c0_i32 = arith.constant 0 : i32
    %c0_i32_0 = arith.constant 0 : i32
    %c0_i32_1 = arith.constant 0 : i32
    return %arg0, %c0_i32, %c0_i32_0 : i32, i32, i32
  }
}

</mosaic_0001>

<bundles_post_ra>
// kernel: tpu_custom_call.1
= control target key start
LH: loop header
LB: loop body
LE: loop exit
PB: predicated region body
PF: predicated region fallthrough
CT: control target
= control target key end

     0   :  { %12 = vsyncpa [#allocation6], 0  ;;  %s7994_s0 = inlined_call_operand.vmem [shape: f32[2,4], index: 0, kind: input, shape index: {}]   ;;  %s7995_s1 = inlined_call_operand.vmem [shape: f32[2,16,16,64], index: 1, kind: input, shape index: {}]   ;;  %s7996_s2 = inlined_call_operand.vmem [shape: bf16[4,576,64], index: 2, kind: input, shape index: {}]   ;;  %s7997_s3 = inlined_call_operand.vmem [shape: f32[1,64], index: 3, kind: input, shape index: {}]   ;;  %s7998_s4 = inlined_call_operand.vmem [shape: f32[1,64], index: 4, kind: input, shape index: {}]   ;;  %s7999_s5 = inlined_call_operand.vmem [shape: bf16[2,256,64], index: 5, kind: output, shape index: {0}]   ;;  %s8000_s6 = inlined_call_operand.hbm [shape: f32[2,1,64], index: 6, kind: output, shape index: {1}]  }
   0x1   :  { %13 = vsyncpa [#allocation5], 0 }
   0x2   :  { %15 = vsyncpa [#allocation5 + $0x1], 0  ;;  %s5804_s21 = smov 0   ;;  %s5806_s22 = smov 0  }
   0x3   :  { %s5808_s23 = smov 0   ;;  %s5810_s24 = smov 0  }
   0x4   :  { %s5812_s25 = smov 0   ;;  %s5814_s26 = smov 0  }
   0x5 LB: > { %s4144_s27 = sadd.s32 4294967295, %s5762_s26   ;;  %s4145_s28 = sadd.s32 4294967294, %s5762_s26   ;;  %s5762_s26 = sphi %s5814_s26, %s21_s26   ;;  %s5758_s25 = sphi %s5812_s25, %s8122_s25   ;;  %s5754_s24 = sphi %s5810_s24, %s8121_s24   ;;  %s5750_s23 = sphi %s5808_s23, %s8120_s23   ;;  %s5746_s22 = sphi %s5806_s22, %s8119_s22   ;;  %s5742_s21 = sphi %s5804_s21, %s8118_s21  }
   0x6   : > { %s33_s29 = sadd.s32 1, %s5758_s25  ;;  %s178_s30 = sadd.s32 1, %s5750_s23 }
   0x7   : > { %p35_p0 = scmp.ge.s32.totalorder %s33_s29, 2  ;;  %p188_p1 = scmp.ne.s32.totalorder %s5750_s23, %s5746_s22 }
   0x8   : > { %p189_p2 = scmp.eq.s32.totalorder %s4144_s27, 1  ;;  %p194_p3 = scmp.ne.s32.totalorder %s5746_s22, %s5742_s21 }
   0x9   : > { %s8124_s29 = smov (%p35_p0, %s33_s29), 0  ;;  %p195_p5 = scmp.eq.s32.totalorder %s4145_s28, 1 }
   0xa   : > { %p5844_p4 = por %p189_p2, %p188_p1  ;;  %s175_s8 = ssub.s32 %s5758_s25, %s8124_s29 }
   0xb   : > { %p4146_p6 = scmp.ge.s32.totalorder %s5762_s26, 1  ;;  %p176_p7 = scmp.eq.s32.totalorder %s175_s8, 0 }
   0xc   : > { %p5851_p8 = por %p195_p5, %p194_p3  ;;  %p202_p9 = scmp.lt.s32.totalorder %s5762_s26, 3 }
   0xd   : > { %s5857_s10 = scalar_select %p176_p7, %s5750_s23, %s178_s30  }
   0xe   : > { %p5859_p10 = pnand %p4146_p6, %p202_p9  ;;  %p5863_p11 = scmp.eq.s32.totalorder %s4144_s27, 0 }
   0xf   : > { %s215_s15 = sshll.u32 %s7994_s0, 4  ;;  %s216_s15 = int_to_ptr.vmem [resolvable:$true] %s215_s15 }
  0x10   : > { %p5580_p12 = pneg %p5859_p10  ;;  %s5665_s16 = scalar_lea.vmem %s216_s15, 32 }
  0x11   : > { %p5666_p0 = scmp.ne.s32.totalorder %s216_s15, %s5665_s16  ;;  %p5673_p5 = scmp.lt.s32.totalorder %s216_s15, %s216_s15 }
  0x12   : > { %p5581_p13 = pnand %p5863_p11, %p5580_p12  ;;  %p5674_p6 = scmp.lt.s32.totalorder %s5665_s16, %s5665_s16 }
  0x14   : > { %p5667_p1 = pneg %p5581_p13  ;;  %p5675_p7 = por %p5674_p6, %p5673_p5 }
  0x16   : > { %p5668_p2 = pnand %p5667_p1, %p5666_p0 }
  0x18   : > { %p5669_p3 = pneg %p5668_p2 }
  0x1a   : > { %p5676_p9 = pnand %p5675_p7, %p5669_p3 }
  0x1c   : > { %5679 = shalt.err (!%p5676_p9)
}
  0x1d   : > { %s5764_s17 = smov [#allocation4]   ;;  %245 = sbr.rel (%p5859_p10) target bundleno = 736 (0x2e0), region = 40 }
  0x1e   : > { %5583 = dma.vmem_to_smem (!%p5581_p13), %s216_s15, 32, %s5764_s17, [#allocation6]  }
  0x24   : > { %5733 = dma.done.wait (%p5863_p11), [#allocation6], 32  }
  0x25   : > { %5735 = vsyncadd (%p5863_p11), [#allocation6], 4294967264 }
  0x26   : > { %251 = sfence }
  0x27   : > { %p284_p12 = scmp.lt.s32.totalorder %s5754_s24, 1  ;;  %vm1435_vm0 = vcmask 523264   ;;  %v5765_v0 = vmov 0   ;;  %s5920_s18 = sshll.u32 %s5754_s24, 7  ;;  %v5934_v1 = vld [vmem:[%s7996_s2 + $0x40] sm:$0xff]   ;;  %v5987_v15 = vld [vmem:[%s7996_s2 + $0x48] sm:$0xff]  }
  0x28   : > { %1473 = vst.msk [vmem:[#allocation2 + $0x18] sm:$0xff] %vm1435_vm0, %v5765_v0  ;;  %1472 = vst.msk [vmem:[#allocation2] sm:$0xff] %vm1435_vm0, %v5765_v0  ;;  %v5939_v2 = vld [vmem:[%s7996_s2 + $0x160] sm:$0xff]   ;;  %s523_s11 = sadd.s32 1, %s5920_s18  ;;  %v4589_v12 = vunpack.c.l.bf16 %v5934_v1  ;;  %v4590_v13 = vunpack.c.h.bf16 %v5934_v1  ;;  %s5993_s20 = sld [smem:[#allocation4 + %s5920_s18]]  ;;  %v6007_v28 = vld [vmem:[%s7996_s2 + $0x168] sm:$0xff]  }
  0x29   : > { %1474 = vst.msk [vmem:[#allocation2 + $0x30] sm:$0xff] %vm1435_vm0, %v5765_v0  ;;  %1475 = vst.msk [vmem:[#allocation2 + $0x48] sm:$0xff] %vm1435_vm0, %v5765_v0  ;;  %s5925_s19 = scalar_select %p284_p12, %s5754_s24, 1  ;;  %v5946_v3 = vld [vmem:[%s7996_s2 + $0x280] sm:$0xff]   ;;  %v4733_v14 = vunpack.c.l.bf16 %v5939_v2  ;;  %v4734_v20 = vunpack.c.h.bf16 %v5939_v2  ;;  %v6012_v29 = vld [vmem:[%s7996_s2 + $0x288] sm:$0xff]   ;;  %vm1580_vm3 = vcmask 516096  }
  0x2a   : > { %1476 = vst.msk [vmem:[#allocation2 + $0x60] sm:$0xff] %vm1435_vm0, %v5765_v0  ;;  %1477 = vst.msk [vmem:[#allocation2 + $0x78] sm:$0xff] %vm1435_vm0, %v5765_v0  ;;  %v5951_v4 = vld [vmem:[%s7996_s2 + $0x3a0] sm:$0xff]   ;;  %s5995_s27 = sld [smem:[#allocation4 + %s523_s11]]  ;;  %s5766_s14 = smov 64   ;;  %v6033_v43 = vld [vmem:[%s7996_s2 + $0x3a8] sm:$0xff]  }
  0x2b   : > { %1478 = vst.msk [vmem:[#allocation2 + $0x90] sm:$0xff] %vm1435_vm0, %v5765_v0  ;;  %1479 = vst.msk [vmem:[#allocation2 + $0xa8] sm:$0xff] %vm1435_vm0, %v5765_v0  ;;  %s4521_s8 = sshll.u32 %s5925_s19, 8  ;;  %v5956_v5 = vld [vmem:[%s7996_s2] sm:$0xff]   ;;  %v6042_v49 = vld [vmem:[%s7996_s2 + $0x8] sm:$0xff]   ;;  %s4522_s11 = sshll.u32 %s5925_s19, 7 }
  0x2c   : > { %1480 = vst.msk [vmem:[#allocation2 + $0xc0] sm:$0xff] %vm1435_vm0, %v5765_v0  ;;  %1481 = vst.msk [vmem:[#allocation2 + $0xd8] sm:$0xff] %vm1435_vm0, %v5765_v0  ;;  %s5961_s28 = scalar_lea.vmem %s7995_s1, %s4521_s8  ;;  %v5966_v6 = vld [vmem:[%s7996_s2 + $0x120] sm:$0xff]   ;;  %vm1618_vm1 = vsmask.f32 256  ;;  %vm3858_vm4 = vcmask 519168   ;;  %s7719_s19 = scalar_lea.vmem %s7999_s5, %s4522_s11 }
  0x2d   : > { %1482 = vst.msk [vmem:[#allocation2 + $0xf0] sm:$0xff] %vm1435_vm0, %v5765_v0  ;;  %1483 = vst.msk [vmem:[#allocation2 + $0x108] sm:$0xff] %vm1435_vm0, %v5765_v0  ;;  %v5971_v7 = vld [vmem:[%s7996_s2 + $0x240] sm:$0xff]   ;;  %v1516_v10 = vld [vmem:[%s5961_s28 + $0x8] sm:$0xff]  ;;  %vm1827_vm2 = vsmask.f32 7424 }
  0x2e   : > { %1484 = vst.msk [vmem:[#allocation2 + $0x120] sm:$0xff] %vm1435_vm0, %v5765_v0  ;;  %1485 = vst.msk [vmem:[#allocation2 + $0x138] sm:$0xff] %vm1435_vm0, %v5765_v0  ;;  %v5976_v8 = vld [vmem:[%s7996_s2 + $0x360] sm:$0xff]   ;;  %v1540_v17 = vld [vmem:[%s5961_s28 + $0xc8] sm:$0xff]  ;;  %s4518_s16 = sshll.u32 %s5754_s24, 4  ;;  %s5768_s24 = smov [#allocation7]  }
  0x2f   : > { %1486 = vst.msk [vmem:[#allocation2 + $0x150] sm:$0xff] %vm1435_vm0, %v5765_v0  ;;  %1487 = vst.msk [vmem:[#allocation2 + $0x168] sm:$0xff] %vm1435_vm0, %v5765_v0  ;;  %v1515_v9 = vld [vmem:[%s5961_s28] sm:$0xff]  ;;  %v1537_v18 = vld [vmem:[%s5961_s28 + $0xb0] sm:$0xff]  ;;  %s5684_s12 = sshll.u32 %s5768_s24, 4  ;;  %s5685_s12 = int_to_ptr.vmem [resolvable:$false] %s5684_s12 }
  0x30   : > { %1488 = vst.msk [vmem:[#allocation2 + $0x180] sm:$0xff] %vm1435_vm0, %v5765_v0  ;;  %1489 = vst.msk [vmem:[#allocation2 + $0x198] sm:$0xff] %vm1435_vm0, %v5765_v0  ;;  %v1539_v11 = vld [vmem:[%s5961_s28 + $0xc0] sm:$0xff]  ;;  %v1547_v16 = vpack.c.bf16 %v1516_v10, %v1515_v9  ;;  %v1538_v19 = vld [vmem:[%s5961_s28 + $0xb8] sm:$0xff]  ;;  %s5686_s11 = scalar_lea.vmem %s5685_s12, 32 }
  0x31   : > { %1490 = vst.msk [vmem:[#allocation2 + $0x10] sm:$0xff] %vm1435_vm0, %v5765_v0  ;;  %1491 = vst.msk [vmem:[#allocation2 + $0x28] sm:$0xff] %vm1435_vm0, %v5765_v0  ;;  %v1559_v24 = vpack.c.bf16 %v1540_v17, %v1539_v11  ;;  %v1558_v25 = vpack.c.bf16 %v1538_v19, %v1537_v18  ;;  %v4372_v30 = vld [vmem:[#allocation2 + $0x18] sm:$0x80]  ;;  %v1517_v31 = vld [vmem:[%s5961_s28 + $0x10] sm:$0xff] }
  0x32   : > { %1492 = vst.msk [vmem:[#allocation2 + $0x40] sm:$0xff] %vm1435_vm0, %v5765_v0  ;;  %1493 = vst.msk [vmem:[#allocation2 + $0x58] sm:$0xff] %vm1435_vm0, %v5765_v0  ;;  %v1518_v32 = vld [vmem:[%s5961_s28 + $0x18] sm:$0xff]  ;;  %v1541_v38 = vld [vmem:[%s5961_s28 + $0xd0] sm:$0xff]  ;;  %v1977_v50 = vshrl.u32 %v4372_v30, 16 }
  0x33   : > { %1494 = vst.msk [vmem:[#allocation2 + $0x70] sm:$0xff] %vm1435_vm0, %v5765_v0  ;;  %1495 = vst.msk [vmem:[#allocation2 + $0x88] sm:$0xff] %vm1435_vm0, %v5765_v0  ;;  %v1548_v37 = vpack.c.bf16 %v1518_v32, %v1517_v31  ;;  %v1542_v39 = vld [vmem:[%s5961_s28 + $0xd8] sm:$0xff]  ;;  %v4374_v51 = vld [vmem:[#allocation2 + $0x30] sm:$0x80]  ;;  %v6064_v31 = vstv %s5993_s20  ;;  %v6067_v32 = vstv %s5995_s27  ;;  %s815_s20 = sadd.s32 2, %s5920_s18 }
  0x34   : > { %1496 = vst.msk [vmem:[#allocation2 + $0xa0] sm:$0xff] %vm1435_vm0, %v5765_v0  ;;  %1497 = vst.msk [vmem:[#allocation2 + $0xb8] sm:$0xff] %vm1435_vm0, %v5765_v0  ;;  %v1560_v52 = vpack.c.bf16 %v1542_v39, %v1541_v38  ;;  %v1519_v53 = vld [vmem:[%s5961_s28 + $0x20] sm:$0xff]  ;;  %v1520_v54 = vld [vmem:[%s5961_s28 + $0x28] sm:$0xff]  ;;  %v1979_v38 = vrot.slane %v1977_v50, 7  ;;  %v1989_v39 = vshrl.u32 %v4374_v51, 16 }
  0x35   : > { %1498 = vst.msk [vmem:[#allocation2 + $0xd0] sm:$0xff] %vm1435_vm0, %v5765_v0  ;;  %1499 = vst.msk [vmem:[#allocation2 + $0xe8] sm:$0xff] %vm1435_vm0, %v5765_v0  ;;  %v4396_v44 = vld [vmem:[#allocation2 + $0x138] sm:$0x80]  ;;  %v1549_v58 = vpack.c.bf16 %v1520_v54, %v1519_v53  ;;  %v1543_v59 = vld [vmem:[%s5961_s28 + $0xe0] sm:$0xff]  ;;  %s1107_s27 = sadd.s32 3, %s5920_s18 }
  0x36   : > { %1500 = vst.msk [vmem:[#allocation2 + $0x100] sm:$0xff] %vm1435_vm0, %v5765_v0  ;;  %1501 = vst.msk [vmem:[#allocation2 + $0x118] sm:$0xff] %vm1435_vm0, %v5765_v0  ;;  %v4398_v57 = vld [vmem:[#allocation2 + $0x150] sm:$0x80]  ;;  %v1544_v60 = vld [vmem:[%s5961_s28 + $0xe8] sm:$0xff]  ;;  %v2121_v19 = vshrl.u32 %v4396_v44, 16 }
  0x37   : > { %1502 = vst.msk [vmem:[#allocation2 + $0x130] sm:$0xff] %vm1435_vm0, %v5765_v0  ;;  %1503 = vst.msk [vmem:[#allocation2 + $0x148] sm:$0xff] %vm1435_vm0, %v5765_v0  ;;  %v1561_v10 = vpack.c.bf16 %v1544_v60, %v1543_v59  ;;  %v1521_v11 = vld [vmem:[%s5961_s28 + $0x30] sm:$0xff]  ;;  %v1546_v30 = vld [vmem:[%s5961_s28 + $0xf8] sm:$0xff]  ;;  %v1991_v50 = vrot.slane %v1989_v39, 7  ;;  %s6281_s30 = sld [smem:[#allocation4 + %s815_s20]] }
  0x38   : > { %1504 = vst.msk [vmem:[#allocation2 + $0x160] sm:$0xff] %vm1435_vm0, %v5765_v0  ;;  %1505 = vst.msk [vmem:[#allocation2 + $0x178] sm:$0xff] %vm1435_vm0, %v5765_v0  ;;  %v1545_v17 = vld [vmem:[%s5961_s28 + $0xf0] sm:$0xff]  ;;  %v1523_v54 = vld [vmem:[%s5961_s28 + $0x40] sm:$0xff]  ;;  %v2123_v18 = vrot.slane %v2121_v19, 7  ;;  %s6283_s18 = sld [smem:[#allocation4 + %s1107_s27]] }
  0x39   : > { %1506 = vst.msk [vmem:[#allocation2 + $0x190] sm:$0xff] %vm1435_vm0, %v5765_v0  ;;  %1507 = vst.msk [vmem:[#allocation2 + $0x1a8] sm:$0xff] %vm1435_vm0, %v5765_v0  ;;  %v1562_v53 = vpack.c.bf16 %v1546_v30, %v1545_v17  ;;  %v1524_v59 = vld [vmem:[%s5961_s28 + $0x48] sm:$0xff]  ;;  %v4378_v56 = vld [vmem:[#allocation2 + $0x60] sm:$0x80] }
  0x3a   : > { %1509 = vst.msk [vmem:[#allocation2 + $0x8] sm:$0xff] %vm1435_vm0, %v5765_v0  ;;  %1513 = vst.msk [vmem:[#allocation2 + $0x1a0] sm:$0xff] %vm1435_vm0, %v5765_v0  ;;  %v1525_v22 = vld [vmem:[%s5961_s28 + $0x50] sm:$0xff]  ;;  %v1526_v21 = vld [vmem:[%s5961_s28 + $0x58] sm:$0xff] }
  0x3b   : > { %1508 = vst.msk [vmem:[#allocation2] sm:$0xff] %vm1435_vm0, %v5765_v0  ;;  %1510 = vst.msk [vmem:[#allocation2 + $0x10] sm:$0xff] %vm1435_vm0, %v5765_v0 }
  0x3c   : > { %1512 = vst.msk [vmem:[#allocation2 + $0x198] sm:$0xff] %vm1435_vm0, %v5765_v0  ;;  %1514 = vst.msk [vmem:[#allocation2 + $0x1a8] sm:$0xff] %vm1435_vm0, %v5765_v0  ;;  %v1551_v0 = vpack.c.bf16 %v1524_v59, %v1523_v54  ;;  %v6097_v59 = vmul.f32 %v4589_v12, %v6064_v31 }
  0x3d   : > { %1564 = vst.msk [vmem:[#allocation2 + $0x20] sm:$0xff] %vm1435_vm0, %v1547_v16  ;;  %1576 = vst.msk [vmem:[#allocation2 + $0x140] sm:$0xff] %vm1435_vm0, %v1559_v24  ;;  %v1522_v16 = vld [vmem:[%s5961_s28 + $0x38] sm:$0xff]  ;;  %v4376_v24 = vld [vmem:[#allocation2 + $0x48] sm:$0x80] }
  0x3e   : > { %1575 = vst.msk [vmem:[#allocation2 + $0x128] sm:$0xff] %vm1435_vm0, %v1558_v25  ;;  %1565 = vst.msk [vmem:[#allocation2 + $0x38] sm:$0xff] %vm1435_vm0, %v1548_v37  ;;  %v1550_v25 = vpack.c.bf16 %v1522_v16, %v1521_v11  ;;  %v4400_v16 = vld [vmem:[#allocation2 + $0x168] sm:$0x80]  ;;  %v2001_v17 = vshrl.u32 %v4376_v24, 16 }
  0x3f   : > { %1577 = vst.msk [vmem:[#allocation2 + $0x158] sm:$0xff] %vm1435_vm0, %v1560_v52  ;;  %1566 = vst.msk [vmem:[#allocation2 + $0x50] sm:$0xff] %vm1435_vm0, %v1549_v58  ;;  %v2133_v52 = vshrl.u32 %v4398_v57, 16  ;;  %v2145_v63 = vshrl.u32 %v4400_v16, 16 }
  0x40   : > { %1578 = vst.msk [vmem:[#allocation2 + $0x170] sm:$0xff] %vm1435_vm0, %v1561_v10  ;;  %1567 = vst.msk [vmem:[#allocation2 + $0x68] sm:$0xff] %vm1435_vm0, %v1550_v25  ;;  %v6115_v39 = vrot.slane %v2001_v17, 7  ;;  %v6131_v17 = vmul.f32 %v4733_v14, %v6067_v32 }
  0x41   : > { %v6000_v23 = vld [vmem:[#allocation2 + $0x8] sm:$0xff]  ;;  %1579 = vst.msk [vmem:[#allocation2 + $0x188] sm:$0xff] %vm1435_vm0, %v1562_v53  ;;  %1568 = vst.msk [vmem:[#allocation2 + $0x80] sm:$0xff] %vm1435_vm0, %v1551_v0  ;;  %v2135_v61 = vrot.slane %v2133_v52, 7 }
  0x42   : > { %2668 = vrot.lane.b32.xlu1 %v6000_v23, %s5766_s14  ;;  %v8001_v9 = vshll.u32 %v6000_v23, 16 }
  0x44   : > { %v6069_v37 = vld [vmem:[#allocation2 + $0x20] sm:$0xff]  ;;  %v6084_v51 = vrot.slane %v8001_v9, 1 }
  0x45   : > { %v1981_v44 = vshrl.u32 %v6069_v37, 16  ;;  %v1984_v58 = vshll.u32 %v6069_v37, 16  ;;  %v6076_v60 = vld [vmem:[#allocation2 + $0x140] sm:$0xff]  ;;  %v6078_v11 = vld [vmem:[#allocation2 + $0x128] sm:$0xff]  ;;  %v6091_v25 = vld [vmem:[#allocation2 + $0x38] sm:$0xff] }
  0x46   : > { %v8002_v57 = vshrl.u32 %v6076_v60, 16  ;;  %v8003_v10 = vshll.u32 %v6076_v60, 16  ;;  %2692 = vrot.lane.b32.xlu1 %v6078_v11, %s5766_s14  ;;  %v1993_v24 = vshrl.u32 %v6091_v25, 16  ;;  %v1996_v19 = vshll.u32 %v6091_v25, 16  ;;  %v6105_v62 = vld [vmem:[#allocation2 + $0x158] sm:$0xff] }
  0x47   : > { %v1983_v30 = vrot.slane %v1981_v44, 7  ;;  %v1835_v54 = vrot.slane %v1984_v58, 1  ;;  %v8005_v16 = vshll.u32 %v6105_v62, 16 }
  0x48   : > { %v2127_v9 = vrot.slane %v8002_v57, 7  ;;  %v1995_v55 = vrot.slane %v1993_v24, 7  ;;  %v6113_v57 = vld [vmem:[#allocation2 + $0x50] sm:$0xff]  ;;  %v1842_v14 = vrot.slane %v1996_v19, 1  ;;  %v6144_v45 = vld [vmem:[#allocation2 + $0x188] sm:$0xff]  ;;  %v6161_v35 = vld [vmem:[#allocation2 + $0x80] sm:$0xff] }
  0x49   : > { %v6102_v53 = vor.u32 %v1984_v58, %v1983_v30  ;;  %v6107_v0 = vor.u32 %v1981_v44, %v1835_v54  ;;  %v6120_v58 = vmul.f32 %v4590_v13, %v6064_v31  ;;  %v8004_v44 = vshrl.u32 %v6105_v62, 16  ;;  %v6126_v30 = vld [vmem:[#allocation2 + $0x170] sm:$0xff]  ;;  %v6137_v54 = vld [vmem:[#allocation2 + $0x68] sm:$0xff]  ;;  %8050 = vst [vmem:[#allocation15_spill] sm:$0xff] %v6144_v45 }
  0x4a   : > { %v6111_v12 = vor.u32 %v8003_v10, %v2127_v9  ;;  %8048 = vst [vmem:[#allocation13_spill] sm:$0xff] %v6126_v30  ;;  %v4402_v9 = vld [vmem:[#allocation2 + $0x180] sm:$0x80]  ;;  %v2005_v13 = vshrl.u32 %v6113_v57, 16  ;;  %v2013_v10 = vshrl.u32 %v4378_v56, 16  ;;  %v6139_v48 = vor.u32 %v1996_v19, %v1995_v55 }
  0x4b   : > { %8045 = vst [vmem:[#allocation10_spill] sm:$0xff] %v6102_v53  ;;  %8046 = vst [vmem:[#allocation11_spill] sm:$0xff] %v6107_v0  ;;  %v1987_v52 = vsel %vm1618_vm1, %v1979_v38, %v6102_v53  ;;  %v2147_v38 = vrot.slane %v2145_v63, 7  ;;  %v2139_v47 = vrot.slane %v8004_v44, 7  ;;  %v8006_v46 = vshrl.u32 %v6126_v30, 16 }
  0x4c   : > { %8047 = vst [vmem:[#allocation12_spill] sm:$0xff] %v6111_v12  ;;  %2700 = vrot.lane.b32.xlu0 %v1987_v52, %s5766_s14  ;;  %v2131_v1 = vsel %vm1618_vm1, %v2123_v18, %v6111_v12  ;;  %8049 = vst [vmem:[#allocation14_spill] sm:$0xff] %v6139_v48  ;;  %v8009_v52 = vshrl.u32 %v6078_v11, 16  ;;  %v8007_v18 = vshll.u32 %v6126_v30, 16  ;;  %v2017_v42 = vshrl.u32 %v6137_v54, 16 }
  0x4d   : > { %v2157_v63 = vshrl.u32 %v4402_v9, 16  ;;  %v6151_v56 = vor.u32 %v8005_v16, %v2139_v47  ;;  %v2008_v55 = vshll.u32 %v6113_v57, 16  ;;  %v2151_v44 = vrot.slane %v8006_v46, 7 }
  0x4e   : > { %v6156_v41 = vor.u32 %v1993_v24, %v1842_v14  ;;  %v2007_v19 = vrot.slane %v2005_v13, 7  ;;  %v2019_v40 = vrot.slane %v2017_v42, 7  ;;  %v2020_v36 = vshll.u32 %v6137_v54, 16 }
  0x4f   : > { %8051 = vst [vmem:[#allocation16_spill] sm:$0xff] %v6151_v56  ;;  %v8008_v9 = vshrl.u32 %v6144_v45, 16  ;;  %v8011_v47 = vshll.u32 %v6078_v11, 16  ;;  %v1999_v16 = vsel %vm1618_vm1, %v1991_v50, %v6139_v48  ;;  %v2143_v24 = vsel %vm1618_vm1, %v2135_v61, %v6151_v56  ;;  %v1527_v56 = vld [vmem:[%s5961_s28 + $0x60] sm:$0xff] }
  0x50   : > { %8052 = vst [vmem:[#allocation17_spill] sm:$0xff] %v6156_v41  ;;  %2724 = vrot.lane.b32.xlu0 %v2131_v1, %s5766_s14  ;;  %v1849_v14 = vrot.slane %v2008_v55, 1  ;;  %v4380_v1 = vld [vmem:[#allocation2 + $0x78] sm:$0x80]  ;;  %v1770_v46 = vrot.slane %v8009_v52, 7  ;;  %2726 = vrot.lane.b32.xlu1 %v2143_v24, %s5766_s14  ;;  %v6173_v34 = vor.u32 %v8007_v18, %v2151_v44  ;;  %v2015_v50 = vrot.slane %v2013_v10, 7 }
  0x51   : > { %v2163_v33 = vrot.slane %v8008_v9, 7  ;;  %v2029_v61 = vshrl.u32 %v6161_v35, 16  ;;  %v6186_v24 = vmul.f32 %v4734_v20, %v6067_v32  ;;  %v6189_v44 = vor.u32 %v2008_v55, %v2007_v19  ;;  %v4405_v55 = vld [vmem:[#allocation2 + $0x40] sm:$0x1] }
  0x52   : > { %8053 = vst [vmem:[#allocation18_spill] sm:$0xff] %v6173_v34  ;;  %v6178_v26 = vor.u32 %v2005_v13, %v1849_v14  ;;  %v6191_v18 = vor.u32 %v2020_v36, %v2019_v40  ;;  %v2159_v9 = vrot.slane %v2157_v63, 7  ;;  %v2025_v10 = vshrl.u32 %v4380_v1, 16  ;;  %v4404_v13 = vld [vmem:[#allocation2 + $0x28] sm:$0x1] }
  0x53   : > { %8055 = vst [vmem:[#allocation20_spill] sm:$0xff] %v6189_v44  ;;  %v2031_v14 = vrot.slane %v2029_v61, 7  ;;  %v2032_v52 = vshll.u32 %v6161_v35, 16  ;;  %v1856_v27 = vrot.slane %v2020_v36, 1  ;;  %v6196_v2 = vor.u32 %v8011_v47, %v1770_v46  ;;  %v4382_v1 = vld [vmem:[#allocation2 + $0x90] sm:$0x80] }
  0x54   : > { %8054 = vst [vmem:[#allocation19_spill] sm:$0xff] %v6178_v26  ;;  %2702 = vrot.lane.b32.xlu0 %v1999_v16, %s5766_s14  ;;  %8056 = vst [vmem:[#allocation21_spill] sm:$0xff] %v6191_v18  ;;  %2694 = vrot.lane.b32.xlu1 %v6076_v60, %s5766_s14  ;;  %v2155_v20 = vsel %vm1618_vm1, %v2147_v38, %v6173_v34  ;;  %v8057_v40 = vshll.u32 %v6144_v45, 16  ;;  %v1552_v63 = vpack.c.bf16 %v1526_v21, %v1525_v22  ;;  %v1528_v46 = vld [vmem:[%s5961_s28 + $0x68] sm:$0xff]  ;;  %v4406_v22 = vld [vmem:[#allocation2 + $0x58] sm:$0x1] }
  0x55   : > { %v6204_v19 = vor.u32 %v2017_v42, %v1856_v27  ;;  %v2187_v36 = vshll.u32 %v4404_v13, 16  ;;  %v2011_v38 = vsel %vm1618_vm1, %v6115_v39, %v6189_v44  ;;  %v1863_v21 = vrot.slane %v2032_v52, 1  ;;  %v1530_v47 = vld [vmem:[%s5961_s28 + $0x78] sm:$0xff]  ;;  %v4384_v34 = vld [vmem:[#allocation2 + $0xa8] sm:$0x80] }
  0x56   : > { %v2166_v16 = vor.u32 %v8057_v40, %v2163_v33  ;;  %v2023_v33 = vsel %vm1618_vm1, %v2015_v50, %v6191_v18  ;;  %1569 = vst.msk [vmem:[#allocation2 + $0x98] sm:$0xff] %vm1435_vm0, %v1552_v63  ;;  %v2027_v27 = vrot.slane %v2025_v10, 7  ;;  %v6216_v42 = vor.u32 %v2032_v52, %v2031_v14  ;;  %v1529_v40 = vld [vmem:[%s5961_s28 + $0x70] sm:$0xff]  ;;  %v4386_v18 = vld [vmem:[#allocation2 + $0xc0] sm:$0x80] }
  0x57   : > { %v2194_v13 = vshll.u32 %v4405_v55, 16  ;;  %v6221_v45 = vor.u32 %v2029_v61, %v1863_v21  ;;  %v1553_v39 = vpack.c.bf16 %v1528_v46, %v1527_v56  ;;  %v2189_v63 = vrot.slane %v2187_v36, 1  ;;  %v1531_v14 = vld [vmem:[%s5961_s28 + $0x80] sm:$0xff]  ;;  %v1532_v55 = vld [vmem:[%s5961_s28 + $0x88] sm:$0xff]  ;;  %v4407_v61 = vld [vmem:[#allocation2 + $0x70] sm:$0x1] }
  0x58   : > { %2670 = vrot.lane.b32.xlu0 %v6069_v37, %s5766_s14  ;;  %8058 = vst [vmem:[#allocation22_spill] sm:$0xff] %v6216_v42  ;;  %2728 = vrot.lane.b32.xlu1 %v2155_v20, %s5766_s14  ;;  %v2037_v37 = vshrl.u32 %v4382_v1, 16  ;;  %v2167_v50 = vsel %vm1618_vm1, %v2159_v9, %v2166_v16  ;;  %v2201_v52 = vshll.u32 %v4406_v22, 16  ;;  %v1554_v10 = vpack.c.bf16 %v1530_v47, %v1529_v40  ;;  %v4408_v36 = vld [vmem:[#allocation2 + $0x88] sm:$0x1]  ;;  %v1533_v21 = vld [vmem:[%s5961_s28 + $0x90] sm:$0xff] }
  0x59   : > { %1570 = vst.msk [vmem:[#allocation2 + $0xb0] sm:$0xff] %vm1435_vm0, %v1553_v39  ;;  %v2196_v20 = vrot.slane %v2194_v13, 1  ;;  %v2049_v1 = vshrl.u32 %v4384_v34, 16  ;;  %v6232_v56 = vsel %vm1618_vm1, %v2027_v27, %v6216_v42  ;;  %v2061_v16 = vshrl.u32 %v4386_v18, 16  ;;  %v1534_v34 = vld [vmem:[%s5961_s28 + $0x98] sm:$0xff] }
  0x5a   : > { %v6234_v9 = vrot.slane %v2037_v37, 7  ;;  %1571 = vst.msk [vmem:[#allocation2 + $0xc8] sm:$0xff] %vm1435_vm0, %v1554_v10  ;;  %v2203_v46 = vrot.slane %v2201_v52, 1  ;;  %v6245_v22 = vsel %vm1827_vm2, %v6107_v0, %v2189_v63  ;;  %v2208_v18 = vshll.u32 %v4407_v61, 16  ;;  %v4388_v40 = vld [vmem:[#allocation2 + $0xd8] sm:$0x80] }
  0x5b   : > { %v6251_v37 = vsel %vm1827_vm2, %v6156_v41, %v2196_v20  ;;  %v2051_v39 = vrot.slane %v2049_v1, 7  ;;  %v2215_v52 = vshll.u32 %v4408_v36, 16  ;;  %v6261_v20 = vrot.slane %v2061_v16, 7 }
  0x5c   : > { %2704 = vrot.lane.b32.xlu0 %v2011_v38, %s5766_s14  ;;  %2696 = vrot.lane.b32.xlu1 %v6105_v62, %s5766_s14  ;;  %v1555_v38 = vpack.c.bf16 %v1532_v55, %v1531_v14  ;;  %v1556_v14 = vpack.c.bf16 %v1534_v34, %v1533_v21  ;;  %v4390_v55 = vld [vmem:[#allocation2 + $0xf0] sm:$0x80]  ;;  %v6259_v61 = vsel %vm1827_vm2, %v6178_v26, %v2203_v46  ;;  %v2073_v1 = vshrl.u32 %v4388_v40, 16  ;;  %v4409_v34 = vld [vmem:[#allocation2 + $0xa0] sm:$0x1]  ;;  %v1536_v40 = vld [vmem:[%s5961_s28 + $0xa8] sm:$0xff] }
  0x5d   : > { %v6237_v47 = vld [vmem:[#allocation2 + $0x98] sm:$0xff]  ;;  %v2210_v21 = vrot.slane %v2208_v18, 1  ;;  %v2217_v44 = vrot.slane %v2215_v52, 1  ;;  %v2085_v16 = vshrl.u32 %v4390_v55, 16  ;;  %v1535_v26 = vld [vmem:[%s5961_s28 + $0xa0] sm:$0xff] }
  0x5e   : > { %v2041_v27 = vshrl.u32 %v6237_v47, 16  ;;  %v2044_v13 = vshll.u32 %v6237_v47, 16  ;;  %1572 = vst.msk [vmem:[#allocation2 + $0xe0] sm:$0xff] %vm1435_vm0, %v1555_v38  ;;  %1573 = vst.msk [vmem:[#allocation2 + $0xf8] sm:$0xff] %vm1435_vm0, %v1556_v14  ;;  %v2222_v14 = vshll.u32 %v4409_v34, 16 }
  0x5f   : > { %v6299_v53 = vsel %vm1827_vm2, %v6204_v19, %v2210_v21  ;;  %v6305_v0 = vsel %vm1827_vm2, %v6221_v45, %v2217_v44  ;;  %v4392_v21 = vld [vmem:[#allocation2 + $0x108] sm:$0x80] }
  0x60   : > { %2672 = vrot.lane.b32.xlu0 %v6091_v25, %s5766_s14  ;;  %2730 = vrot.lane.b32.xlu1 %v2167_v50, %s5766_s14  ;;  %v2043_v10 = vrot.slane %v2041_v27, 7  ;;  %v1870_v63 = vrot.slane %v2044_v13, 1  ;;  %v6255_v42 = vld [vmem:[#allocation2 + $0xb0] sm:$0xff] }
  0x61   : > { %v2053_v50 = vshrl.u32 %v6255_v42, 16  ;;  %v2056_v36 = vshll.u32 %v6255_v42, 16  ;;  %v6271_v46 = vld [vmem:[#allocation2 + $0xc8] sm:$0xff] }
  0x62   : > { %v6267_v38 = vor.u32 %v2041_v27, %v1870_v63  ;;  %v2065_v27 = vshrl.u32 %v6271_v46, 16  ;;  %v2068_v18 = vshll.u32 %v6271_v46, 16 }
  0x63   : > { %v2055_v48 = vrot.slane %v2053_v50, 7  ;;  %v1877_v63 = vrot.slane %v2056_v36, 1 }
  0x64   : > { %2706 = vrot.lane.b32.xlu0 %v2023_v33, %s5766_s14  ;;  %8059 = vst [vmem:[#allocation23_spill] sm:$0xff] %v6267_v38  ;;  %2698 = vrot.lane.b32.xlu1 %v6126_v30, %s5766_s14  ;;  %v6277_v33 = vor.u32 %v2044_v13, %v2043_v10  ;;  %v2067_v55 = vrot.slane %v2065_v27, 7  ;;  %v1884_v13 = vrot.slane %v2068_v18, 1  ;;  %v1557_v10 = vpack.c.bf16 %v1536_v40, %v1535_v26 }
  0x65   : > { %v6287_v52 = vor.u32 %v2056_v36, %v2055_v48  ;;  %v6289_v41 = vld [vmem:[#allocation2 + $0xe0] sm:$0xff]  ;;  %v6291_v30 = vor.u32 %v2053_v50, %v1877_v63  ;;  %v2075_v48 = vrot.slane %v2073_v1, 7  ;;  %v6311_v50 = vld [vmem:[#allocation2 + $0xf8] sm:$0xff] }
  0x66   : > { %8060 = vst [vmem:[#allocation24_spill] sm:$0xff] %v6277_v33  ;;  %v2077_v12 = vshrl.u32 %v6289_v41, 16  ;;  %v2080_v34 = vshll.u32 %v6289_v41, 16  ;;  %v6301_v36 = vor.u32 %v2065_v27, %v1884_v13  ;;  %1574 = vst.msk [vmem:[#allocation2 + $0x110] sm:$0xff] %vm1435_vm0, %v1557_v10  ;;  %v2047_v26 = vsel %vm1618_vm1, %v6234_v9, %v6277_v33 }
  0x67   : > { %8061 = vst [vmem:[#allocation25_spill] sm:$0xff] %v6287_v52  ;;  %v6315_v1 = vor.u32 %v2068_v18, %v2067_v55  ;;  %v8032_v44 = vshrl.u32 %v6311_v50, 16  ;;  %v2224_v27 = vrot.slane %v2222_v14, 1  ;;  %v6320_v63 = vsel %vm1618_vm1, %v2051_v39, %v6287_v52  ;;  %v4410_v14 = vld [vmem:[#allocation2 + $0xb8] sm:$0x1] }
  0x68   : > { %2674 = vrot.lane.b32.xlu0 %v6113_v57, %s5766_s14  ;;  %2780 = vrot.lane.b32.xlu1 %v6091_v25, %s5766_s14  ;;  %v2087_v25 = vrot.slane %v2085_v16, 7  ;;  %v1891_v40 = vrot.slane %v2080_v34, 1  ;;  %v2079_v9 = vrot.slane %v2077_v12, 7  ;;  %v2097_v18 = vshrl.u32 %v4392_v21, 16 }
  0x69   : > { %8062 = vst [vmem:[#allocation26_spill] sm:$0xff] %v6315_v1  ;;  %v2091_v16 = vrot.slane %v8032_v44, 7  ;;  %v759_v55 = vadd.f32 %v6131_v17, %v6097_v59  ;;  %v760_v39 = vadd.f32 %v6186_v24, %v6120_v58  ;;  %v6334_v10 = vstv %s6281_s30  ;;  %s7943_s30 = scalar_lea.hbm %s8000_s6, %s4518_s16 }
  0x6a   : > { %v6322_v13 = vor.u32 %v2077_v12, %v1891_v40  ;;  %v6337_v12 = vstv %s6283_s18  ;;  %v6348_v40 = vsel %vm1827_vm2, %v6267_v38, %v2224_v27  ;;  %v8063_v59 = vunpack.c.l.bf16 %v5946_v3 }
  0x6b   : > { %v8064_v17 = vunpack.c.h.bf16 %v5946_v3  ;;  %v6356_v21 = vor.u32 %v2080_v34, %v2079_v9  ;;  %v8066_v27 = vunpack.c.h.bf16 %v5951_v4  ;;  %v2229_v52 = vshll.u32 %v4410_v14, 16 }
  0x6c   : > { %2708 = vrot.lane.b32.xlu0 %v6232_v56, %s5766_s14  ;;  %2732 = vrot.lane.b32.xlu1 %v6245_v22, %s5766_s14  ;;  %v6344_v22 = vsel %vm1618_vm1, %v6261_v20, %v6315_v1  ;;  %v979_v58 = vmul.f32 %v8063_v59, %v6334_v10  ;;  %v8065_v20 = vunpack.c.l.bf16 %v5951_v4  ;;  %v8067_v59 = vshll.u32 %v6311_v50, 16 }
  0x6d   : > { %v980_v24 = vmul.f32 %v8064_v17, %v6334_v10  ;;  %v6358_v44 = vld [vmem:[#allocation2 + $0x110] sm:$0xff]  ;;  %v1272_v1 = vmul.f32 %v8066_v27, %v6337_v12  ;;  %v6372_v34 = vrot.slane %v2097_v18, 7  ;;  %v8069_v4 = vunpack.c.h.bf16 %v5956_v5 }
  0x6e   : > { %v1271_v56 = vmul.f32 %v8065_v20, %v6337_v12  ;;  %v6370_v3 = vor.u32 %v8067_v59, %v2091_v16  ;;  %v2101_v9 = vshrl.u32 %v6358_v44, 16  ;;  %v1051_v17 = vadd.f32 %v979_v58, %v759_v55 }
  0x6f   : > { %v1052_v33 = vadd.f32 %v980_v24, %v760_v39  ;;  %v8068_v20 = vunpack.c.l.bf16 %v5956_v5  ;;  %v452_v14 = vmul.f32 %v8069_v4, %v6064_v31  ;;  %v8070_v18 = vunpack.c.l.bf16 %v5966_v6 }
  0x70   : > { %2676 = vrot.lane.b32.xlu0 %v6137_v54, %s5766_s14  ;;  %2782 = vrot.lane.b32.xlu1 %v6113_v57, %s5766_s14  ;;  %v2104_v57 = vshll.u32 %v6358_v44, 16  ;;  %v1343_v16 = vadd.f32 %v1271_v56, %v1051_v17  ;;  %v8071_v55 = vunpack.c.h.bf16 %v5966_v6  ;;  %v2231_v24 = vrot.slane %v2229_v52, 1 }
  0x71   : > { %v451_v38 = vmul.f32 %v8068_v20, %v6064_v31  ;;  %v671_v27 = vmul.f32 %v8070_v18, %v6067_v32  ;;  %v1344_v58 = vadd.f32 %v1272_v1, %v1052_v33  ;;  %v8072_v59 = vunpack.c.l.bf16 %v5971_v7 }
  0x72   : > { %v672_v39 = vmul.f32 %v8071_v55, %v6067_v32  ;;  %v2103_v56 = vrot.slane %v2101_v9, 7  ;;  %v8074_v6 = vunpack.c.l.bf16 %v5976_v8  ;;  %v6404_v52 = vsel %vm1618_vm1, %v2075_v48, %v6356_v21 }
  0x73   : > { %v963_v5 = vmul.f32 %v8072_v59, %v6334_v10  ;;  %v743_v17 = vadd.f32 %v671_v27, %v451_v38  ;;  %v1407_v1 = vpack.c.bf16 %v1344_v58, %v1343_v16  ;;  %v6416_v38 = vsel %vm1618_vm1, %v2087_v25, %v6370_v3 }
  0x74   : > { %2710 = vrot.lane.b32.xlu0 %v2047_v26, %s5766_s14  ;;  %v8073_v26 = vunpack.c.h.bf16 %v5971_v7  ;;  %2734 = vrot.lane.b32.xlu1 %v6251_v37, %s5766_s14  ;;  %v744_v4 = vadd.f32 %v672_v39, %v452_v14  ;;  %v1255_v33 = vmul.f32 %v8074_v6, %v6337_v12  ;;  %v8075_v7 = vunpack.c.h.bf16 %v5976_v8 }
  0x75   : > { %v8076_v37 = vunpack.c.l.bf16 %v5987_v15  ;;  %v1035_v14 = vadd.f32 %v963_v5, %v743_v17  ;;  %v8077_v48 = vunpack.c.h.bf16 %v5987_v15  ;;  %1444 = vst.msk [vmem:[#allocation3 + $0x40] sm:$0xff] %vm1435_vm0, %v1407_v1  ;;  %v6424_v8 = vsel %vm1827_vm2, %v6291_v30, %v2231_v24 }
  0x76   : > { %v964_v20 = vmul.f32 %v8073_v26, %v6334_v10  ;;  %v1256_v18 = vmul.f32 %v8075_v7, %v6337_v12  ;;  %v8078_v39 = vunpack.c.l.bf16 %v6007_v28  ;;  %v8079_v25 = vunpack.c.h.bf16 %v6007_v28  ;;  %v5167_v28 = vld [vmem:[%s7996_s2 + $0x128] sm:$0xff]  }
  0x77   : > { %v469_v55 = vmul.f32 %v8076_v37, %v6064_v31  ;;  %v470_v16 = vmul.f32 %v8077_v48, %v6064_v31  ;;  %v8080_v5 = vunpack.c.l.bf16 %v6012_v29  ;;  %v6439_v15 = vor.u32 %v2104_v57, %v2103_v56 }
  0x78   : > { %2678 = vrot.lane.b32.xlu0 %v6161_v35, %s5766_s14  ;;  %v1036_v27 = vadd.f32 %v964_v20, %v744_v4  ;;  %v689_v58 = vmul.f32 %v8078_v39, %v6067_v32  ;;  %v690_v59 = vmul.f32 %v8079_v25, %v6067_v32  ;;  %2784 = vrot.lane.b32.xlu1 %v6137_v54, %s5766_s14  ;;  %v8081_v17 = vunpack.c.h.bf16 %v6012_v29  ;;  %v5239_v29 = vld [vmem:[%s7996_s2 + $0x368] sm:$0xff]   ;;  %v6470_v25 = vld [vmem:[#allocation2 + $0x120] sm:$0x80] }
  0x79   : > { %v981_v26 = vmul.f32 %v8080_v5, %v6334_v10  ;;  %v1327_v24 = vadd.f32 %v1255_v33, %v1035_v14  ;;  %v8082_v7 = vunpack.c.l.bf16 %v6033_v43  ;;  %v8083_v56 = vunpack.c.h.bf16 %v6033_v43  ;;  %v5203_v33 = vld [vmem:[%s7996_s2 + $0x248] sm:$0xff]  }
  0x7a   : > { %v1328_v20 = vadd.f32 %v1256_v18, %v1036_v27  ;;  %v982_v4 = vmul.f32 %v8081_v17, %v6334_v10  ;;  %v761_v6 = vadd.f32 %v689_v58, %v469_v55  ;;  %v762_v1 = vadd.f32 %v690_v59, %v470_v16 }
  0x7b   : > { %v1273_v54 = vmul.f32 %v8082_v7, %v6337_v12  ;;  %v1274_v37 = vmul.f32 %v8083_v56, %v6337_v12  ;;  %v8084_v55 = vunpack.c.l.bf16 %v6042_v49  ;;  %v8085_v43 = vunpack.c.h.bf16 %v6042_v49 }
  0x7c   : > { %2712 = vrot.lane.b32.xlu0 %v6320_v63, %s5766_s14  ;;  %v1399_v18 = vpack.c.bf16 %v1328_v20, %v1327_v24  ;;  %v1053_v48 = vadd.f32 %v981_v26, %v761_v6  ;;  %v1054_v16 = vadd.f32 %v982_v4, %v762_v1  ;;  %v4705_v39 = vunpack.c.l.bf16 %v5167_v28  ;;  %2736 = vrot.lane.b32.xlu1 %v6259_v61, %s5766_s14  ;;  %v5140_v26 = vld [vmem:[%s7996_s2 + $0x50] sm:$0xff]  }
  0x7d   : > { %v453_v14 = vmul.f32 %v8084_v55, %v6064_v31  ;;  %v454_v27 = vmul.f32 %v8085_v43, %v6064_v31  ;;  %v4706_v58 = vunpack.c.h.bf16 %v5167_v28  ;;  %v4849_v63 = vunpack.c.l.bf16 %v5203_v33  ;;  %v5176_v61 = vld [vmem:[%s7996_s2 + $0x170] sm:$0xff]  }
  0x7e   : > { %1436 = vst.msk [vmem:[#allocation3] sm:$0xff] %vm1435_vm0, %v1399_v18  ;;  %v4850_v59 = vunpack.c.h.bf16 %v5203_v33  ;;  %v4993_v5 = vunpack.c.l.bf16 %v5239_v29  ;;  %v1345_v24 = vadd.f32 %v1273_v54, %v1053_v48  ;;  %v1346_v20 = vadd.f32 %v1274_v37, %v1054_v16  ;;  %v3061_v4 = vld [vmem:[#allocation3 + $0x40] sm:$0xff] }
  0x7f   : > { %v673_v17 = vmul.f32 %v4705_v39, %v6067_v32  ;;  %v674_v49 = vmul.f32 %v4706_v58, %v6067_v32  ;;  %v965_v28 = vmul.f32 %v4849_v63, %v6334_v10  ;;  %v4994_v1 = vunpack.c.h.bf16 %v5239_v29  ;;  %5274 = vmatprep.subr.bf16.mxu0 %v3061_v4  ;;  %5558 = vmatprep.subr.bf16.mxu1 %v3061_v4  ;;  %v5212_v18 = vld [vmem:[%s7996_s2 + $0x290] sm:$0xff]  }
  0x80   : > { %2680 = vrot.lane.b32.xlu0 %v6237_v47, %s5766_s14  ;;  %v966_v6 = vmul.f32 %v4850_v59, %v6334_v10  ;;  %v1257_v7 = vmul.f32 %v4993_v5, %v6337_v12  ;;  %v2109_v54 = vshrl.u32 %v6470_v25, 16  ;;  %v1408_v56 = vpack.c.bf16 %v1346_v20, %v1345_v24  ;;  %2786 = vrot.lane.b32.xlu1 %v6161_v35, %s5766_s14  ;;  %v5248_v58 = vld [vmem:[%s7996_s2 + $0x3b0] sm:$0xff]  }
  0x81   : > { %v745_v37 = vadd.f32 %v673_v17, %v453_v14  ;;  %v746_v33 = vadd.f32 %v674_v49, %v454_v27  ;;  %v1258_v55 = vmul.f32 %v4994_v1, %v6337_v12  ;;  %v4597_v43 = vunpack.c.l.bf16 %v5140_v26  ;;  %v4411_v49 = vld [vmem:[#allocation2 + $0xd0] sm:$0x1] }
  0x82   : > { %v4598_v29 = vunpack.c.h.bf16 %v5140_v26  ;;  %v4741_v48 = vunpack.c.l.bf16 %v5176_v61  ;;  %v6495_v16 = vsel %vm1618_vm1, %v6372_v34, %v6439_v15  ;;  %1445 = vst.msk [vmem:[#allocation3 + $0x48] sm:$0xff] %vm1435_vm0, %v1408_v56  ;;  %v4742_v39 = vunpack.c.h.bf16 %v5176_v61  ;;  %v5168_v56 = vld [vmem:[%s7996_s2 + $0x130] sm:$0xff]  }
  0x83   : > { %v1037_v14 = vadd.f32 %v965_v28, %v745_v37  ;;  %v1038_v27 = vadd.f32 %v966_v6, %v746_v33  ;;  %v471_v35 = vmul.f32 %v4597_v43, %v6064_v31  ;;  %v4885_v34 = vunpack.c.l.bf16 %v5212_v18  ;;  %v5132_v28 = vld [vmem:[%s7996_s2 + $0x10] sm:$0xff]  }
  0x84   : > { %2714 = vrot.lane.b32.xlu0 %v6344_v22, %s5766_s14  ;;  %v472_v25 = vmul.f32 %v4598_v29, %v6064_v31  ;;  %v691_v63 = vmul.f32 %v4741_v48, %v6067_v32  ;;  %v692_v20 = vmul.f32 %v4742_v39, %v6067_v32  ;;  %v4886_v17 = vunpack.c.h.bf16 %v5212_v18  ;;  %2738 = vrot.lane.b32.xlu1 %v6299_v53, %s5766_s14 }
  0x85   : > { %v3053_v59 = vld [vmem:[#allocation3] sm:$0xff]  ;;  %v1329_v5 = vadd.f32 %v1257_v7, %v1037_v14  ;;  %v1330_v24 = vadd.f32 %v1258_v55, %v1038_v27  ;;  %v983_v22 = vmul.f32 %v4885_v34, %v6334_v10  ;;  %v5029_v61 = vunpack.c.l.bf16 %v5248_v58 }
  0x86   : > { %5275 = vmatpush3.bf16.msra.mxu0 %v3053_v59  ;;  %v763_v26 = vadd.f32 %v691_v63, %v471_v35  ;;  %v5030_v4 = vunpack.c.h.bf16 %v5248_v58  ;;  %5566 = vmatpush3.bf16.msra.mxu1 %v3053_v59  ;;  %v764_v1 = vadd.f32 %v692_v20, %v472_v25  ;;  %v984_v7 = vmul.f32 %v4886_v17, %v6334_v10  ;;  %v5204_v55 = vld [vmem:[%s7996_s2 + $0x250] sm:$0xff]  }
  0x87   : > { %v1400_v6 = vpack.c.bf16 %v1330_v24, %v1329_v5  ;;  %v1275_v37 = vmul.f32 %v5029_v61, %v6337_v12  ;;  %v2236_v18 = vshll.u32 %v4411_v49, 16  ;;  %v6524_v43 = vrot.slane %v2109_v54, 7  ;;  %v5240_v25 = vld [vmem:[%s7996_s2 + $0x370] sm:$0xff]   ;;  %v5177_v49 = vld [vmem:[%s7996_s2 + $0x178] sm:$0xff]  }
  0x88   : > { %2682 = vrot.lane.b32.xlu0 %v6255_v42, %s5766_s14  ;;  %v1055_v53 = vadd.f32 %v983_v22, %v763_v26  ;;  %v1276_v33 = vmul.f32 %v5030_v4, %v6337_v12  ;;  %v1056_v29 = vadd.f32 %v984_v7, %v764_v1  ;;  %v4565_v48 = vunpack.c.l.bf16 %v5132_v28  ;;  %2788 = vrot.lane.b32.xlu1 %v6237_v47, %s5766_s14  ;;  %v5141_v47 = vld [vmem:[%s7996_s2 + $0x58] sm:$0xff]  }
  0x89   : > { %1437 = vst.msk [vmem:[#allocation3 + $0x8] sm:$0xff] %vm1435_vm0, %v1400_v6  ;;  %v4566_v14 = vunpack.c.h.bf16 %v5132_v28  ;;  %v3062_v27 = vld [vmem:[#allocation3 + $0x48] sm:$0xff]  ;;  %v4709_v58 = vunpack.c.l.bf16 %v5168_v56  ;;  %v4710_v35 = vunpack.c.h.bf16 %v5168_v56  ;;  %v4853_v59 = vunpack.c.l.bf16 %v5204_v55 }
  0x8a   : > { %v1347_v39 = vadd.f32 %v1275_v37, %v1055_v53  ;;  %5276 = vmatprep.subr.bf16.mxu0 %v3062_v27  ;;  %5559 = vmatprep.subr.bf16.mxu1 %v3062_v27  ;;  %v1348_v54 = vadd.f32 %v1276_v33, %v1056_v29  ;;  %v455_v63 = vmul.f32 %v4565_v48, %v6064_v31  ;;  %v6539_v5 = vrot.slane %v2236_v18, 1  ;;  %v5213_v7 = vld [vmem:[%s7996_s2 + $0x298] sm:$0xff]  }
  0x8b   : > { %v456_v34 = vmul.f32 %v4566_v14, %v6064_v31  ;;  %v675_v24 = vmul.f32 %v4709_v58, %v6067_v32  ;;  %v676_v20 = vmul.f32 %v4710_v35, %v6067_v32  ;;  %v4854_v17 = vunpack.c.h.bf16 %v5204_v55 }
  0x8c   : > { %2716 = vrot.lane.b32.xlu0 %v6404_v52, %s5766_s14  ;;  %v1409_v26 = vpack.c.bf16 %v1348_v54, %v1347_v39  ;;  %v967_v22 = vmul.f32 %v4853_v59, %v6334_v10  ;;  %v4997_v61 = vunpack.c.l.bf16 %v5240_v25  ;;  %v4998_v4 = vunpack.c.h.bf16 %v5240_v25  ;;  %2740 = vrot.lane.b32.xlu1 %v6305_v0, %s5766_s14  ;;  %v5249_v0 = vld [vmem:[%s7996_s2 + $0x3b8] sm:$0xff]  }
  0x8d   : > { %v747_v52 = vadd.f32 %v675_v24, %v455_v63  ;;  %v748_v28 = vadd.f32 %v676_v20, %v456_v34  ;;  %v968_v6 = vmul.f32 %v4854_v17, %v6334_v10  ;;  %v4601_v1 = vunpack.c.l.bf16 %v5141_v47  ;;  %v5133_v25 = vld [vmem:[%s7996_s2 + $0x18] sm:$0xff]  }
  0x8e   : > { %1446 = vst.msk [vmem:[#allocation3 + $0x50] sm:$0xff] %vm1435_vm0, %v1409_v26  ;;  %v1259_v56 = vmul.f32 %v4997_v61, %v6337_v12  ;;  %v1260_v53 = vmul.f32 %v4998_v4, %v6337_v12  ;;  %v4602_v37 = vunpack.c.h.bf16 %v5141_v47  ;;  %v4745_v33 = vunpack.c.l.bf16 %v5177_v49  ;;  %v5169_v47 = vld [vmem:[%s7996_s2 + $0x138] sm:$0xff]  }
  0x8f   : > { %v1039_v55 = vadd.f32 %v967_v22, %v747_v52  ;;  %v1040_v29 = vadd.f32 %v968_v6, %v748_v28  ;;  %v473_v48 = vmul.f32 %v4601_v1, %v6064_v31  ;;  %v4746_v14 = vunpack.c.h.bf16 %v5177_v49  ;;  %v5205_v26 = vld [vmem:[%s7996_s2 + $0x258] sm:$0xff]  }
  0x90   : > { %2684 = vrot.lane.b32.xlu0 %v6271_v46, %s5766_s14  ;;  %v3054_v18 = vld [vmem:[#allocation3 + $0x8] sm:$0xff]  ;;  %v474_v27 = vmul.f32 %v4602_v37, %v6064_v31  ;;  %v693_v39 = vmul.f32 %v4745_v33, %v6067_v32  ;;  %v4889_v58 = vunpack.c.l.bf16 %v5213_v7  ;;  %v4890_v35 = vunpack.c.h.bf16 %v5213_v7  ;;  %2790 = vrot.lane.b32.xlu1 %v6255_v42, %s5766_s14 }
  0x91   : > { %5277 = vmatpush3.bf16.msra.mxu0 %v3054_v18  ;;  %5567 = vmatpush3.bf16.msra.mxu1 %v3054_v18  ;;  %v1331_v54 = vadd.f32 %v1259_v56, %v1039_v55  ;;  %v1332_v63 = vadd.f32 %v1260_v53, %v1040_v29  ;;  %v694_v34 = vmul.f32 %v4746_v14, %v6067_v32  ;;  %v5033_v59 = vunpack.c.l.bf16 %v5249_v0  ;;  %v5241_v7 = vld [vmem:[%s7996_s2 + $0x378] sm:$0xff]  }
  0x92   : > { %v765_v24 = vadd.f32 %v693_v39, %v473_v48  ;;  %v985_v20 = vmul.f32 %v4889_v58, %v6334_v10  ;;  %v986_v17 = vmul.f32 %v4890_v35, %v6334_v10  ;;  %v5034_v49 = vunpack.c.h.bf16 %v5249_v0 }
  0x93   : > { %v1401_v42 = vpack.c.bf16 %v1332_v63, %v1331_v54  ;;  %v766_v22 = vadd.f32 %v694_v34, %v474_v27  ;;  %v1277_v61 = vmul.f32 %v5033_v59, %v6337_v12  ;;  %v4569_v4 = vunpack.c.l.bf16 %v5133_v25  ;;  %v5178_v63 = vld [vmem:[%s7996_s2 + $0x180] sm:$0xff]  }
  0x94   : > { %2718 = vrot.lane.b32.xlu0 %v6416_v38, %s5766_s14  ;;  %v1057_v52 = vadd.f32 %v985_v20, %v765_v24  ;;  %v1278_v28 = vmul.f32 %v5034_v49, %v6337_v12  ;;  %v4570_v6 = vunpack.c.h.bf16 %v5133_v25  ;;  %v4713_v1 = vunpack.c.l.bf16 %v5169_v47  ;;  %2742 = vrot.lane.b32.xlu1 %v6348_v40, %s5766_s14  ;;  %v5142_v40 = vld [vmem:[%s7996_s2 + $0x60] sm:$0xff]  }
  0x95   : > { %v3063_v56 = vld [vmem:[#allocation3 + $0x50] sm:$0xff]  ;;  %1438 = vst.msk [vmem:[#allocation3 + $0x10] sm:$0xff] %vm1435_vm0, %v1401_v42  ;;  %v1058_v38 = vadd.f32 %v986_v17, %v766_v22  ;;  %v457_v53 = vmul.f32 %v4569_v4, %v6064_v31  ;;  %v4714_v37 = vunpack.c.h.bf16 %v5169_v47  ;;  %v4857_v33 = vunpack.c.l.bf16 %v5205_v26 }
  0x96   : > { %5278 = vmatprep.subr.bf16.mxu0 %v3063_v56  ;;  %5560 = vmatprep.subr.bf16.mxu1 %v3063_v56  ;;  %v1349_v0 = vadd.f32 %v1277_v61, %v1057_v52  ;;  %v458_v18 = vmul.f32 %v4570_v6, %v6064_v31  ;;  %v677_v55 = vmul.f32 %v4713_v1, %v6067_v32  ;;  %v4858_v29 = vunpack.c.h.bf16 %v5205_v26 }
  0x97   : > { %v1350_v48 = vadd.f32 %v1278_v28, %v1058_v38  ;;  %v678_v14 = vmul.f32 %v4714_v37, %v6067_v32  ;;  %v969_v27 = vmul.f32 %v4857_v33, %v6334_v10  ;;  %v5001_v39 = vunpack.c.l.bf16 %v5241_v7  ;;  %v5134_v37 = vld [vmem:[%s7996_s2 + $0x20] sm:$0xff]  }
  0x98   : > { %2686 = vrot.lane.b32.xlu0 %v6289_v41, %s5766_s14  ;;  %v2119_v58 = vsel %vm1618_vm1, %v6524_v43, %v6196_v2  ;;  %v749_v35 = vadd.f32 %v677_v55, %v457_v53  ;;  %v970_v25 = vmul.f32 %v4858_v29, %v6334_v10  ;;  %v5002_v54 = vunpack.c.h.bf16 %v5241_v7  ;;  %2792 = vrot.lane.b32.xlu1 %v6271_v46, %s5766_s14  ;;  %v5214_v43 = vld [vmem:[%s7996_s2 + $0x2a0] sm:$0xff]   ;;  %v4412_v53 = vld [vmem:[#allocation2 + $0xe8] sm:$0x1] }
  0x99   : > { %v1410_v34 = vpack.c.bf16 %v1350_v48, %v1349_v0  ;;  %v750_v59 = vadd.f32 %v678_v14, %v458_v18  ;;  %v1261_v47 = vmul.f32 %v5001_v39, %v6337_v12  ;;  %v4605_v24 = vunpack.c.l.bf16 %v5142_v40  ;;  %v5250_v46 = vld [vmem:[%s7996_s2 + $0x3c0] sm:$0xff]  }
  0x9a   : > { %v2239_v20 = vsel %vm1827_vm2, %v6301_v36, %v6539_v5  ;;  %v1041_v17 = vadd.f32 %v969_v27, %v749_v35  ;;  %v1262_v49 = vmul.f32 %v5002_v54, %v6337_v12  ;;  %v4606_v26 = vunpack.c.h.bf16 %v5142_v40  ;;  %v5206_v14 = vld [vmem:[%s7996_s2 + $0x260] sm:$0xff]  }
  0x9b   : > { %1447 = vst.msk [vmem:[#allocation3 + $0x58] sm:$0xff] %vm1435_vm0, %v1410_v34  ;;  %v1042_v42 = vadd.f32 %v970_v25, %v750_v59  ;;  %v475_v22 = vmul.f32 %v4605_v24, %v6064_v31  ;;  %v4749_v61 = vunpack.c.l.bf16 %v5178_v63  ;;  %v4750_v4 = vunpack.c.h.bf16 %v5178_v63 }
  0x9c   : > { %2720 = vrot.lane.b32.xlu0 %v6495_v16, %s5766_s14  ;;  %v3055_v52 = vld [vmem:[#allocation3 + $0x10] sm:$0xff]  ;;  %v1333_v5 = vadd.f32 %v1261_v47, %v1041_v17  ;;  %v476_v28 = vmul.f32 %v4606_v26, %v6064_v31  ;;  %v4893_v6 = vunpack.c.l.bf16 %v5214_v43  ;;  %v4894_v1 = vunpack.c.h.bf16 %v5214_v43  ;;  %2744 = vrot.lane.b32.xlu1 %v6424_v8, %s5766_s14 }
  0x9d   : > { %5279 = vmatpush3.bf16.msra.mxu0 %v3055_v52  ;;  %v1334_v7 = vadd.f32 %v1262_v49, %v1042_v42  ;;  %v695_v16 = vmul.f32 %v4749_v61, %v6067_v32  ;;  %v696_v56 = vmul.f32 %v4750_v4, %v6067_v32  ;;  %v5037_v38 = vunpack.c.l.bf16 %v5250_v46  ;;  %5568 = vmatpush3.bf16.msra.mxu1 %v3055_v52  ;;  %v5170_v8 = vld [vmem:[%s7996_s2 + $0x140] sm:$0xff]  }
  0x9e   : > { %v987_v33 = vmul.f32 %v4893_v6, %v6334_v10  ;;  %v988_v0 = vmul.f32 %v4894_v1, %v6334_v10  ;;  %v5038_v18 = vunpack.c.h.bf16 %v5250_v46  ;;  %v2243_v39 = vshll.u32 %v4412_v53, 16  ;;  %v5242_v49 = vld [vmem:[%s7996_s2 + $0x380] sm:$0xff]  }
  0x9f   : > { %v1402_v55 = vpack.c.bf16 %v1334_v7, %v1333_v5  ;;  %v767_v29 = vadd.f32 %v695_v16, %v475_v22  ;;  %v768_v40 = vadd.f32 %v696_v56, %v476_v28  ;;  %v1279_v48 = vmul.f32 %v5037_v38, %v6337_v12  ;;  %v5143_v22 = vld [vmem:[%s7996_s2 + $0x68] sm:$0xff]  }
  0xa0   : > { %2688 = vrot.lane.b32.xlu0 %v6311_v50, %s5766_s14  ;;  %v1280_v27 = vmul.f32 %v5038_v18, %v6337_v12  ;;  %v4573_v35 = vunpack.c.l.bf16 %v5134_v37  ;;  %2794 = vrot.lane.b32.xlu1 %v6289_v41, %s5766_s14  ;;  %v4574_v63 = vunpack.c.h.bf16 %v5134_v37  ;;  %v4717_v34 = vunpack.c.l.bf16 %v5170_v8  ;;  %v5179_v5 = vld [vmem:[%s7996_s2 + $0x188] sm:$0xff]  }
  0xa1   : > { %1439 = vst.msk [vmem:[#allocation3 + $0x18] sm:$0xff] %vm1435_vm0, %v1402_v55  ;;  %v1059_v25 = vadd.f32 %v987_v33, %v767_v29  ;;  %v1060_v54 = vadd.f32 %v988_v0, %v768_v40  ;;  %v2245_v47 = vrot.slane %v2243_v39, 1  ;;  %v4718_v43 = vunpack.c.h.bf16 %v5170_v8  ;;  %v5215_v37 = vld [vmem:[%s7996_s2 + $0x2a8] sm:$0xff]  }
  0xa2   : > { %v3064_v59 = vld [vmem:[#allocation3 + $0x58] sm:$0xff]  ;;  %v459_v24 = vmul.f32 %v4573_v35, %v6064_v31  ;;  %v4861_v17 = vunpack.c.l.bf16 %v5206_v14  ;;  %v460_v46 = vmul.f32 %v4574_v63, %v6064_v31  ;;  %v4862_v42 = vunpack.c.h.bf16 %v5206_v14 }
  0xa3   : > { %5280 = vmatprep.subr.bf16.mxu0 %v3064_v59  ;;  %v1351_v41 = vadd.f32 %v1279_v48, %v1059_v25  ;;  %v1352_v26 = vadd.f32 %v1280_v27, %v1060_v54  ;;  %5561 = vmatprep.subr.bf16.mxu1 %v3064_v59  ;;  %v2246_v61 = vsel %vm1827_vm2, %v6322_v13, %v2245_v47  ;;  %v5005_v1 = vunpack.c.l.bf16 %v5242_v49  ;;  %v5251_v8 = vld [vmem:[%s7996_s2 + $0x3c8] sm:$0xff]  }
  0xa4   : > { %2722 = vrot.lane.b32.xlu0 %v2119_v58, %s5766_s14  ;;  %v679_v4 = vmul.f32 %v4717_v34, %v6067_v32  ;;  %v680_v52 = vmul.f32 %v4718_v43, %v6067_v32  ;;  %v971_v58 = vmul.f32 %v4861_v17, %v6334_v10  ;;  %2746 = vrot.lane.b32.xlu1 %v2239_v20, %s5766_s14  ;;  %v5006_v7 = vunpack.c.h.bf16 %v5242_v49  ;;  %v5135_v54 = vld [vmem:[%s7996_s2 + $0x28] sm:$0xff]  }
  0xa5   : > { %v1411_v28 = vpack.c.bf16 %v1352_v26, %v1351_v41  ;;  %v972_v6 = vmul.f32 %v4862_v42, %v6334_v10  ;;  %v4609_v38 = vunpack.c.l.bf16 %v5143_v22  ;;  %v4610_v53 = vunpack.c.h.bf16 %v5143_v22  ;;  %v5207_v26 = vld [vmem:[%s7996_s2 + $0x268] sm:$0xff]  }
  0xa6   : > { %v751_v16 = vadd.f32 %v679_v4, %v459_v24  ;;  %v752_v56 = vadd.f32 %v680_v52, %v460_v46  ;;  %v1263_v20 = vmul.f32 %v5005_v1, %v6337_v12  ;;  %v1264_v33 = vmul.f32 %v5006_v7, %v6337_v12  ;;  %v5171_v24 = vld [vmem:[%s7996_s2 + $0x148] sm:$0xff]  }
  0xa7   : > { %1448 = vst.msk [vmem:[#allocation3 + $0x60] sm:$0xff] %vm1435_vm0, %v1411_v28  ;;  %v4753_v0 = vunpack.c.l.bf16 %v5179_v5  ;;  %v4754_v18 = vunpack.c.h.bf16 %v5179_v5  ;;  %v477_v48 = vmul.f32 %v4609_v38, %v6064_v31  ;;  %v478_v14 = vmul.f32 %v4610_v53, %v6064_v31  ;;  %v5243_v4 = vld [vmem:[%s7996_s2 + $0x388] sm:$0xff]  }
  0xa8   : > { %2690 = vrot.lane.b32.xlu0 %v6358_v44, %s5766_s14  ;;  %v3056_v55 = vld [vmem:[#allocation3 + $0x18] sm:$0xff]  ;;  %v1043_v29 = vadd.f32 %v971_v58, %v751_v16  ;;  %v1044_v40 = vadd.f32 %v972_v6, %v752_v56  ;;  %v4897_v35 = vunpack.c.l.bf16 %v5215_v37  ;;  %v4898_v25 = vunpack.c.h.bf16 %v5215_v37  ;;  %2748 = vrot.lane.b32.xlu1 %v2246_v61, %s5766_s14 }
  0xa9   : > { %5281 = vmatpush3.bf16.msra.mxu0 %v3056_v55  ;;  %5569 = vmatpush3.bf16.msra.mxu1 %v3056_v55  ;;  %v697_v27 = vmul.f32 %v4753_v0, %v6067_v32  ;;  %v698_v39 = vmul.f32 %v4754_v18, %v6067_v32  ;;  %v5041_v59 = vunpack.c.l.bf16 %v5251_v8  ;;  %v5042_v47 = vunpack.c.h.bf16 %v5251_v8 }
  0xaa   : > { %v1335_v63 = vadd.f32 %v1263_v20, %v1043_v29  ;;  %v1336_v34 = vadd.f32 %v1264_v33, %v1044_v40  ;;  %v989_v49 = vmul.f32 %v4897_v35, %v6334_v10  ;;  %v990_v41 = vmul.f32 %v4898_v25, %v6334_v10  ;;  %v5144_v33 = vld [vmem:[%s7996_s2 + $0x70] sm:$0xff]   ;;  %v4441_v35 = vld [vmem:[#allocation2 + $0x128] sm:$0xff] }
  0xab   : > { %v769_v43 = vadd.f32 %v697_v27, %v477_v48  ;;  %v770_v17 = vadd.f32 %v698_v39, %v478_v14  ;;  %v1281_v42 = vmul.f32 %v5041_v59, %v6337_v12  ;;  %v1282_v22 = vmul.f32 %v5042_v47, %v6337_v12  ;;  %v5180_v29 = vld [vmem:[%s7996_s2 + $0x190] sm:$0xff]  }
  0xac   : > { %2796 = vrot.lane.b32.xlu0 %v6311_v50, %s5766_s14  ;;  %v1403_v46 = vpack.c.bf16 %v1336_v34, %v1335_v63  ;;  %v4577_v61 = vunpack.c.l.bf16 %v5135_v54  ;;  %v4578_v5 = vunpack.c.h.bf16 %v5135_v54  ;;  %v4721_v28 = vunpack.c.l.bf16 %v5171_v24  ;;  %v5216_v59 = vld [vmem:[%s7996_s2 + $0x2b0] sm:$0xff]  }
  0xad   : > { %v1061_v52 = vadd.f32 %v989_v49, %v769_v43  ;;  %v1062_v58 = vadd.f32 %v990_v41, %v770_v17  ;;  %v4722_v7 = vunpack.c.h.bf16 %v5171_v24  ;;  %v4865_v16 = vunpack.c.l.bf16 %v5207_v26  ;;  %v5252_v41 = vld [vmem:[%s7996_s2 + $0x3d0] sm:$0xff]  }
  0xae   : > { %v3065_v6 = vld [vmem:[#allocation3 + $0x60] sm:$0xff]  ;;  %1440 = vst.msk [vmem:[#allocation3 + $0x20] sm:$0xff] %vm1435_vm0, %v1403_v46  ;;  %v461_v1 = vmul.f32 %v4577_v61, %v6064_v31  ;;  %v4866_v56 = vunpack.c.h.bf16 %v5207_v26  ;;  %v462_v37 = vmul.f32 %v4578_v5, %v6064_v31  ;;  %v5009_v20 = vunpack.c.l.bf16 %v5243_v4  ;;  %v4443_v5 = vld [vmem:[#allocation2 + $0x140] sm:$0xff] }
  0xaf   : > { %5282 = vmatprep.subr.bf16.mxu0 %v3065_v6  ;;  %5562 = vmatprep.subr.bf16.mxu1 %v3065_v6  ;;  %v1353_v38 = vadd.f32 %v1281_v42, %v1061_v52  ;;  %v1354_v53 = vadd.f32 %v1282_v22, %v1062_v58  ;;  %v681_v0 = vmul.f32 %v4721_v28, %v6067_v32  ;;  %v8086_v40 = vshrl.u32 %v6000_v23, 16 }
  0xb0   : > { %v682_v18 = vmul.f32 %v4722_v7, %v6067_v32  ;;  %v973_v8 = vmul.f32 %v4865_v16, %v6334_v10  ;;  %v974_v55 = vmul.f32 %v4866_v56, %v6334_v10  ;;  %2798 = vrot.lane.b32.xlu0 %v6358_v44, %s5766_s14  ;;  %v5010_v27 = vunpack.c.h.bf16 %v5243_v4  ;;  %v4413_v16 = vld [vmem:[#allocation2 + $0x100] sm:$0x1]  ;;  %v5136_v56 = vld [vmem:[%s7996_s2 + $0x30] sm:$0xff]  }
  0xb1   : > { %v6715_v48 = vrot.slane %v8086_v40, 7  ;;  %v1412_v14 = vpack.c.bf16 %v1354_v53, %v1353_v38  ;;  %v1265_v39 = vmul.f32 %v5009_v20, %v6337_v12  ;;  %v753_v25 = vadd.f32 %v681_v0, %v461_v1 }
  0xb2   : > { %v754_v54 = vadd.f32 %v682_v18, %v462_v37  ;;  %v4613_v63 = vunpack.c.l.bf16 %v5144_v33  ;;  %v4614_v34 = vunpack.c.h.bf16 %v5144_v33  ;;  %v8087_v47 = vmov %v8086_v40  ;;  %v5172_v33 = vld [vmem:[%s7996_s2 + $0x150] sm:$0xff]  }
  0xb3   : > { %v6724_v24 = vor.u32 %v6084_v51, %v8087_v47  ;;  %1449 = vst.msk [vmem:[#allocation3 + $0x68] sm:$0xff] %vm1435_vm0, %v1412_v14  ;;  %v1266_v43 = vmul.f32 %v5010_v27, %v6337_v12  ;;  %v4757_v17 = vunpack.c.l.bf16 %v5180_v29  ;;  %v4758_v49 = vunpack.c.h.bf16 %v5180_v29 }
  0xb4   : > { %v1045_v26 = vadd.f32 %v973_v8, %v753_v25  ;;  %v1046_v46 = vadd.f32 %v974_v55, %v754_v54  ;;  %v479_v42 = vmul.f32 %v4613_v63, %v6064_v31  ;;  %v480_v22 = vmul.f32 %v4614_v34, %v6064_v31  ;;  %2800 = vrot.lane.b32.xlu0 %v4441_v35, %s5766_s14  ;;  %v5208_v35 = vld [vmem:[%s7996_s2 + $0x270] sm:$0xff]   ;;  %v4445_v25 = vld [vmem:[#allocation2 + $0x158] sm:$0xff] }
  0xb5   : > { %v3057_v51 = vld [vmem:[#allocation3 + $0x20] sm:$0xff]  ;;  %v699_v61 = vmul.f32 %v4757_v17, %v6067_v32  ;;  %v700_v4 = vmul.f32 %v4758_v49, %v6067_v32  ;;  %v4901_v52 = vunpack.c.l.bf16 %v5216_v59  ;;  %v4902_v58 = vunpack.c.h.bf16 %v5216_v59 }
  0xb6   : > { %5283 = vmatpush3.bf16.msra.mxu0 %v3057_v51  ;;  %5570 = vmatpush3.bf16.msra.mxu1 %v3057_v51  ;;  %v1337_v28 = vadd.f32 %v1265_v39, %v1045_v26  ;;  %v1338_v6 = vadd.f32 %v1266_v43, %v1046_v46  ;;  %v5045_v1 = vunpack.c.l.bf16 %v5252_v41  ;;  %v5046_v7 = vunpack.c.h.bf16 %v5252_v41  ;;  %v5244_v17 = vld [vmem:[%s7996_s2 + $0x390] sm:$0xff]  }
  0xb7   : > { %v771_v38 = vadd.f32 %v699_v61, %v479_v42  ;;  %v772_v53 = vadd.f32 %v700_v4, %v480_v22  ;;  %v991_v37 = vmul.f32 %v4901_v52, %v6334_v10  ;;  %v992_v20 = vmul.f32 %v4902_v58, %v6334_v10  ;;  %v5145_v61 = vld [vmem:[%s7996_s2 + $0x78] sm:$0xff]  }
  0xb8   : > { %v1404_v0 = vpack.c.bf16 %v1338_v6, %v1337_v28  ;;  %v1283_v18 = vmul.f32 %v5045_v1, %v6337_v12  ;;  %v1284_v8 = vmul.f32 %v5046_v7, %v6337_v12  ;;  %v8088_v55 = vshll.u32 %v6311_v50, 16  ;;  %2802 = vrot.lane.b32.xlu0 %v4443_v5, %s5766_s14  ;;  %v5181_v28 = vld [vmem:[%s7996_s2 + $0x198] sm:$0xff]   ;;  %v4447_v6 = vld [vmem:[#allocation2 + $0x170] sm:$0xff] }
  0xb9   : > { %v1063_v40 = vadd.f32 %v991_v37, %v771_v38  ;;  %v1064_v14 = vadd.f32 %v992_v20, %v772_v53  ;;  %v2250_v27 = vshll.u32 %v4413_v16, 16  ;;  %v4581_v39 = vunpack.c.l.bf16 %v5136_v56  ;;  %v5217_v38 = vld [vmem:[%s7996_s2 + $0x2b8] sm:$0xff]  }
  0xba   : > { %v2247_v29 = vrot.slane %v8088_v55, 1  ;;  %v3066_v54 = vld [vmem:[#allocation3 + $0x68] sm:$0xff]  ;;  %1441 = vst.msk [vmem:[#allocation3 + $0x28] sm:$0xff] %vm1435_vm0, %v1404_v0  ;;  %v8089_v63 = vshrl.u32 %v6311_v50, 16  ;;  %v4582_v59 = vunpack.c.h.bf16 %v5136_v56  ;;  %v4725_v47 = vunpack.c.l.bf16 %v5172_v33 }
  0xbb   : > { %v4726_v43 = vunpack.c.h.bf16 %v5172_v33  ;;  %5284 = vmatprep.subr.bf16.mxu0 %v3066_v54  ;;  %5563 = vmatprep.subr.bf16.mxu1 %v3066_v54  ;;  %v1355_v49 = vadd.f32 %v1283_v18, %v1063_v40  ;;  %v1356_v41 = vadd.f32 %v1284_v8, %v1064_v14  ;;  %v2252_v26 = vrot.slane %v2250_v27, 1 }
  0xbc   : > { %v6755_v34 = vor.u32 %v2247_v29, %v8089_v63  ;;  %v463_v46 = vmul.f32 %v4581_v39, %v6064_v31  ;;  %v464_v42 = vmul.f32 %v4582_v59, %v6064_v31  ;;  %v683_v50 = vmul.f32 %v4725_v47, %v6067_v32  ;;  %2804 = vrot.lane.b32.xlu0 %v4445_v25, %s5766_s14  ;;  %v5253_v29 = vld [vmem:[%s7996_s2 + $0x3d8] sm:$0xff]  }
  0xbd   : > { %v684_v22 = vmul.f32 %v4726_v43, %v6067_v32  ;;  %v4869_v51 = vunpack.c.l.bf16 %v5208_v35  ;;  %v1413_v4 = vpack.c.bf16 %v1356_v41, %v1355_v49  ;;  %v4870_v58 = vunpack.c.h.bf16 %v5208_v35  ;;  %v5137_v25 = vld [vmem:[%s7996_s2 + $0x38] sm:$0xff]  }
  0xbe   : > { %v2253_v52 = vsel %vm1827_vm2, %v6755_v34, %v2252_v26  ;;  %v5013_v5 = vunpack.c.l.bf16 %v5244_v17  ;;  %v755_v1 = vadd.f32 %v683_v50, %v463_v46  ;;  %v5014_v56 = vunpack.c.h.bf16 %v5244_v17  ;;  %v5173_v26 = vld [vmem:[%s7996_s2 + $0x158] sm:$0xff]  }
  0xbf   : > { %2750 = vrot.lane.b32.xlu1 %v2253_v52, %s5766_s14  ;;  %v756_v7 = vadd.f32 %v684_v22, %v464_v42  ;;  %v975_v16 = vmul.f32 %v4869_v51, %v6334_v10  ;;  %1450 = vst.msk [vmem:[#allocation3 + $0x70] sm:$0xff] %vm1435_vm0, %v1413_v4  ;;  %v976_v53 = vmul.f32 %v4870_v58, %v6334_v10  ;;  %v4617_v20 = vunpack.c.l.bf16 %v5145_v61  ;;  %v5209_v51 = vld [vmem:[%s7996_s2 + $0x278] sm:$0xff]  }
  0xc0   : > { %v1267_v37 = vmul.f32 %v5013_v5, %v6337_v12  ;;  %v4618_v33 = vunpack.c.h.bf16 %v5145_v61  ;;  %v1268_v18 = vmul.f32 %v5014_v56, %v6337_v12  ;;  %v4761_v8 = vunpack.c.l.bf16 %v5181_v28  ;;  %2806 = vrot.lane.b32.xlu0 %v4447_v6, %s5766_s14  ;;  %v5245_v5 = vld [vmem:[%s7996_s2 + $0x398] sm:$0xff]  }
  0xc1   : > { %v1047_v0 = vadd.f32 %v975_v16, %v755_v1  ;;  %v4762_v55 = vunpack.c.h.bf16 %v5181_v28  ;;  %v3058_v40 = vld [vmem:[#allocation3 + $0x28] sm:$0xff]  ;;  %v1048_v14 = vadd.f32 %v976_v53, %v756_v7  ;;  %v481_v27 = vmul.f32 %v4617_v20, %v6064_v31  ;;  %v1811_v20 = vld [vmem:[#allocation2 + $0x10] sm:$0x1] }
  0xc2   : > { %v482_v39 = vmul.f32 %v4618_v33, %v6064_v31  ;;  %v4905_v35 = vunpack.c.l.bf16 %v5217_v38  ;;  %5285 = vmatpush3.bf16.msra.mxu0 %v3058_v40  ;;  %5571 = vmatpush3.bf16.msra.mxu1 %v3058_v40  ;;  %v701_v63 = vmul.f32 %v4761_v8, %v6067_v32  ;;  %v4906_v47 = vunpack.c.h.bf16 %v5217_v38 }
  0xc3   : > { %v1339_v54 = vadd.f32 %v1267_v37, %v1047_v0  ;;  %v702_v59 = vmul.f32 %v4762_v55, %v6067_v32  ;;  %v1340_v43 = vadd.f32 %v1268_v18, %v1048_v14  ;;  %v5049_v49 = vunpack.c.l.bf16 %v5253_v29 }
  0xc4   : > { %v993_v17 = vmul.f32 %v4905_v35, %v6334_v10  ;;  %v5050_v41 = vunpack.c.h.bf16 %v5253_v29  ;;  %v773_v46 = vadd.f32 %v701_v63, %v481_v27  ;;  %v994_v50 = vmul.f32 %v4906_v47, %v6334_v10  ;;  %v4414_v27 = vld [vmem:[#allocation2 + $0x118] sm:$0x1]  ;;  %v1586_v63 = vld [vmem:[#allocation2] sm:$0x80] }
  0xc5   : > { %v774_v42 = vadd.f32 %v702_v59, %v482_v39  ;;  %v4585_v22 = vunpack.c.l.bf16 %v5137_v25  ;;  %v1405_v61 = vpack.c.bf16 %v1340_v43, %v1339_v54  ;;  %v1285_v4 = vmul.f32 %v5049_v49, %v6337_v12 }
  0xc6   : > { %v1286_v52 = vmul.f32 %v5050_v41, %v6337_v12  ;;  %v4586_v58 = vunpack.c.h.bf16 %v5137_v25  ;;  %v3067_v28 = vld [vmem:[#allocation3 + $0x70] sm:$0xff]  ;;  %v1065_v6 = vadd.f32 %v993_v17, %v773_v46  ;;  %v4729_v16 = vunpack.c.l.bf16 %v5173_v26  ;;  %v2701_v41 = vpop.permute.xlu0 %2700 }
  0xc7   : > { %v1066_v1 = vadd.f32 %v994_v50, %v774_v42  ;;  %v465_v7 = vmul.f32 %v4585_v22, %v6064_v31  ;;  %5286 = vmatprep.subr.bf16.mxu0 %v3067_v28  ;;  %1442 = vst.msk [vmem:[#allocation3 + $0x30] sm:$0xff] %vm1435_vm0, %v1405_v61  ;;  %5564 = vmatprep.subr.bf16.mxu1 %v3067_v28  ;;  %v4730_v38 = vunpack.c.h.bf16 %v5173_v26  ;;  %v4873_v53 = vunpack.c.l.bf16 %v5209_v51 }
  0xc8   : > { %v466_v56 = vmul.f32 %v4586_v58, %v6064_v31  ;;  %v4874_v37 = vunpack.c.h.bf16 %v5209_v51  ;;  %v1357_v33 = vadd.f32 %v1285_v4, %v1065_v6  ;;  %v685_v18 = vmul.f32 %v4729_v16, %v6067_v32  ;;  %v1823_v4 = vld [vmem:[#allocation2 + $0x130] sm:$0x1]  ;;  %v2669_v16 = vpop.permute.xlu1 %2668 }
  0xc9   : > { %v1358_v0 = vadd.f32 %v1286_v52, %v1066_v1  ;;  %v5017_v8 = vunpack.c.l.bf16 %v5245_v5  ;;  %v686_v55 = vmul.f32 %v4730_v38, %v6067_v32  ;;  %v977_v29 = vmul.f32 %v4873_v53, %v6334_v10  ;;  %v5154_v52 = vld [vmem:[%s7996_s2 + $0xc0] sm:$0xff]  }
  0xca   : > { %v978_v40 = vmul.f32 %v4874_v37, %v6334_v10  ;;  %v5018_v14 = vunpack.c.h.bf16 %v5245_v5  ;;  %v757_v35 = vadd.f32 %v685_v18, %v465_v7  ;;  %v1831_v54 = vshll.u32 %v1811_v20, 16  ;;  %v5226_v20 = vld [vmem:[%s7996_s2 + $0x300] sm:$0xff]  }
  0xcb   : > { %v1414_v39 = vpack.c.bf16 %v1358_v0, %v1357_v33  ;;  %v1269_v25 = vmul.f32 %v5017_v8, %v6337_v12  ;;  %v8090_v59 = vshll.u32 %v6078_v11, 16  ;;  %v758_v43 = vadd.f32 %v686_v55, %v466_v56 }
  0xcc   : > { %v1270_v17 = vmul.f32 %v5018_v14, %v6337_v12  ;;  %v1049_v49 = vadd.f32 %v977_v29, %v757_v35  ;;  %v1833_v26 = vrot.slane %v1831_v54, 1  ;;  %v2254_v46 = vrot.slane %v2104_v57, 1  ;;  %v2725_v29 = vpop.permute.xlu0 %2724 }
  0xcd   : > { %v1912_v47 = vrot.slane %v8090_v59, 1  ;;  %1451 = vst.msk [vmem:[#allocation3 + $0x78] sm:$0xff] %vm1435_vm0, %v1414_v39  ;;  %v2257_v42 = vshll.u32 %v4414_v27, 16  ;;  %v8091_v50 = vshll.u32 %v6000_v23, 16  ;;  %v1050_v51 = vadd.f32 %v978_v40, %v758_v43  ;;  %v5190_v23 = vld [vmem:[%s7996_s2 + $0x1e0] sm:$0xff]  }
  0xce   : > { %v1620_v61 = vshrl.u32 %v1586_v63, 16  ;;  %v3059_v58 = vld [vmem:[#allocation3 + $0x30] sm:$0xff]  ;;  %v1341_v5 = vadd.f32 %v1269_v25, %v1049_v49  ;;  %v1834_v28 = vsel %vm1827_vm2, %v6724_v24, %v1833_v26  ;;  %v6830_v57 = vor.u32 %v2254_v46, %v2101_v9 }
  0xcf   : > { %v1629_v22 = vor.u32 %v8091_v50, %v6715_v48  ;;  %v2259_v6 = vrot.slane %v2257_v42, 1  ;;  %v8092_v48 = vshll.u32 %v6076_v60, 16  ;;  %5287 = vmatpush3.bf16.msra.mxu0 %v3059_v58  ;;  %5572 = vmatpush3.bf16.msra.mxu1 %v3059_v58  ;;  %v1342_v7 = vadd.f32 %v1270_v17, %v1050_v51  ;;  %v5162_v59 = vld [vmem:[%s7996_s2 + $0x100] sm:$0xff]   ;;  %v4449_v51 = vld [vmem:[#allocation2 + $0x188] sm:$0xff] }
  0xd0   : > { %v2879_v56 = vsel %vm1435_vm0, %v1834_v28, %v2701_v41  ;;  %v1622_v24 = vrot.slane %v1620_v61, 7  ;;  %v8093_v44 = vshrl.u32 %v6078_v11, 16  ;;  %v1915_v53 = vshll.u32 %v1823_v4, 16  ;;  %v5262_v11 = vld [vmem:[%s7996_s2 + $0x420] sm:$0xff]   ;;  %2808 = vrot.lane.b32.xlu0 %v4449_v51, %s5766_s14 }
  0xd1   : > { %v6837_v1 = vrot.slane %v8092_v48, 1  ;;  %3169 = vmatprep.mubr.bf16.mxu0 %v2879_v56  ;;  %v2260_v38 = vsel %vm1827_vm2, %v6830_v57, %v2259_v6  ;;  %v4653_v37 = vunpack.c.l.bf16 %v5154_v52  ;;  %v1406_v33 = vpack.c.bf16 %v1342_v7, %v1341_v5  ;;  %v5198_v41 = vld [vmem:[%s7996_s2 + $0x220] sm:$0xff]  }
  0xd2   : > { %v6842_v9 = vor.u32 %v1912_v47, %v8093_v44  ;;  %2752 = vrot.lane.b32.xlu1 %v2260_v38, %s5766_s14  ;;  %v1630_v0 = vsel %vm1618_vm1, %v1622_v24, %v1629_v22  ;;  %v4654_v18 = vunpack.c.h.bf16 %v5154_v52  ;;  %v4797_v8 = vunpack.c.l.bf16 %v5190_v23  ;;  %v5234_v22 = vld [vmem:[%s7996_s2 + $0x340] sm:$0xff]  }
  0xd3   : > { %v6855_v55 = vsel %vm1435_vm0, %v1630_v0, %v2669_v16  ;;  %v1917_v40 = vrot.slane %v1915_v53, 1  ;;  %v499_v14 = vmul.f32 %v4653_v37, %v6064_v31  ;;  %v4798_v27 = vunpack.c.h.bf16 %v5190_v23  ;;  %1443 = vst.msk [vmem:[#allocation3 + $0x38] sm:$0xff] %vm1435_vm0, %v1406_v33  ;;  %v5270_v48 = vld [vmem:[%s7996_s2 + $0x460] sm:$0xff]  }
  0xd4   : > { %v3068_v39 = vld [vmem:[#allocation3 + $0x78] sm:$0xff]  ;;  %v500_v35 = vmul.f32 %v4654_v18, %v6064_v31  ;;  %v719_v25 = vmul.f32 %v4797_v8, %v6067_v32  ;;  %v4941_v54 = vunpack.c.l.bf16 %v5226_v20  ;;  %v4942_v63 = vunpack.c.h.bf16 %v5226_v20  ;;  %v1610_v44 = vld [vmem:[#allocation2 + $0x120] sm:$0x80] }
  0xd5   : > { %5288 = vmatprep.subr.bf16.mxu0 %v3068_v39  ;;  %5565 = vmatprep.subr.bf16.mxu1 %v3068_v39  ;;  %v1918_v47 = vsel %vm1827_vm2, %v6842_v9, %v1917_v40  ;;  %v720_v43 = vmul.f32 %v4798_v27, %v6067_v32  ;;  %v5085_v17 = vunpack.c.l.bf16 %v5262_v11  ;;  %v5086_v49 = vunpack.c.h.bf16 %v5262_v11  ;;  %v5146_v33 = vld [vmem:[%s7996_s2 + $0x80] sm:$0xff]  }
  0xd6   : > { %v2927_v26 = vsel %vm1435_vm0, %v1918_v47, %v2725_v29  ;;  %v791_v46 = vadd.f32 %v719_v25, %v499_v14  ;;  %v1011_v42 = vmul.f32 %v4941_v54, %v6334_v10  ;;  %v1012_v50 = vmul.f32 %v4942_v63, %v6334_v10  ;;  %v5218_v47 = vld [vmem:[%s7996_s2 + $0x2c0] sm:$0xff]  }
  0xd7   : > { %3265 = vmatprep.mubr.bf16.mxu1 %v2927_v26  ;;  %v792_v61 = vadd.f32 %v720_v43, %v500_v35  ;;  %v1303_v4 = vmul.f32 %v5085_v17, %v6337_v12  ;;  %v1304_v52 = vmul.f32 %v5086_v49, %v6337_v12  ;;  %v4685_v58 = vunpack.c.l.bf16 %v5162_v59  ;;  %v5182_v35 = vld [vmem:[%s7996_s2 + $0x1a0] sm:$0xff]   ;;  %v2693_v43 = vpop.permute.xlu1 %2692 }
  0xd8   : > { %v1083_v5 = vadd.f32 %v1011_v42, %v791_v46  ;;  %v4686_v28 = vunpack.c.h.bf16 %v5162_v59  ;;  %v4829_v6 = vunpack.c.l.bf16 %v5198_v41  ;;  %v4830_v23 = vunpack.c.h.bf16 %v5198_v41  ;;  %v5254_v51 = vld [vmem:[%s7996_s2 + $0x3e0] sm:$0xff]  }
  0xd9   : > { %v1084_v7 = vadd.f32 %v1012_v50, %v792_v61  ;;  %v515_v16 = vmul.f32 %v4685_v58, %v6064_v31  ;;  %v4973_v56 = vunpack.c.l.bf16 %v5234_v22  ;;  %v4974_v24 = vunpack.c.h.bf16 %v5234_v22 }
  0xda   : > { %v1375_v38 = vadd.f32 %v1303_v4, %v1083_v5  ;;  %v516_v53 = vmul.f32 %v4686_v28, %v6064_v31  ;;  %v735_v37 = vmul.f32 %v4829_v6, %v6067_v32  ;;  %v736_v20 = vmul.f32 %v4830_v23, %v6067_v32  ;;  %v3060_v0 = vld [vmem:[#allocation3 + $0x38] sm:$0xff] }
  0xdb   : > { %v1376_v18 = vadd.f32 %v1304_v52, %v1084_v7  ;;  %v1027_v8 = vmul.f32 %v4973_v56, %v6334_v10  ;;  %v1028_v11 = vmul.f32 %v4974_v24, %v6334_v10  ;;  %v5117_v29 = vunpack.c.l.bf16 %v5270_v48  ;;  %5289 = vmatpush3.bf16.msra.mxu0 %v3060_v0  ;;  %5573 = vmatpush3.bf16.msra.mxu1 %v3060_v0 }
  0xdc   : > { %v807_v40 = vadd.f32 %v735_v37, %v515_v16  ;;  %v808_v14 = vadd.f32 %v736_v20, %v516_v53  ;;  %v5118_v27 = vunpack.c.h.bf16 %v5270_v48  ;;  %v1764_v39 = vshrl.u32 %v1610_v44, 16  ;;  %v5191_v48 = vld [vmem:[%s7996_s2 + $0x1e8] sm:$0xff]  }
  0xdd   : > { %v1423_v25 = vpack.c.bf16 %v1376_v18, %v1375_v38  ;;  %v1319_v54 = vmul.f32 %v5117_v29, %v6337_v12  ;;  %v4621_v63 = vunpack.c.l.bf16 %v5146_v33  ;;  %v4622_v59 = vunpack.c.h.bf16 %v5146_v33  ;;  %v5227_v37 = vld [vmem:[%s7996_s2 + $0x308] sm:$0xff]  }
  0xde   : > { %v1099_v17 = vadd.f32 %v1027_v8, %v807_v40  ;;  %v1100_v49 = vadd.f32 %v1028_v11, %v808_v14  ;;  %v1320_v41 = vmul.f32 %v5118_v27, %v6337_v12  ;;  %v1766_v26 = vrot.slane %v1764_v39, 7  ;;  %3170 = vmatmul.mubr.bf16.vlgmr.msra.gmra.mrb[0].mxu0 %v6855_v55  ;;  %v5155_v55 = vld [vmem:[%s7996_s2 + $0xc8] sm:$0xff]   ;;  %v4451_v27 = vld [vmem:[#allocation2 + $0x1a0] sm:$0xff] }
  0xdf   : > { %1460 = vst.msk [vmem:[#allocation3 + $0xc0] sm:$0xff] %vm1435_vm0, %v1423_v25  ;;  %v483_v46 = vmul.f32 %v4621_v63, %v6064_v31  ;;  %v484_v42 = vmul.f32 %v4622_v59, %v6064_v31  ;;  %v4765_v50 = vunpack.c.l.bf16 %v5182_v35  ;;  %v4766_v22 = vunpack.c.h.bf16 %v5182_v35  ;;  %v5263_v8 = vld [vmem:[%s7996_s2 + $0x428] sm:$0xff]   ;;  %2810 = vrot.lane.b32.xlu0 %v4451_v27, %s5766_s14 }
  0xe0   : > { %v1391_v61 = vadd.f32 %v1319_v54, %v1099_v17  ;;  %v1392_v4 = vadd.f32 %v1320_v41, %v1100_v49  ;;  %v1774_v52 = vsel %vm1618_vm1, %v1766_v26, %v6196_v2  ;;  %v4909_v58 = vunpack.c.l.bf16 %v5218_v47  ;;  %v5255_v27 = vld [vmem:[%s7996_s2 + $0x3e8] sm:$0xff]  }
  0xe1   : > { %v2863_v5 = vsel %vm1435_vm0, %v1774_v52, %v2693_v43  ;;  %v703_v28 = vmul.f32 %v4765_v50, %v6067_v32  ;;  %v704_v6 = vmul.f32 %v4766_v22, %v6067_v32  ;;  %v4910_v23 = vunpack.c.h.bf16 %v5218_v47  ;;  %v1812_v50 = vld [vmem:[#allocation2 + $0x28] sm:$0x1] }
  0xe2   : > { %v1431_v7 = vpack.c.bf16 %v1392_v4, %v1391_v61  ;;  %3266 = vmatmul.mubr.bf16.vlgmr.msra.gmra.mrb[0].mxu1 %v2863_v5  ;;  %v995_v2 = vmul.f32 %v4909_v58, %v6334_v10  ;;  %v5053_v16 = vunpack.c.l.bf16 %v5254_v51  ;;  %v5054_v56 = vunpack.c.h.bf16 %v5254_v51  ;;  %v1824_v4 = vld [vmem:[#allocation2 + $0x148] sm:$0x1] }
  0xe3   : > { %v775_v24 = vadd.f32 %v703_v28, %v483_v46  ;;  %v776_v44 = vadd.f32 %v704_v6, %v484_v42  ;;  %v996_v38 = vmul.f32 %v4910_v23, %v6334_v10  ;;  %v4657_v53 = vunpack.c.l.bf16 %v5155_v55  ;;  %v4415_v42 = vld [vmem:[#allocation2 + $0x130] sm:$0x1]  ;;  %v5147_v23 = vld [vmem:[%s7996_s2 + $0x88] sm:$0xff]  }
  0xe4   : > { %1468 = vst.msk [vmem:[#allocation3 + $0x100] sm:$0xff] %vm1435_vm0, %v1431_v7  ;;  %v1287_v20 = vmul.f32 %v5053_v16, %v6337_v12  ;;  %v1288_v33 = vmul.f32 %v5054_v56, %v6337_v12  ;;  %v4658_v0 = vunpack.c.h.bf16 %v5155_v55  ;;  %v4801_v18 = vunpack.c.l.bf16 %v5191_v48  ;;  %v5183_v56 = vld [vmem:[%s7996_s2 + $0x1a8] sm:$0xff]  }
  0xe5   : > { %v1067_v11 = vadd.f32 %v995_v2, %v775_v24  ;;  %v1068_v29 = vadd.f32 %v996_v38, %v776_v44  ;;  %v501_v40 = vmul.f32 %v4657_v53, %v6064_v31  ;;  %v4802_v14 = vunpack.c.h.bf16 %v5191_v48  ;;  %v2703_v24 = vpop.permute.xlu0 %2702 }
  0xe6   : > { %v3077_v39 = vld [vmem:[#allocation3 + $0xc0] sm:$0xff]  ;;  %v502_v35 = vmul.f32 %v4658_v0, %v6064_v31  ;;  %v721_v25 = vmul.f32 %v4801_v18, %v6067_v32  ;;  %v4945_v54 = vunpack.c.l.bf16 %v5227_v37  ;;  %v4946_v63 = vunpack.c.h.bf16 %v5227_v37  ;;  %v5219_v18 = vld [vmem:[%s7996_s2 + $0x2c8] sm:$0xff]  }
  0xe7   : > { %5386 = vmatprep.subr.bf16.mxu1 %v3077_v39  ;;  %v1359_v59 = vadd.f32 %v1287_v20, %v1067_v11  ;;  %v1360_v47 = vadd.f32 %v1288_v33, %v1068_v29  ;;  %v722_v43 = vmul.f32 %v4802_v14, %v6067_v32  ;;  %v5089_v17 = vunpack.c.l.bf16 %v5263_v8  ;;  %v2727_v33 = vpop.permute.xlu1 %2726  ;;  %v8096_v29 = vld [vmem:[#allocation11_spill] sm:$0xff] }
  0xe8   : > { %v793_v49 = vadd.f32 %v721_v25, %v501_v40  ;;  %v1013_v41 = vmul.f32 %v4945_v54, %v6334_v10  ;;  %v1014_v26 = vmul.f32 %v4946_v63, %v6334_v10  ;;  %v5090_v46 = vunpack.c.h.bf16 %v5263_v8  ;;  %v1588_v39 = vld [vmem:[#allocation2 + $0x18] sm:$0x80]  ;;  %v5156_v63 = vld [vmem:[%s7996_s2 + $0xd0] sm:$0xff]  }
  0xe9   : > { %v1415_v22 = vpack.c.bf16 %v1360_v47, %v1359_v59  ;;  %v794_v51 = vadd.f32 %v722_v43, %v502_v35  ;;  %v1305_v61 = vmul.f32 %v5089_v17, %v6337_v12  ;;  %v2264_v28 = vshll.u32 %v4415_v42, 16 }
  0xea   : > { %v1085_v52 = vadd.f32 %v1013_v41, %v793_v49  ;;  %v1306_v58 = vmul.f32 %v5090_v46, %v6337_v12  ;;  %v1838_v6 = vshll.u32 %v1812_v50, 16  ;;  %v8094_v48 = vshrl.u32 %v6076_v60, 16 }
  0xeb   : > { %v3085_v55 = vld [vmem:[#allocation3 + $0x100] sm:$0xff]  ;;  %1452 = vst.msk [vmem:[#allocation3 + $0x80] sm:$0xff] %vm1435_vm0, %v1415_v22  ;;  %v1086_v5 = vadd.f32 %v1014_v26, %v794_v51  ;;  %v1922_v16 = vshll.u32 %v1824_v4, 16  ;;  %v2266_v38 = vrot.slane %v2264_v28, 1  ;;  %v8095_v37 = vshll.u32 %v6105_v62, 16  ;;  %v2671_v28 = vpop.permute.xlu0 %2670 }
  0xec   : > { %v6944_v7 = vor.u32 %v8094_v48, %v6837_v1  ;;  %5518 = vmatprep.subr.bf16.mxu0 %v3085_v55  ;;  %v1377_v2 = vadd.f32 %v1305_v61, %v1085_v52  ;;  %v1840_v53 = vrot.slane %v1838_v6, 1  ;;  %v4625_v1 = vunpack.c.l.bf16 %v5147_v23  ;;  %v5192_v4 = vld [vmem:[%s7996_s2 + $0x1f0] sm:$0xff]  }
  0xed   : > { %5519 = vmatpush3.bf16.msra.mxu0 %v3085_v55  ;;  %v1378_v44 = vadd.f32 %v1306_v58, %v1086_v5  ;;  %v6951_v20 = vrot.slane %v8095_v37, 1  ;;  %v1924_v60 = vrot.slane %v1922_v16, 1  ;;  %v4626_v0 = vunpack.c.h.bf16 %v5147_v23  ;;  %v5228_v52 = vld [vmem:[%s7996_s2 + $0x310] sm:$0xff]  }
  0xee   : > { %v2267_v11 = vsel %vm1827_vm2, %v6842_v9, %v2266_v38  ;;  %v1841_v40 = vsel %vm1827_vm2, %v8096_v29, %v1840_v53  ;;  %v4769_v14 = vunpack.c.l.bf16 %v5183_v56  ;;  %v485_v54 = vmul.f32 %v4625_v1, %v6064_v31  ;;  %v5264_v37 = vld [vmem:[%s7996_s2 + $0x430] sm:$0xff]  }
  0xef   : > { %v1424_v8 = vpack.c.bf16 %v1378_v44, %v1377_v2  ;;  %2754 = vrot.lane.b32.xlu1 %v2267_v11, %s5766_s14  ;;  %v2883_v35 = vsel %vm1435_vm0, %v1841_v40, %v2703_v24  ;;  %v1925_v25 = vsel %vm1827_vm2, %v6944_v7, %v1924_v60  ;;  %v486_v9 = vmul.f32 %v4626_v0, %v6064_v31 }
  0xf0   : > { %3177 = vmatprep.mubr.bf16.mxu0 %v2883_v35  ;;  %v2931_v59 = vsel %vm1435_vm0, %v1925_v25, %v2727_v33  ;;  %v4770_v47 = vunpack.c.h.bf16 %v5183_v56  ;;  %v705_v43 = vmul.f32 %v4769_v14, %v6067_v32  ;;  %v4913_v17 = vunpack.c.l.bf16 %v5219_v18  ;;  %v8097_v56 = vld [vmem:[#allocation10_spill] sm:$0xff]  ;;  %v1612_v33 = vld [vmem:[#allocation2 + $0x138] sm:$0x80] }
  0xf1   : > { %1461 = vst.msk [vmem:[#allocation3 + $0xc8] sm:$0xff] %vm1435_vm0, %v1424_v8  ;;  %3273 = vmatprep.mubr.bf16.mxu1 %v2931_v59  ;;  %v4914_v41 = vunpack.c.h.bf16 %v5219_v18  ;;  %v5057_v26 = vunpack.c.l.bf16 %v5255_v27  ;;  %v5058_v46 = vunpack.c.h.bf16 %v5255_v27  ;;  %v1632_v42 = vshrl.u32 %v1588_v39, 16  ;;  %v5148_v8 = vld [vmem:[%s7996_s2 + $0x90] sm:$0xff]  }
  0xf2   : > { %v3069_v49 = vld [vmem:[#allocation3 + $0x80] sm:$0xff]  ;;  %v706_v50 = vmul.f32 %v4770_v47, %v6067_v32  ;;  %v777_v22 = vadd.f32 %v705_v43, %v485_v54  ;;  %v997_v51 = vmul.f32 %v4913_v17, %v6334_v10  ;;  %v4661_v61 = vunpack.c.l.bf16 %v5156_v63 }
  0xf3   : > { %5387 = vmatpush3.bf16.msra.mxu1 %v3069_v49  ;;  %v998_v58 = vmul.f32 %v4914_v41, %v6334_v10  ;;  %v1289_v55 = vmul.f32 %v5057_v26, %v6337_v12  ;;  %v1290_v5 = vmul.f32 %v5058_v46, %v6337_v12  ;;  %v1634_v6 = vrot.slane %v1632_v42, 7  ;;  %v5184_v43 = vld [vmem:[%s7996_s2 + $0x1b0] sm:$0xff]   ;;  %v2695_v41 = vpop.permute.xlu1 %2694 }
  0xf4   : > { %v778_v23 = vadd.f32 %v706_v50, %v486_v9  ;;  %v1069_v48 = vadd.f32 %v997_v51, %v777_v22  ;;  %v4662_v2 = vunpack.c.h.bf16 %v5156_v63  ;;  %v503_v16 = vmul.f32 %v4661_v61, %v6064_v31  ;;  %v5220_v17 = vld [vmem:[%s7996_s2 + $0x2d0] sm:$0xff]  }
  0xf5   : > { %v1642_v24 = vsel %vm1618_vm1, %v1634_v6, %v8097_v56  ;;  %v4805_v44 = vunpack.c.l.bf16 %v5192_v4  ;;  %v4806_v38 = vunpack.c.h.bf16 %v5192_v4  ;;  %v4949_v53 = vunpack.c.l.bf16 %v5228_v52  ;;  %v8098_v4 = vld [vmem:[#allocation12_spill] sm:$0xff]  ;;  %v5157_v6 = vld [vmem:[%s7996_s2 + $0xd8] sm:$0xff]  }
  0xf6   : > { %v1070_v60 = vadd.f32 %v998_v58, %v778_v23  ;;  %v1361_v1 = vadd.f32 %v1289_v55, %v1069_v48  ;;  %v2819_v0 = vsel %vm1435_vm0, %v1642_v24, %v2671_v28  ;;  %v504_v18 = vmul.f32 %v4662_v2, %v6064_v31  ;;  %v5256_v28 = vld [vmem:[%s7996_s2 + $0x3f0] sm:$0xff]  }
  0xf7   : > { %3178 = vmatmul.mubr.bf16.gmra.mrb[4].mxu0 %v2819_v0  ;;  %v723_v29 = vmul.f32 %v4805_v44, %v6067_v32  ;;  %v724_v40 = vmul.f32 %v4806_v38, %v6067_v32  ;;  %v4950_v14 = vunpack.c.h.bf16 %v5228_v52  ;;  %v1015_v27 = vmul.f32 %v4949_v53, %v6334_v10  ;;  %v5193_v53 = vld [vmem:[%s7996_s2 + $0x1f8] sm:$0xff]  }
  0xf8   : > { %v3078_v11 = vld [vmem:[#allocation3 + $0xc8] sm:$0xff]  ;;  %v1362_v39 = vadd.f32 %v1290_v5, %v1070_v60  ;;  %v5093_v35 = vunpack.c.l.bf16 %v5264_v37  ;;  %v5094_v25 = vunpack.c.h.bf16 %v5264_v37  ;;  %v1776_v54 = vshrl.u32 %v1612_v33, 16 }
  0xf9   : > { %5388 = vmatprep.subr.bf16.mxu1 %v3078_v11  ;;  %v795_v9 = vadd.f32 %v723_v29, %v503_v16  ;;  %v796_v63 = vadd.f32 %v724_v40, %v504_v18  ;;  %v1016_v59 = vmul.f32 %v4950_v14, %v6334_v10  ;;  %v4629_v47 = vunpack.c.l.bf16 %v5148_v8  ;;  %v5229_v29 = vld [vmem:[%s7996_s2 + $0x318] sm:$0xff]  }
  0xfa   : > { %v1416_v49 = vpack.c.bf16 %v1362_v39, %v1361_v1  ;;  %v1307_v26 = vmul.f32 %v5093_v35, %v6337_v12  ;;  %v1308_v46 = vmul.f32 %v5094_v25, %v6337_v12  ;;  %v1778_v42 = vrot.slane %v1776_v54, 7  ;;  %v5265_v40 = vld [vmem:[%s7996_s2 + $0x438] sm:$0xff]  }
  0xfb   : > { %v1087_v50 = vadd.f32 %v1015_v27, %v795_v9  ;;  %v1088_v22 = vadd.f32 %v1016_v59, %v796_v63  ;;  %v4630_v51 = vunpack.c.h.bf16 %v5148_v8  ;;  %v487_v61 = vmul.f32 %v4629_v47, %v6064_v31 }
  0xfc   : > { %1453 = vst.msk [vmem:[#allocation3 + $0x88] sm:$0xff] %vm1435_vm0, %v1416_v49  ;;  %v1786_v52 = vsel %vm1618_vm1, %v1778_v42, %v8098_v4  ;;  %v4773_v58 = vunpack.c.l.bf16 %v5184_v43  ;;  %v4774_v55 = vunpack.c.h.bf16 %v5184_v43  ;;  %v4917_v5 = vunpack.c.l.bf16 %v5220_v17 }
  0xfd   : > { %v1379_v23 = vadd.f32 %v1307_v26, %v1087_v50  ;;  %v1380_v48 = vadd.f32 %v1308_v46, %v1088_v22  ;;  %v2867_v2 = vsel %vm1435_vm0, %v1786_v52, %v2695_v41  ;;  %v488_v16 = vmul.f32 %v4630_v51, %v6064_v31  ;;  %v4416_v50 = vld [vmem:[#allocation2 + $0x148] sm:$0x1]  ;;  %v1813_v52 = vld [vmem:[#allocation2 + $0x40] sm:$0x1] }
  0xfe   : > { %3274 = vmatmul.mubr.bf16.gmra.mrb[4].mxu1 %v2867_v2  ;;  %v707_v56 = vmul.f32 %v4773_v58, %v6067_v32  ;;  %v708_v24 = vmul.f32 %v4774_v55, %v6067_v32  ;;  %v4918_v44 = vunpack.c.h.bf16 %v5220_v17  ;;  %v999_v38 = vmul.f32 %v4917_v5, %v6334_v10  ;;  %v1825_v58 = vld [vmem:[#allocation2 + $0x160] sm:$0x1] }
  0xff   : > { %v1425_v37 = vpack.c.bf16 %v1380_v48, %v1379_v23  ;;  %v5061_v33 = vunpack.c.l.bf16 %v5256_v28  ;;  %v5062_v60 = vunpack.c.h.bf16 %v5256_v28  ;;  %v4665_v1 = vunpack.c.l.bf16 %v5157_v6 }
 0x100   : > { %v779_v0 = vadd.f32 %v707_v56, %v487_v61  ;;  %v780_v18 = vadd.f32 %v708_v24, %v488_v16  ;;  %v1000_v8 = vmul.f32 %v4918_v44, %v6334_v10  ;;  %v4666_v11 = vunpack.c.h.bf16 %v5157_v6 }
 0x101   : > { %1462 = vst.msk [vmem:[#allocation3 + $0xd0] sm:$0xff] %vm1435_vm0, %v1425_v37  ;;  %v1291_v14 = vmul.f32 %v5061_v33, %v6337_v12  ;;  %v1292_v27 = vmul.f32 %v5062_v60, %v6337_v12  ;;  %v505_v39 = vmul.f32 %v4665_v1, %v6064_v31  ;;  %v4809_v35 = vunpack.c.l.bf16 %v5193_v53  ;;  %v5185_v33 = vld [vmem:[%s7996_s2 + $0x1b8] sm:$0xff]  }
 0x102   : > { %v1071_v25 = vadd.f32 %v999_v38, %v779_v0  ;;  %v1072_v54 = vadd.f32 %v1000_v8, %v780_v18  ;;  %v506_v9 = vmul.f32 %v4666_v11, %v6064_v31  ;;  %v4810_v63 = vunpack.c.h.bf16 %v5193_v53  ;;  %v5149_v38 = vld [vmem:[%s7996_s2 + $0x98] sm:$0xff]   ;;  %v8100_v18 = vld [vmem:[#allocation13_spill] sm:$0xff] }
 0x103   : > { %v3070_v59 = vld [vmem:[#allocation3 + $0x88] sm:$0xff]  ;;  %v725_v47 = vmul.f32 %v4809_v35, %v6067_v32  ;;  %v4953_v43 = vunpack.c.l.bf16 %v5229_v29  ;;  %v4954_v17 = vunpack.c.h.bf16 %v5229_v29  ;;  %v5097_v49 = vunpack.c.l.bf16 %v5265_v40  ;;  %v8102_v35 = vld [vmem:[#allocation17_spill] sm:$0xff] }
 0x104   : > { %5389 = vmatpush3.bf16.msra.mxu1 %v3070_v59  ;;  %v1363_v41 = vadd.f32 %v1291_v14, %v1071_v25  ;;  %v1364_v26 = vadd.f32 %v1292_v27, %v1072_v54  ;;  %v726_v46 = vmul.f32 %v4810_v63, %v6067_v32  ;;  %v5098_v42 = vunpack.c.h.bf16 %v5265_v40  ;;  %v5221_v27 = vld [vmem:[%s7996_s2 + $0x2d8] sm:$0xff]   ;;  %v1590_v63 = vld [vmem:[#allocation2 + $0x30] sm:$0x80]  ;;  %v5158_v59 = vld [vmem:[%s7996_s2 + $0xe0] sm:$0xff]  }
 0x105   : > { %v797_v22 = vadd.f32 %v725_v47, %v505_v39  ;;  %v1017_v51 = vmul.f32 %v4953_v43, %v6334_v10  ;;  %v1018_v61 = vmul.f32 %v4954_v17, %v6334_v10  ;;  %v1309_v4 = vmul.f32 %v5097_v49, %v6337_v12 }
 0x106   : > { %v1417_v55 = vpack.c.bf16 %v1364_v26, %v1363_v41  ;;  %v798_v5 = vadd.f32 %v726_v46, %v506_v9  ;;  %v1310_v28 = vmul.f32 %v5098_v42, %v6337_v12  ;;  %v2271_v23 = vshll.u32 %v4416_v50, 16 }
 0x107   : > { %v1089_v6 = vadd.f32 %v1017_v51, %v797_v22  ;;  %v8099_v48 = vshrl.u32 %v6105_v62, 16  ;;  %v1845_v24 = vshll.u32 %v1813_v52, 16  ;;  %v1929_v44 = vshll.u32 %v1825_v58, 16  ;;  %v2705_v62 = vpop.permute.xlu0 %2704  ;;  %v5194_v52 = vld [vmem:[%s7996_s2 + $0x200] sm:$0xff]  }
 0x108   : > { %v3079_v16 = vld [vmem:[#allocation3 + $0xd0] sm:$0xff]  ;;  %1454 = vst.msk [vmem:[#allocation3 + $0x90] sm:$0xff] %vm1435_vm0, %v1417_v55  ;;  %v1090_v56 = vadd.f32 %v1018_v61, %v798_v5  ;;  %v2273_v37 = vrot.slane %v2271_v23, 1  ;;  %v8101_v8 = vshll.u32 %v8100_v18, 16  ;;  %v4633_v40 = vunpack.c.l.bf16 %v5149_v38 }
 0x109   : > { %v7048_v2 = vor.u32 %v8099_v48, %v6951_v20  ;;  %5390 = vmatprep.subr.bf16.mxu1 %v3079_v16  ;;  %v1381_v53 = vadd.f32 %v1309_v4, %v1089_v6  ;;  %v2729_v20 = vpop.permute.xlu1 %2728  ;;  %v1847_v1 = vrot.slane %v1845_v24, 1  ;;  %v1931_v0 = vrot.slane %v1929_v44, 1  ;;  %v5230_v6 = vld [vmem:[%s7996_s2 + $0x320] sm:$0xff]  }
 0x10a   : > { %v1382_v60 = vadd.f32 %v1310_v28, %v1090_v56  ;;  %v7059_v11 = vrot.slane %v8101_v8, 1  ;;  %v2274_v29 = vsel %vm1827_vm2, %v6944_v7, %v2273_v37  ;;  %v4634_v14 = vunpack.c.h.bf16 %v5149_v38  ;;  %v5257_v7 = vld [vmem:[%s7996_s2 + $0x3f8] sm:$0xff]   ;;  %v1614_v8 = vld [vmem:[#allocation2 + $0x150] sm:$0x80] }
 0x10b   : > { %2756 = vrot.lane.b32.xlu1 %v2274_v29, %s5766_s14  ;;  %v1848_v25 = vsel %vm1827_vm2, %v8102_v35, %v1847_v1  ;;  %v1932_v54 = vsel %vm1827_vm2, %v7048_v2, %v1931_v0  ;;  %v4777_v9 = vunpack.c.l.bf16 %v5185_v33  ;;  %v489_v17 = vmul.f32 %v4633_v40, %v6064_v31  ;;  %v2673_v16 = vpop.permute.xlu0 %2672 }
 0x10c   : > { %v1426_v39 = vpack.c.bf16 %v1382_v60, %v1381_v53  ;;  %v2887_v47 = vsel %vm1435_vm0, %v1848_v25, %v2705_v62  ;;  %v2935_v43 = vsel %vm1435_vm0, %v1932_v54, %v2729_v20  ;;  %v490_v49 = vmul.f32 %v4634_v14, %v6064_v31  ;;  %v8103_v62 = vld [vmem:[#allocation14_spill] sm:$0xff] }
 0x10d   : > { %3185 = vmatprep.mubr.bf16.mxu0 %v2887_v47  ;;  %3281 = vmatprep.mubr.bf16.mxu1 %v2935_v43  ;;  %v4778_v41 = vunpack.c.h.bf16 %v5185_v33  ;;  %v709_v26 = vmul.f32 %v4777_v9, %v6067_v32  ;;  %v4921_v46 = vunpack.c.l.bf16 %v5221_v27  ;;  %v4922_v42 = vunpack.c.h.bf16 %v5221_v27  ;;  %v5266_v33 = vld [vmem:[%s7996_s2 + $0x440] sm:$0xff]  }
 0x10e   : > { %1463 = vst.msk [vmem:[#allocation3 + $0xd8] sm:$0xff] %vm1435_vm0, %v1426_v39  ;;  %v5065_v22 = vunpack.c.l.bf16 %v5257_v7  ;;  %v5066_v51 = vunpack.c.h.bf16 %v5257_v7  ;;  %v1644_v61 = vshrl.u32 %v1590_v63, 16  ;;  %v4669_v4 = vunpack.c.l.bf16 %v5158_v59  ;;  %v5150_v39 = vld [vmem:[%s7996_s2 + $0xa0] sm:$0xff]  }
 0x10f   : > { %v3071_v50 = vld [vmem:[#allocation3 + $0x90] sm:$0xff]  ;;  %v710_v58 = vmul.f32 %v4778_v41, %v6067_v32  ;;  %v781_v55 = vadd.f32 %v709_v26, %v489_v17  ;;  %v1001_v5 = vmul.f32 %v4921_v46, %v6334_v10  ;;  %v1002_v28 = vmul.f32 %v4922_v42, %v6334_v10 }
 0x110   : > { %5391 = vmatpush3.bf16.msra.mxu1 %v3071_v50  ;;  %v1293_v23 = vmul.f32 %v5065_v22, %v6337_v12  ;;  %v1294_v48 = vmul.f32 %v5066_v51, %v6337_v12  ;;  %v1646_v56 = vrot.slane %v1644_v61, 7  ;;  %v4670_v24 = vunpack.c.h.bf16 %v5158_v59  ;;  %v5222_v50 = vld [vmem:[%s7996_s2 + $0x2e0] sm:$0xff]   ;;  %v2697_v51 = vpop.permute.xlu1 %2696 }
 0x111   : > { %v782_v44 = vadd.f32 %v710_v58, %v490_v49  ;;  %v1073_v38 = vadd.f32 %v1001_v5, %v781_v55  ;;  %v507_v53 = vmul.f32 %v4669_v4, %v6064_v31  ;;  %v4813_v37 = vunpack.c.l.bf16 %v5194_v52  ;;  %v5186_v49 = vld [vmem:[%s7996_s2 + $0x1c0] sm:$0xff]  }
 0x112   : > { %v1654_v20 = vsel %vm1618_vm1, %v1646_v56, %v8103_v62  ;;  %v508_v60 = vmul.f32 %v4670_v24, %v6064_v31  ;;  %v4814_v1 = vunpack.c.h.bf16 %v5194_v52  ;;  %v4957_v0 = vunpack.c.l.bf16 %v5230_v6 }
 0x113   : > { %v1074_v29 = vadd.f32 %v1002_v28, %v782_v44  ;;  %v1365_v40 = vadd.f32 %v1293_v23, %v1073_v38  ;;  %v2823_v14 = vsel %vm1435_vm0, %v1654_v20, %v2673_v16  ;;  %v727_v27 = vmul.f32 %v4813_v37, %v6067_v32  ;;  %v5159_v44 = vld [vmem:[%s7996_s2 + $0xe8] sm:$0xff]  }
 0x114   : > { %3186 = vmatmul.mubr.bf16.gmra.mrb[8].mxu0 %v2823_v14  ;;  %v728_v54 = vmul.f32 %v4814_v1, %v6067_v32  ;;  %v4958_v9 = vunpack.c.h.bf16 %v5230_v6  ;;  %v1019_v7 = vmul.f32 %v4957_v0, %v6334_v10  ;;  %v5101_v63 = vunpack.c.l.bf16 %v5266_v33  ;;  %v5258_v6 = vld [vmem:[%s7996_s2 + $0x400] sm:$0xff]  }
 0x115   : > { %v3080_v25 = vld [vmem:[#allocation3 + $0xd8] sm:$0xff]  ;;  %v1366_v59 = vadd.f32 %v1294_v48, %v1074_v29  ;;  %v799_v47 = vadd.f32 %v727_v27, %v507_v53  ;;  %v5102_v43 = vunpack.c.h.bf16 %v5266_v33  ;;  %v1788_v17 = vshrl.u32 %v1614_v8, 16 }
 0x116   : > { %5392 = vmatprep.subr.bf16.mxu1 %v3080_v25  ;;  %v800_v41 = vadd.f32 %v728_v54, %v508_v60  ;;  %v1020_v26 = vmul.f32 %v4958_v9, %v6334_v10  ;;  %v1311_v46 = vmul.f32 %v5101_v63, %v6337_v12  ;;  %v4637_v42 = vunpack.c.l.bf16 %v5150_v39  ;;  %v8104_v48 = vld [vmem:[#allocation16_spill] sm:$0xff] }
 0x117   : > { %v1418_v22 = vpack.c.bf16 %v1366_v59, %v1365_v40  ;;  %v1091_v61 = vadd.f32 %v1019_v7, %v799_v47  ;;  %v1312_v4 = vmul.f32 %v5102_v43, %v6337_v12  ;;  %v1790_v52 = vrot.slane %v1788_v17, 7  ;;  %v5195_v8 = vld [vmem:[%s7996_s2 + $0x208] sm:$0xff]  }
 0x118   : > { %v1092_v58 = vadd.f32 %v1020_v26, %v800_v41  ;;  %v4638_v55 = vunpack.c.h.bf16 %v5150_v39  ;;  %v491_v5 = vmul.f32 %v4637_v42, %v6064_v31  ;;  %v4781_v28 = vunpack.c.l.bf16 %v5186_v49  ;;  %v5231_v39 = vld [vmem:[%s7996_s2 + $0x328] sm:$0xff]  }
 0x119   : > { %1455 = vst.msk [vmem:[#allocation3 + $0x98] sm:$0xff] %vm1435_vm0, %v1418_v22  ;;  %v1383_v23 = vadd.f32 %v1311_v46, %v1091_v61  ;;  %v1798_v16 = vsel %vm1618_vm1, %v1790_v52, %v8104_v48  ;;  %v4782_v56 = vunpack.c.h.bf16 %v5186_v49  ;;  %v4925_v24 = vunpack.c.l.bf16 %v5222_v50  ;;  %v5267_v63 = vld [vmem:[%s7996_s2 + $0x448] sm:$0xff]  }
 0x11a   : > { %v1384_v38 = vadd.f32 %v1312_v4, %v1092_v58  ;;  %v2871_v53 = vsel %vm1435_vm0, %v1798_v16, %v2697_v51  ;;  %v492_v37 = vmul.f32 %v4638_v55, %v6064_v31  ;;  %v711_v33 = vmul.f32 %v4781_v28, %v6067_v32  ;;  %v2707_v28 = vpop.permute.xlu0 %2706  ;;  %v1814_v16 = vld [vmem:[#allocation2 + $0x58] sm:$0x1] }
 0x11b   : > { %3282 = vmatmul.mubr.bf16.gmra.mrb[8].mxu1 %v2871_v53  ;;  %v712_v20 = vmul.f32 %v4782_v56, %v6067_v32  ;;  %v4926_v60 = vunpack.c.h.bf16 %v5222_v50  ;;  %v1003_v1 = vmul.f32 %v4925_v24, %v6334_v10  ;;  %v5069_v0 = vunpack.c.l.bf16 %v5258_v6  ;;  %v1826_v56 = vld [vmem:[#allocation2 + $0x178] sm:$0x1] }
 0x11c   : > { %v1427_v29 = vpack.c.bf16 %v1384_v38, %v1383_v23  ;;  %v783_v40 = vadd.f32 %v711_v33, %v491_v5  ;;  %v5070_v14 = vunpack.c.h.bf16 %v5258_v6  ;;  %v4673_v27 = vunpack.c.l.bf16 %v5159_v44  ;;  %v4417_v5 = vld [vmem:[#allocation2 + $0x160] sm:$0x1] }
 0x11d   : > { %v784_v25 = vadd.f32 %v712_v20, %v492_v37  ;;  %v1004_v54 = vmul.f32 %v4926_v60, %v6334_v10  ;;  %v1295_v9 = vmul.f32 %v5069_v0, %v6337_v12  ;;  %v4674_v7 = vunpack.c.h.bf16 %v5159_v44 }
 0x11e   : > { %1464 = vst.msk [vmem:[#allocation3 + $0xe0] sm:$0xff] %vm1435_vm0, %v1427_v29  ;;  %v1075_v59 = vadd.f32 %v1003_v1, %v783_v40  ;;  %v1296_v47 = vmul.f32 %v5070_v14, %v6337_v12  ;;  %v509_v43 = vmul.f32 %v4673_v27, %v6064_v31  ;;  %v4817_v17 = vunpack.c.l.bf16 %v5195_v8  ;;  %v5151_v29 = vld [vmem:[%s7996_s2 + $0xa8] sm:$0xff]  }
 0x11f   : > { %v1076_v49 = vadd.f32 %v1004_v54, %v784_v25  ;;  %v510_v41 = vmul.f32 %v4674_v7, %v6064_v31  ;;  %v4818_v26 = vunpack.c.h.bf16 %v5195_v8  ;;  %v4961_v46 = vunpack.c.l.bf16 %v5231_v39  ;;  %v5187_v40 = vld [vmem:[%s7996_s2 + $0x1c8] sm:$0xff]  }
 0x120   : > { %v3072_v42 = vld [vmem:[#allocation3 + $0x98] sm:$0xff]  ;;  %v1367_v50 = vadd.f32 %v1295_v9, %v1075_v59  ;;  %v729_v22 = vmul.f32 %v4817_v17, %v6067_v32  ;;  %v4962_v51 = vunpack.c.h.bf16 %v5231_v39  ;;  %v5105_v61 = vunpack.c.l.bf16 %v5267_v63  ;;  %v8106_v17 = vld [vmem:[#allocation19_spill] sm:$0xff] }
 0x121   : > { %5393 = vmatpush3.bf16.msra.mxu1 %v3072_v42  ;;  %v1368_v4 = vadd.f32 %v1296_v47, %v1076_v49  ;;  %v730_v52 = vmul.f32 %v4818_v26, %v6067_v32  ;;  %v1021_v58 = vmul.f32 %v4961_v46, %v6334_v10  ;;  %v5106_v55 = vunpack.c.h.bf16 %v5267_v63  ;;  %v5223_v59 = vld [vmem:[%s7996_s2 + $0x2e8] sm:$0xff]   ;;  %v2675_v47 = vpop.permute.xlu0 %2674  ;;  %v5160_v42 = vld [vmem:[%s7996_s2 + $0xf0] sm:$0xff]  }
 0x122   : > { %v801_v6 = vadd.f32 %v729_v22, %v509_v43  ;;  %v1022_v23 = vmul.f32 %v4962_v51, %v6334_v10  ;;  %v1313_v48 = vmul.f32 %v5105_v61, %v6337_v12  ;;  %v2278_v37 = vshll.u32 %v4417_v5, 16  ;;  %v1592_v46 = vld [vmem:[#allocation2 + $0x48] sm:$0x80] }
 0x123   : > { %v1419_v24 = vpack.c.bf16 %v1368_v4, %v1367_v50  ;;  %v802_v44 = vadd.f32 %v730_v52, %v510_v41  ;;  %v1314_v38 = vmul.f32 %v5106_v55, %v6337_v12  ;;  %v8105_v33 = vshrl.u32 %v8100_v18, 16  ;;  %v2731_v18 = vpop.permute.xlu1 %2730 }
 0x124   : > { %v1093_v53 = vadd.f32 %v1021_v58, %v801_v6  ;;  %v1852_v0 = vshll.u32 %v1814_v16, 16  ;;  %v1936_v8 = vshll.u32 %v1826_v56, 16  ;;  %v2280_v27 = vrot.slane %v2278_v37, 1  ;;  %v5196_v16 = vld [vmem:[%s7996_s2 + $0x210] sm:$0xff]  }
 0x125   : > { %v7156_v20 = vor.u32 %v8105_v33, %v7059_v11  ;;  %v3081_v60 = vld [vmem:[#allocation3 + $0xe0] sm:$0xff]  ;;  %1456 = vst.msk [vmem:[#allocation3 + $0xa0] sm:$0xff] %vm1435_vm0, %v1419_v24  ;;  %v1094_v1 = vadd.f32 %v1022_v23, %v802_v44  ;;  %v4641_v9 = vunpack.c.l.bf16 %v5151_v29  ;;  %v4642_v7 = vunpack.c.h.bf16 %v5151_v29 }
 0x126   : > { %5394 = vmatprep.subr.bf16.mxu1 %v3081_v60  ;;  %v1385_v14 = vadd.f32 %v1313_v48, %v1093_v53  ;;  %v1854_v39 = vrot.slane %v1852_v0, 1  ;;  %v1938_v25 = vrot.slane %v1936_v8, 1  ;;  %v2281_v54 = vsel %vm1827_vm2, %v7048_v2, %v2280_v27  ;;  %v5259_v2 = vld [vmem:[%s7996_s2 + $0x408] sm:$0xff]   ;;  %v5232_v53 = vld [vmem:[%s7996_s2 + $0x330] sm:$0xff]   ;;  %v7198_v0 = vpop.permute.xlu0 %2708 }
 0x127   : > { %v1386_v11 = vadd.f32 %v1314_v38, %v1094_v1  ;;  %v4785_v63 = vunpack.c.l.bf16 %v5187_v40  ;;  %2758 = vrot.lane.b32.xlu1 %v2281_v54, %s5766_s14  ;;  %v4786_v26 = vunpack.c.h.bf16 %v5187_v40  ;;  %v493_v51 = vmul.f32 %v4641_v9, %v6064_v31  ;;  %v5268_v27 = vld [vmem:[%s7996_s2 + $0x450] sm:$0xff]   ;;  %v5163_v9 = vld [vmem:[%s7996_s2 + $0x108] sm:$0xff]  }
 0x128   : > { %v1855_v49 = vsel %vm1827_vm2, %v8106_v17, %v1854_v39  ;;  %v1939_v41 = vsel %vm1827_vm2, %v7156_v20, %v1938_v25  ;;  %v494_v61 = vmul.f32 %v4642_v7, %v6064_v31  ;;  %v4929_v58 = vunpack.c.l.bf16 %v5223_v59 }
 0x129   : > { %v1428_v43 = vpack.c.bf16 %v1386_v11, %v1385_v14  ;;  %v2891_v50 = vsel %vm1435_vm0, %v1855_v49, %v2707_v28  ;;  %v2939_v22 = vsel %vm1435_vm0, %v1939_v41, %v2731_v18  ;;  %v713_v4 = vmul.f32 %v4785_v63, %v6067_v32  ;;  %v8107_v18 = vld [vmem:[#allocation20_spill] sm:$0xff] }
 0x12a   : > { %3193 = vmatprep.mubr.bf16.mxu0 %v2891_v50  ;;  %3289 = vmatprep.mubr.bf16.mxu1 %v2939_v22  ;;  %v714_v52 = vmul.f32 %v4786_v26, %v6067_v32  ;;  %v4930_v55 = vunpack.c.h.bf16 %v5223_v59  ;;  %v5073_v6 = vunpack.c.l.bf16 %v5259_v2  ;;  %v5074_v23 = vunpack.c.h.bf16 %v5259_v2 }
 0x12b   : > { %1465 = vst.msk [vmem:[#allocation3 + $0xe8] sm:$0xff] %vm1435_vm0, %v1428_v43  ;;  %v1656_v28 = vshrl.u32 %v1592_v46, 16  ;;  %v4677_v48 = vunpack.c.l.bf16 %v5160_v42  ;;  %v785_v56 = vadd.f32 %v713_v4, %v493_v51  ;;  %v1005_v44 = vmul.f32 %v4929_v58, %v6334_v10  ;;  %v2699_v4 = vpop.permute.xlu1 %2698 }
 0x12c   : > { %v3073_v5 = vld [vmem:[#allocation3 + $0xa0] sm:$0xff]  ;;  %v786_v24 = vadd.f32 %v714_v52, %v494_v61  ;;  %v1006_v38 = vmul.f32 %v4930_v55, %v6334_v10  ;;  %v1297_v37 = vmul.f32 %v5073_v6, %v6337_v12  ;;  %v1298_v33 = vmul.f32 %v5074_v23, %v6337_v12  ;;  %v5271_v6 = vld [vmem:[%s7996_s2 + $0x468] sm:$0xff]   ;;  %v7225_v23 = vpop.permute.xlu0 %2676 }
 0x12d   : > { %5395 = vmatpush3.bf16.msra.mxu1 %v3073_v5  ;;  %v1658_v60 = vrot.slane %v1656_v28, 7  ;;  %v4678_v1 = vunpack.c.h.bf16 %v5160_v42  ;;  %v1077_v8 = vadd.f32 %v1005_v44, %v785_v56  ;;  %v511_v40 = vmul.f32 %v4677_v48, %v6064_v31  ;;  %v5199_v42 = vld [vmem:[%s7996_s2 + $0x228] sm:$0xff]  }
 0x12e   : > { %v1078_v29 = vadd.f32 %v1006_v38, %v786_v24  ;;  %v4821_v14 = vunpack.c.l.bf16 %v5196_v16  ;;  %v4822_v25 = vunpack.c.h.bf16 %v5196_v16  ;;  %v4965_v54 = vunpack.c.l.bf16 %v5232_v53 }
 0x12f   : > { %v1666_v11 = vsel %vm1618_vm1, %v1658_v60, %v8107_v18  ;;  %v512_v39 = vmul.f32 %v4678_v1, %v6064_v31  ;;  %v1369_v7 = vadd.f32 %v1297_v37, %v1077_v8  ;;  %v4966_v26 = vunpack.c.h.bf16 %v5232_v53  ;;  %v1616_v37 = vld [vmem:[#allocation2 + $0x168] sm:$0x80] }
 0x130   : > { %v1370_v63 = vadd.f32 %v1298_v33, %v1078_v29  ;;  %v2827_v59 = vsel %vm1435_vm0, %v1666_v11, %v2675_v47  ;;  %v731_v43 = vmul.f32 %v4821_v14, %v6067_v32  ;;  %v732_v41 = vmul.f32 %v4822_v25, %v6067_v32  ;;  %v5235_v47 = vld [vmem:[%s7996_s2 + $0x348] sm:$0xff]   ;;  %v5152_v29 = vld [vmem:[%s7996_s2 + $0xb0] sm:$0xff]  }
 0x131   : > { %3194 = vmatmul.mubr.bf16.gmra.mrb[12].mxu0 %v2827_v59  ;;  %v1023_v2 = vmul.f32 %v4965_v54, %v6334_v10  ;;  %v5109_v46 = vunpack.c.l.bf16 %v5268_v27  ;;  %v5110_v51 = vunpack.c.h.bf16 %v5268_v27  ;;  %v4689_v61 = vunpack.c.l.bf16 %v5163_v9 }
 0x132   : > { %v3082_v49 = vld [vmem:[#allocation3 + $0xe8] sm:$0xff]  ;;  %v1420_v50 = vpack.c.bf16 %v1370_v63, %v1369_v7  ;;  %v803_v22 = vadd.f32 %v731_v43, %v511_v40  ;;  %v804_v52 = vadd.f32 %v732_v41, %v512_v39  ;;  %v1024_v58 = vmul.f32 %v4966_v26, %v6334_v10  ;;  %v5188_v39 = vld [vmem:[%s7996_s2 + $0x1d0] sm:$0xff]   ;;  %v7246_v26 = vpop.permute.xlu1 %2780 }
 0x133   : > { %5396 = vmatprep.subr.bf16.mxu1 %v3082_v49  ;;  %v1315_v55 = vmul.f32 %v5109_v46, %v6337_v12  ;;  %v4690_v5 = vunpack.c.h.bf16 %v5163_v9  ;;  %v1316_v48 = vmul.f32 %v5110_v51, %v6337_v12  ;;  %v517_v16 = vmul.f32 %v4689_v61, %v6064_v31  ;;  %v5224_v63 = vld [vmem:[%s7996_s2 + $0x2f0] sm:$0xff]  }
 0x134   : > { %1457 = vst.msk [vmem:[#allocation3 + $0xa8] sm:$0xff] %vm1435_vm0, %v1420_v50  ;;  %v1095_v28 = vadd.f32 %v1023_v2, %v803_v22  ;;  %v4833_v56 = vunpack.c.l.bf16 %v5199_v42  ;;  %v1096_v24 = vadd.f32 %v1024_v58, %v804_v52  ;;  %v4834_v38 = vunpack.c.h.bf16 %v5199_v42  ;;  %v7248_v2 = vpop.permute.xlu0 %2710 }
 0x135   : > { %v518_v44 = vmul.f32 %v4690_v5, %v6064_v31  ;;  %v4977_v53 = vunpack.c.l.bf16 %v5235_v47  ;;  %v4978_v1 = vunpack.c.h.bf16 %v5235_v47  ;;  %v5121_v8 = vunpack.c.l.bf16 %v5271_v6 }
 0x136   : > { %v1387_v33 = vadd.f32 %v1315_v55, %v1095_v28  ;;  %v737_v60 = vmul.f32 %v4833_v56, %v6067_v32  ;;  %v1388_v40 = vadd.f32 %v1316_v48, %v1096_v24  ;;  %v738_v14 = vmul.f32 %v4834_v38, %v6067_v32  ;;  %v5260_v55 = vld [vmem:[%s7996_s2 + $0x410] sm:$0xff]   ;;  %v5161_v56 = vld [vmem:[%s7996_s2 + $0xf8] sm:$0xff]  }
 0x137   : > { %v1029_v27 = vmul.f32 %v4977_v53, %v6334_v10  ;;  %v5122_v11 = vunpack.c.h.bf16 %v5271_v6  ;;  %v1030_v54 = vmul.f32 %v4978_v1, %v6334_v10  ;;  %v1321_v9 = vmul.f32 %v5121_v8, %v6337_v12  ;;  %v8108_v6 = vld [vmem:[#allocation18_spill] sm:$0xff] }
 0x138   : > { %v809_v25 = vadd.f32 %v737_v60, %v517_v16  ;;  %v1800_v7 = vshrl.u32 %v1616_v37, 16  ;;  %v1429_v59 = vpack.c.bf16 %v1388_v40, %v1387_v33  ;;  %v810_v43 = vadd.f32 %v738_v14, %v518_v44  ;;  %v5197_v8 = vld [vmem:[%s7996_s2 + $0x218] sm:$0xff]  }
 0x139   : > { %v1322_v49 = vmul.f32 %v5122_v11, %v6337_v12  ;;  %v4645_v41 = vunpack.c.l.bf16 %v5152_v29  ;;  %v4646_v50 = vunpack.c.h.bf16 %v5152_v29  ;;  %v4789_v22 = vunpack.c.l.bf16 %v5188_v39  ;;  %v7272_v11 = vpop.permute.xlu1 %2732 }
 0x13a   : > { %v1101_v46 = vadd.f32 %v1029_v27, %v809_v25  ;;  %v1802_v42 = vrot.slane %v1800_v7, 7  ;;  %1466 = vst.msk [vmem:[#allocation3 + $0xf0] sm:$0xff] %vm1435_vm0, %v1429_v59  ;;  %v1102_v61 = vadd.f32 %v1030_v54, %v810_v43  ;;  %v4790_v52 = vunpack.c.h.bf16 %v5188_v39  ;;  %v7274_v39 = vpop.permute.xlu0 %2678 }
 0x13b   : > { %v3074_v51 = vld [vmem:[#allocation3 + $0xa8] sm:$0xff]  ;;  %v495_v47 = vmul.f32 %v4645_v41, %v6064_v31  ;;  %v4933_v58 = vunpack.c.l.bf16 %v5224_v63  ;;  %v496_v48 = vmul.f32 %v4646_v50, %v6064_v31  ;;  %v715_v16 = vmul.f32 %v4789_v22, %v6067_v32 }
 0x13c   : > { %5397 = vmatpush3.bf16.msra.mxu1 %v3074_v51  ;;  %v1393_v5 = vadd.f32 %v1321_v9, %v1101_v46  ;;  %v1810_v28 = vsel %vm1618_vm1, %v1802_v42, %v8108_v6  ;;  %v1394_v24 = vadd.f32 %v1322_v49, %v1102_v61  ;;  %v716_v38 = vmul.f32 %v4790_v52, %v6067_v32 }
 0x13d   : > { %v2875_v44 = vsel %vm1435_vm0, %v1810_v28, %v2699_v4  ;;  %v4934_v53 = vunpack.c.h.bf16 %v5224_v63  ;;  %v787_v37 = vadd.f32 %v715_v16, %v495_v47  ;;  %v1007_v33 = vmul.f32 %v4933_v58, %v6334_v10  ;;  %v5233_v4 = vld [vmem:[%s7996_s2 + $0x338] sm:$0xff]  }
 0x13e   : > { %3290 = vmatmul.mubr.bf16.gmra.mrb[12].mxu1 %v2875_v44  ;;  %v5077_v60 = vunpack.c.l.bf16 %v5260_v55  ;;  %v5078_v1 = vunpack.c.h.bf16 %v5260_v55  ;;  %v1432_v29 = vpack.c.bf16 %v1394_v24, %v1393_v5  ;;  %v788_v40 = vadd.f32 %v716_v38, %v496_v48  ;;  %v5269_v63 = vld [vmem:[%s7996_s2 + $0x458] sm:$0xff]   ;;  %v1815_v48 = vld [vmem:[#allocation2 + $0x70] sm:$0x1] }
 0x13f   : > { %v1008_v14 = vmul.f32 %v4934_v53, %v6334_v10  ;;  %v4681_v27 = vunpack.c.l.bf16 %v5161_v56  ;;  %v1079_v25 = vadd.f32 %v1007_v33, %v787_v37  ;;  %v4682_v7 = vunpack.c.h.bf16 %v5161_v56  ;;  %v4418_v28 = vld [vmem:[#allocation2 + $0x178] sm:$0x1]  ;;  %v7292_v53 = vpop.permute.xlu1 %2782  ;;  %v7294_v37 = vpop.permute.xlu0 %2712 }
 0x140   : > { %v1299_v54 = vmul.f32 %v5077_v60, %v6337_v12  ;;  %v1300_v9 = vmul.f32 %v5078_v1, %v6337_v12  ;;  %1469 = vst.msk [vmem:[#allocation3 + $0x108] sm:$0xff] %vm1435_vm0, %v1432_v29  ;;  %v4825_v49 = vunpack.c.l.bf16 %v5197_v8  ;;  %v4826_v41 = vunpack.c.h.bf16 %v5197_v8  ;;  %v5153_v38 = vld [vmem:[%s7996_s2 + $0xb8] sm:$0xff]  }
 0x141   : > { %v1080_v59 = vadd.f32 %v1008_v14, %v788_v40  ;;  %v513_v43 = vmul.f32 %v4681_v27, %v6064_v31  ;;  %v3083_v46 = vld [vmem:[#allocation3 + $0xf0] sm:$0xff]  ;;  %v514_v50 = vmul.f32 %v4682_v7, %v6064_v31  ;;  %v4969_v22 = vunpack.c.l.bf16 %v5233_v4  ;;  %v5189_v40 = vld [vmem:[%s7996_s2 + $0x1d8] sm:$0xff]  }
 0x142   : > { %v1371_v42 = vadd.f32 %v1299_v54, %v1079_v25  ;;  %v4970_v51 = vunpack.c.h.bf16 %v5233_v4  ;;  %5398 = vmatprep.subr.bf16.mxu1 %v3083_v46  ;;  %v733_v47 = vmul.f32 %v4825_v49, %v6067_v32  ;;  %v734_v52 = vmul.f32 %v4826_v41, %v6067_v32  ;;  %v5225_v7 = vld [vmem:[%s7996_s2 + $0x2f8] sm:$0xff]  }
 0x143   : > { %v1372_v61 = vadd.f32 %v1300_v9, %v1080_v59  ;;  %v5113_v58 = vunpack.c.l.bf16 %v5269_v63  ;;  %v1025_v55 = vmul.f32 %v4969_v22, %v6334_v10  ;;  %v5114_v6 = vunpack.c.h.bf16 %v5269_v63  ;;  %v5261_v49 = vld [vmem:[%s7996_s2 + $0x418] sm:$0xff]   ;;  %v4420_v22 = vld [vmem:[#allocation2 + $0x30] sm:$0x80] }
 0x144   : > { %v1026_v5 = vmul.f32 %v4970_v51, %v6334_v10  ;;  %v805_v56 = vadd.f32 %v733_v47, %v513_v43  ;;  %v806_v24 = vadd.f32 %v734_v52, %v514_v50  ;;  %v2285_v8 = vshll.u32 %v4418_v28, 16  ;;  %v7312_v51 = vpop.permute.xlu1 %2734 }
 0x145   : > { %v1421_v16 = vpack.c.bf16 %v1372_v61, %v1371_v42  ;;  %v1317_v44 = vmul.f32 %v5113_v58, %v6337_v12  ;;  %v1318_v33 = vmul.f32 %v5114_v6, %v6337_v12  ;;  %v1859_v29 = vshll.u32 %v1815_v48, 16  ;;  %v7314_v61 = vpop.permute.xlu0 %2680  ;;  %v1594_v48 = vld [vmem:[#allocation2 + $0x60] sm:$0x80] }
 0x146   : > { %v1097_v60 = vadd.f32 %v1025_v55, %v805_v56  ;;  %v1098_v1 = vadd.f32 %v1026_v5, %v806_v24  ;;  %v4649_v27 = vunpack.c.l.bf16 %v5153_v38  ;;  %v2287_v54 = vrot.slane %v2285_v8, 1 }
 0x147   : > { %1458 = vst.msk [vmem:[#allocation3 + $0xb0] sm:$0xff] %vm1435_vm0, %v1421_v16  ;;  %v3086_v14 = vld [vmem:[#allocation3 + $0x108] sm:$0xff]  ;;  %v1861_v9 = vrot.slane %v1859_v29, 1  ;;  %v4650_v63 = vunpack.c.h.bf16 %v5153_v38  ;;  %v4793_v43 = vunpack.c.l.bf16 %v5189_v40  ;;  %v4794_v50 = vunpack.c.h.bf16 %v5189_v40 }
 0x148   : > { %5520 = vmatprep.subr.bf16.mxu0 %v3086_v14  ;;  %v1389_v4 = vadd.f32 %v1317_v44, %v1097_v60  ;;  %v1390_v25 = vadd.f32 %v1318_v33, %v1098_v1  ;;  %v497_v59 = vmul.f32 %v4649_v27, %v6064_v31  ;;  %v2288_v46 = vsel %vm1827_vm2, %v7156_v20, %v2287_v54  ;;  %v8109_v27 = vld [vmem:[#allocation15_spill] sm:$0xff] }
 0x149   : > { %5521 = vmatpush3.bf16.msra.mxu0 %v3086_v14  ;;  %v1862_v42 = vsel %vm1827_vm2, %v6204_v19, %v1861_v9  ;;  %2760 = vrot.lane.b32.xlu1 %v2288_v46, %s5766_s14  ;;  %v498_v52 = vmul.f32 %v4650_v63, %v6064_v31  ;;  %v717_v58 = vmul.f32 %v4793_v43, %v6067_v32  ;;  %v4937_v55 = vunpack.c.l.bf16 %v5225_v7  ;;  %v1816_v9 = vld [vmem:[#allocation2 + $0x88] sm:$0x1]  ;;  %v7331_v63 = vpop.permute.xlu0 %2714 }
 0x14a   : > { %v1430_v41 = vpack.c.bf16 %v1390_v25, %v1389_v4  ;;  %v2895_v47 = vsel %vm1435_vm0, %v1862_v42, %v7198_v0  ;;  %v718_v20 = vmul.f32 %v4794_v50, %v6067_v32  ;;  %v4938_v5 = vunpack.c.h.bf16 %v5225_v7  ;;  %v4419_v0 = vld [vmem:[#allocation2 + $0x190] sm:$0x1]  ;;  %v7329_v7 = vpop.permute.xlu1 %2784 }
 0x14b   : > { %3201 = vmatprep.mubr.bf16.mxu0 %v2895_v47  ;;  %v5081_v6 = vunpack.c.l.bf16 %v5261_v49  ;;  %v5082_v28 = vunpack.c.h.bf16 %v5261_v49  ;;  %v789_v56 = vadd.f32 %v717_v58, %v497_v59  ;;  %v1009_v24 = vmul.f32 %v4937_v55, %v6334_v10  ;;  %v1596_v47 = vld [vmem:[#allocation2 + $0x78] sm:$0x80]  ;;  %v8112_v58 = vld [vmem:[#allocation21_spill] sm:$0xff] }
 0x14c   : > { %1467 = vst.msk [vmem:[#allocation3 + $0xf8] sm:$0xff] %vm1435_vm0, %v1430_v41  ;;  %v2333_v44 = vshrl.u32 %v4420_v22, 16  ;;  %v790_v38 = vadd.f32 %v718_v20, %v498_v52  ;;  %v1010_v33 = vmul.f32 %v4938_v5, %v6334_v10  ;;  %v1668_v40 = vshrl.u32 %v1594_v48, 16  ;;  %v4422_v41 = vld [vmem:[#allocation2 + $0x48] sm:$0x80] }
 0x14d   : > { %v1301_v60 = vmul.f32 %v5081_v6, %v6337_v12  ;;  %v1302_v1 = vmul.f32 %v5082_v28, %v6337_v12  ;;  %v1081_v8 = vadd.f32 %v1009_v24, %v789_v56  ;;  %v8110_v4 = vshll.u32 %v8109_v27, 16  ;;  %v1817_v6 = vld [vmem:[#allocation2 + $0xa0] sm:$0x1] }
 0x14e   : > { %v3075_v16 = vld [vmem:[#allocation3 + $0xb0] sm:$0xff]  ;;  %v2335_v29 = vrot.slane %v2333_v44, 7  ;;  %v1082_v14 = vadd.f32 %v1010_v33, %v790_v38  ;;  %v2292_v54 = vshll.u32 %v4419_v0, 16  ;;  %v1670_v49 = vrot.slane %v1668_v40, 7 }
 0x14f   : > { %5399 = vmatpush3.bf16.msra.mxu1 %v3075_v16  ;;  %v2289_v25 = vrot.slane %v8110_v4, 1  ;;  %v1373_v59 = vadd.f32 %v1301_v60, %v1081_v8  ;;  %v8111_v50 = vshrl.u32 %v8109_v27, 16  ;;  %v1866_v5 = vshll.u32 %v1816_v9, 16  ;;  %v1598_v16 = vld [vmem:[#allocation2 + $0x90] sm:$0x80]  ;;  %v7349_v60 = vpop.permute.xlu1 %2736 }
 0x150   : > { %v2343_v43 = vsel %vm1618_vm1, %v2335_v29, %v8103_v62  ;;  %v1374_v46 = vadd.f32 %v1302_v1, %v1082_v14  ;;  %v1678_v55 = vsel %vm1618_vm1, %v1670_v49, %v8112_v58  ;;  %v2294_v20 = vrot.slane %v2292_v54, 1  ;;  %v4424_v33 = vld [vmem:[#allocation2 + $0x60] sm:$0x80]  ;;  %v8113_v54 = vld [vmem:[#allocation22_spill] sm:$0xff] }
 0x151   : > { %v2991_v42 = vsel %vm1435_vm0, %v2343_v43, %v7246_v26  ;;  %v2290_v22 = vor.u32 %v2289_v25, %v8111_v50  ;;  %v2831_v28 = vsel %vm1435_vm0, %v1678_v55, %v7225_v23  ;;  %v2345_v48 = vshrl.u32 %v4422_v41, 16  ;;  %v5164_v26 = vld [vmem:[%s7996_s2 + $0x110] sm:$0xff]   ;;  %v7351_v23 = vpop.permute.xlu0 %2682  ;;  %v5643_v49 = vld [vmem:[#allocation2 + $0x20] sm:$0xff] }
 0x152   : > { %3330 = vmatprep.mubr.bf16.mxu1 %v2991_v42  ;;  %v1422_v62 = vpack.c.bf16 %v1374_v46, %v1373_v59  ;;  %3202 = vmatmul.mubr.bf16.gmra.mrb[16].mxu0 %v2831_v28  ;;  %v1868_v24 = vrot.slane %v1866_v5, 1  ;;  %v1680_v44 = vshrl.u32 %v1596_v47, 16  ;;  %v1873_v38 = vshll.u32 %v1817_v6, 16  ;;  %v5200_v25 = vld [vmem:[%s7996_s2 + $0x230] sm:$0xff]   ;;  %v8114_v42 = vld [vmem:[#allocation23_spill] sm:$0xff] }
 0x153   : > { %v3084_v52 = vld [vmem:[#allocation3 + $0xf8] sm:$0xff]  ;;  %v2295_v56 = vsel %vm1827_vm2, %v2290_v22, %v2294_v20  ;;  %v2347_v0 = vrot.slane %v2345_v48, 7  ;;  %v1692_v29 = vshrl.u32 %v1598_v16, 16  ;;  %v4693_v40 = vunpack.c.l.bf16 %v5164_v26  ;;  %v5236_v43 = vld [vmem:[%s7996_s2 + $0x350] sm:$0xff]   ;;  %v1818_v20 = vld [vmem:[#allocation2 + $0xb8] sm:$0x1] }
 0x154   : > { %5400 = vmatprep.subr.bf16.mxu1 %v3084_v52  ;;  %1459 = vst.msk [vmem:[#allocation3 + $0xb8] sm:$0xff] %vm1435_vm0, %v1422_v62  ;;  %2762 = vrot.lane.b32.xlu1 %v2295_v56, %s5766_s14  ;;  %v1869_v1 = vsel %vm1827_vm2, %v6221_v45, %v1868_v24  ;;  %v1682_v8 = vrot.slane %v1680_v44, 7  ;;  %v1875_v27 = vrot.slane %v1873_v38, 1  ;;  %v4694_v4 = vunpack.c.h.bf16 %v5164_v26  ;;  %v5272_v22 = vld [vmem:[%s7996_s2 + $0x470] sm:$0xff]   ;;  %v7380_v62 = vpop.permute.xlu1 %2786  ;;  %v1600_v24 = vld [vmem:[#allocation2 + $0xa8] sm:$0x80] }
 0x155   : > { %v2899_v14 = vsel %vm1435_vm0, %v1869_v1, %v7248_v2  ;;  %v2357_v59 = vshrl.u32 %v4424_v33, 16  ;;  %v2942_v41 = vsel %vm1435_vm0, %v5643_v49, %v7272_v11  ;;  %v2355_v2 = vsel %vm1618_vm1, %v2347_v0, %v8107_v18  ;;  %v7382_v28 = vpop.permute.xlu0 %2716  ;;  %v1819_v1 = vld [vmem:[#allocation2 + $0xd0] sm:$0x1]  ;;  %s282_s14 = sand.u32 1, %s5746_s22  }
 0x156   : > { %3209 = vmatprep.mubr.bf16.mxu0 %v2899_v14  ;;  %v1690_v9 = vsel %vm1618_vm1, %v1682_v8, %v8113_v54  ;;  %v1876_v50 = vsel %vm1827_vm2, %v8114_v42, %v1875_v27  ;;  %v1694_v52 = vrot.slane %v1692_v29, 7  ;;  %v519_v55 = vmul.f32 %v4693_v40, %v6064_v31  ;;  %v8115_v29 = vld [vmem:[#allocation24_spill] sm:$0xff]  ;;  %s7647_s27 = scalar_lea.vmem [#allocation7], %s282_s14  ;;  %s4006_s18 = scalar_lea.sflag [#allocation5], %s282_s14 }
 0x157   : > { %v2835_v46 = vsel %vm1435_vm0, %v1690_v9, %v7274_v39  ;;  %v2903_v47 = vsel %vm1435_vm0, %v1876_v50, %v7294_v37  ;;  %v4837_v11 = vunpack.c.l.bf16 %v5200_v25  ;;  %v520_v18 = vmul.f32 %v4694_v4, %v6064_v31  ;;  %s4022_s8 = sshll.u32 %s7647_s27, 4  ;;  %s7945_s8 = int_to_ptr.vmem [resolvable:$true] %s4022_s8 }
 0x158   : > { %v4838_v5 = vunpack.c.h.bf16 %v5200_v25  ;;  %v4981_v6 = vunpack.c.l.bf16 %v5236_v43  ;;  %v4982_v39 = vunpack.c.h.bf16 %v5236_v43  ;;  %v2359_v16 = vrot.slane %v2357_v59, 7  ;;  %v4426_v59 = vld [vmem:[#allocation2 + $0x78] sm:$0x80]  ;;  %s5680_s28 = scalar_lea.vmem %s7945_s8, 16  ;;  %p5687_p0 = scmp.lt.s32.totalorder %s7945_s8, %s5685_s12 }
 0x159   : > { %v739_v26 = vmul.f32 %v4837_v11, %v6067_v32  ;;  %v5125_v37 = vunpack.c.l.bf16 %v5272_v22  ;;  %v5126_v56 = vunpack.c.h.bf16 %v5272_v22  ;;  %v1880_v33 = vshll.u32 %v1818_v20, 16  ;;  %v7398_v22 = vpop.permute.xlu1 %2738  ;;  %v1602_v20 = vld [vmem:[#allocation2 + $0xc0] sm:$0x80]  ;;  %p5681_p10 = scmp.ne.s32.totalorder %s7945_s8, %s5680_s28  ;;  %p5688_p1 = scmp.lt.s32.totalorder %s5686_s11, %s5680_s28 }
 0x15a   : > { %3210 = vmatmul.mubr.bf16.gmra.mrb[20].mxu0 %v2835_v46  ;;  %v740_v44 = vmul.f32 %v4838_v5, %v6067_v32  ;;  %v1031_v0 = vmul.f32 %v4981_v6, %v6334_v10  ;;  %v1032_v38 = vmul.f32 %v4982_v39, %v6334_v10  ;;  %v2995_v8 = vsel %vm1435_vm0, %v2355_v2, %v7292_v53  ;;  %v1820_v6 = vld [vmem:[#allocation2 + $0xe8] sm:$0x1]  ;;  %v5165_v39 = vld [vmem:[%s7996_s2 + $0x118] sm:$0xff]  }
 0x15b   : > { %v3076_v48 = vld [vmem:[#allocation3 + $0xb8] sm:$0xff]  ;;  %3217 = vmatprep.mubr.bf16.mxu0 %v2903_v47  ;;  %v1702_v40 = vsel %vm1618_vm1, %v1694_v52, %v8115_v29  ;;  %v811_v14 = vadd.f32 %v739_v26, %v519_v55  ;;  %v1323_v27 = vmul.f32 %v5125_v37, %v6337_v12  ;;  %v1324_v25 = vmul.f32 %v5126_v56, %v6337_v12  ;;  %v7400_v52 = vpop.permute.xlu0 %2684  ;;  %p5682_p11 = pnand %p5681_p10, %p5844_p4  ;;  %p5689_p2 = por %p5688_p1, %p5687_p0 }
 0x15c   : > { %5401 = vmatpush3.bf16.msra.mxu1 %v3076_v48  ;;  %v812_v4 = vadd.f32 %v740_v44, %v520_v18  ;;  %v1882_v9 = vrot.slane %v1880_v33, 1  ;;  %v1704_v43 = vshrl.u32 %v1600_v24, 16  ;;  %v1887_v46 = vshll.u32 %v1819_v1, 16  ;;  %v5644_v48 = vld [vmem:[#allocation2 + $0x38] sm:$0xff] }
 0x15d   : > { %v1103_v49 = vadd.f32 %v1031_v0, %v811_v14  ;;  %v2839_v50 = vsel %vm1435_vm0, %v1702_v40, %v7314_v61  ;;  %v2367_v18 = vsel %vm1618_vm1, %v2359_v16, %v8112_v58  ;;  %v2945_v26 = vsel %vm1435_vm0, %v5644_v48, %v7312_v51  ;;  %v5201_v58 = vld [vmem:[%s7996_s2 + $0x238] sm:$0xff]   ;;  %v7422_v51 = vpop.permute.xlu1 %2788  ;;  %v4428_v14 = vld [vmem:[#allocation2 + $0x90] sm:$0x80]  ;;  %p5683_p13 = pneg %p5682_p11 }
 0x15e   : > { %v1104_v53 = vadd.f32 %v1032_v38, %v812_v4  ;;  %v1883_v2 = vsel %vm1827_vm2, %v6291_v30, %v1882_v9  ;;  %v1706_v47 = vrot.slane %v1704_v43, 7  ;;  %v1889_v61 = vrot.slane %v1887_v46, 1  ;;  %v5237_v0 = vld [vmem:[%s7996_s2 + $0x358] sm:$0xff]   ;;  %v5645_v46 = vld [vmem:[#allocation2 + $0x50] sm:$0xff] }
 0x15f   : > { %3331 = vmatmul.mubr.bf16.vlgmr.msra.gmra.mrb[16].mxu1 %v2942_v41  ;;  %v1395_v55 = vadd.f32 %v1323_v27, %v1103_v49  ;;  %v2907_v11 = vsel %vm1435_vm0, %v1883_v2, %v7331_v63  ;;  %v2369_v41 = vshrl.u32 %v4426_v59, 16  ;;  %v8116_v63 = vld [vmem:[#allocation25_spill] sm:$0xff]  ;;  %v1716_v24 = vshrl.u32 %v1602_v20, 16  ;;  %v2719_v33 = vpop.permute.xlu0 %2718  ;;  %v5273_v49 = vld [vmem:[%s7996_s2 + $0x478] sm:$0xff]   ;;  %p5690_p3 = pnand %p5689_p2, %p5683_p13 }
 0x160   : > { %3338 = vmatprep.mubr.bf16.mxu1 %v2995_v8  ;;  %v1396_v5 = vadd.f32 %v1324_v25, %v1104_v53  ;;  %v1714_v56 = vsel %vm1618_vm1, %v1706_v47, %v8116_v63  ;;  %v2999_v16 = vsel %vm1435_vm0, %v2367_v18, %v7329_v7  ;;  %v1890_v38 = vsel %vm1827_vm2, %v6301_v36, %v1889_v61  ;;  %v1821_v61 = vld [vmem:[#allocation2 + $0x100] sm:$0x1] }
 0x161   : > { %v2371_v44 = vrot.slane %v2369_v41, 7  ;;  %v1894_v1 = vshll.u32 %v1820_v6, 16  ;;  %v4697_v8 = vunpack.c.l.bf16 %v5165_v39  ;;  %v4698_v40 = vunpack.c.h.bf16 %v5165_v39  ;;  %v8117_v6 = vld [vmem:[#allocation26_spill] sm:$0xff] }
 0x162   : > { %3218 = vmatmul.mubr.bf16.gmra.mrb[24].mxu0 %v2839_v50  ;;  %v1433_v37 = vpack.c.bf16 %v1396_v5, %v1395_v55  ;;  %v2843_v7 = vsel %vm1435_vm0, %v1714_v56, %v7351_v23  ;;  %v4841_v27 = vunpack.c.l.bf16 %v5201_v58  ;;  %v4842_v4 = vunpack.c.h.bf16 %v5201_v58 }
 0x163   : > { %3225 = vmatprep.mubr.bf16.mxu0 %v2907_v11  ;;  %v1718_v25 = vrot.slane %v1716_v24, 7  ;;  %v521_v9 = vmul.f32 %v4697_v8, %v6064_v31  ;;  %v522_v59 = vmul.f32 %v4698_v40, %v6064_v31  ;;  %v4985_v43 = vunpack.c.l.bf16 %v5237_v0  ;;  %v1604_v31 = vld [vmem:[#allocation2 + $0xd8] sm:$0x80]  ;;  %v2687_v48 = vpop.permute.xlu0 %2686 }
 0x164   : > { %1470 = vst.msk [vmem:[#allocation3 + $0x110] sm:$0xff] %vm1435_vm0, %v1433_v37  ;;  %v2948_v50 = vsel %vm1435_vm0, %v5645_v46, %v7349_v60  ;;  %v2379_v23 = vsel %vm1618_vm1, %v2371_v44, %v8113_v54  ;;  %v2911_v53 = vsel %vm1435_vm0, %v1890_v38, %v7382_v28  ;;  %v741_v2 = vmul.f32 %v4841_v27, %v6067_v32  ;;  %v2741_v28 = vpop.permute.xlu1 %2740  ;;  %v5646_v46 = vld [vmem:[#allocation2 + $0x68] sm:$0xff] }
 0x165   : > { %v2381_v47 = vshrl.u32 %v4428_v14, 16  ;;  %v1896_v55 = vrot.slane %v1894_v1, 1  ;;  %v742_v11 = vmul.f32 %v4842_v4, %v6067_v32  ;;  %v4986_v41 = vunpack.c.h.bf16 %v5237_v0  ;;  %v4430_v1 = vld [vmem:[#allocation2 + $0xa8] sm:$0x80] }
 0x166   : > { %v813_v20 = vadd.f32 %v741_v2, %v521_v9  ;;  %v1033_v18 = vmul.f32 %v4985_v43, %v6334_v10  ;;  %v5129_v5 = vunpack.c.l.bf16 %v5273_v49  ;;  %v5130_v60 = vunpack.c.h.bf16 %v5273_v49  ;;  %v1606_v43 = vld [vmem:[#allocation2 + $0xf0] sm:$0x80]  ;;  %v1822_v49 = vld [vmem:[#allocation2 + $0x118] sm:$0x1] }
 0x167   : > { %3339 = vmatmul.mubr.bf16.gmra.mrb[20].mxu1 %v2945_v26  ;;  %v3003_v54 = vsel %vm1435_vm0, %v2379_v23, %v7380_v62  ;;  %v1726_v39 = vsel %vm1618_vm1, %v1718_v25, %v8117_v6  ;;  %v814_v26 = vadd.f32 %v742_v11, %v522_v59  ;;  %v1034_v32 = vmul.f32 %v4986_v41, %v6334_v10  ;;  %v2721_v9 = vpop.permute.xlu0 %2720 }
 0x168   : > { %3346 = vmatprep.mubr.bf16.mxu1 %v2999_v16  ;;  %v1728_v56 = vshrl.u32 %v1604_v31, 16  ;;  %v1105_v24 = vadd.f32 %v1033_v18, %v813_v20  ;;  %v1325_v58 = vmul.f32 %v5129_v5, %v6337_v12  ;;  %v1326_v16 = vmul.f32 %v5130_v60, %v6337_v12  ;;  %v2791_v27 = vpop.permute.xlu1 %2790  ;;  %v1608_v5 = vld [vmem:[#allocation2 + $0x108] sm:$0x80] }
 0x169   : > { %v2383_v44 = vrot.slane %v2381_v47, 7  ;;  %v1897_v62 = vsel %vm1827_vm2, %v6322_v13, %v1896_v55  ;;  %v1106_v0 = vadd.f32 %v1034_v32, %v814_v26  ;;  %v1901_v38 = vshll.u32 %v1821_v61, 16  ;;  %v4432_v47 = vld [vmem:[#allocation2 + $0xc0] sm:$0x80] }
 0x16a   : > { %3226 = vmatmul.mubr.bf16.gmra.mrb[28].mxu0 %v2843_v7  ;;  %v1397_v8 = vadd.f32 %v1325_v58, %v1105_v24  ;;  %v2847_v10 = vsel %vm1435_vm0, %v1726_v39, %v7400_v52  ;;  %v2915_v7 = vsel %vm1435_vm0, %v1897_v62, %v2719_v33  ;;  %v1730_v14 = vrot.slane %v1728_v56, 7  ;;  %v5647_v61 = vld [vmem:[#allocation2 + $0x80] sm:$0xff]  ;;  %v4434_v58 = vld [vmem:[#allocation2 + $0xd8] sm:$0x80] }
 0x16b   : > { %3233 = vmatprep.mubr.bf16.mxu0 %v2911_v53  ;;  %v3087_v37 = vld [vmem:[#allocation3 + $0x110] sm:$0xff]  ;;  %v1398_v40 = vadd.f32 %v1326_v16, %v1106_v0  ;;  %v2391_v12 = vsel %vm1618_vm1, %v2383_v44, %v8115_v29  ;;  %v2393_v4 = vshrl.u32 %v4430_v1, 16  ;;  %v1903_v59 = vrot.slane %v1901_v38, 1  ;;  %v2689_v31 = vpop.permute.xlu0 %2688  ;;  %v5648_v1 = vld [vmem:[#allocation2 + $0x98] sm:$0xff] }
 0x16c   : > { %5522 = vmatprep.subr.bf16.mxu0 %v3087_v37  ;;  %v3007_v52 = vsel %vm1435_vm0, %v2391_v12, %v7422_v51  ;;  %v1738_v29 = vsel %vm1618_vm1, %v1730_v14, %v6356_v21  ;;  %v1740_v33 = vshrl.u32 %v1606_v43, 16  ;;  %v1908_v2 = vshll.u32 %v1822_v49, 16  ;;  %v2743_v55 = vpop.permute.xlu1 %2742  ;;  %v4452_v24 = vld [vmem:[#allocation2 + $0x40] sm:$0x1] }
 0x16d   : > { %5523 = vmatpush3.bf16.msra.mxu0 %v3087_v37  ;;  %v1434_v25 = vpack.c.bf16 %v1398_v40, %v1397_v8  ;;  %v2395_v23 = vrot.slane %v2393_v4, 7  ;;  %v1904_v53 = vsel %vm1827_vm2, %v6755_v34, %v1903_v59  ;;  %v2405_v20 = vshrl.u32 %v4432_v47, 16  ;;  %v4455_v47 = vld [vmem:[#allocation2 + $0x88] sm:$0x1] }
 0x16e   : > { %v2919_v11 = vsel %vm1435_vm0, %v1904_v53, %v2721_v9  ;;  %v1742_v41 = vrot.slane %v1740_v33, 7  ;;  %v1910_v18 = vrot.slane %v1908_v2, 1  ;;  %v1752_v26 = vshrl.u32 %v1608_v5, 16  ;;  %v4436_v9 = vld [vmem:[#allocation2 + $0xf0] sm:$0x80] }
 0x16f   : > { %3347 = vmatmul.mubr.bf16.gmra.mrb[24].mxu1 %v2948_v50  ;;  %v2951_v50 = vsel %vm1435_vm0, %v5646_v46, %v7398_v22  ;;  %1471 = vst.msk [vmem:[#allocation3 + $0x118] sm:$0xff] %vm1435_vm0, %v1434_v25  ;;  %v2851_v22 = vsel %vm1435_vm0, %v1738_v29, %v2687_v48  ;;  %v2403_v51 = vsel %vm1618_vm1, %v2395_v23, %v8116_v63  ;;  %v2407_v37 = vrot.slane %v2405_v20, 7  ;;  %v2723_v63 = vpop.permute.xlu0 %2722  ;;  %v4454_v25 = vld [vmem:[#allocation2 + $0x70] sm:$0x1] }
 0x170   : > { %3354 = vmatprep.mubr.bf16.mxu1 %v3003_v54  ;;  %v2954_v54 = vsel %vm1435_vm0, %v5647_v61, %v2741_v28  ;;  %v3011_v39 = vsel %vm1435_vm0, %v2403_v51, %v2791_v27  ;;  %v1750_v48 = vsel %vm1618_vm1, %v1742_v41, %v6370_v3  ;;  %v2793_v32 = vpop.permute.xlu1 %2792  ;;  %v1911_v56 = vsel %vm1827_vm2, %v6830_v57, %v1910_v18  ;;  %v4453_v27 = vld [vmem:[#allocation2 + $0x58] sm:$0x1]  ;;  %v5649_v29 = vld [vmem:[#allocation2 + $0xb0] sm:$0xff] }
 0x171   : > { %v2855_v28 = vsel %vm1435_vm0, %v1750_v48, %v2689_v31  ;;  %v2923_v16 = vsel %vm1435_vm0, %v1911_v56, %v2723_v63  ;;  %v1754_v44 = vrot.slane %v1752_v26, 7  ;;  %v2543_v62 = vshll.u32 %v4452_v24, 16  ;;  %v4457_v48 = vld [vmem:[#allocation2 + $0xb8] sm:$0x1]  ;;  %v7501_v26 = vld [vmem:[#allocation2 + $0x128] sm:$0xff] }
 0x172   : > { %3234 = vmatmul.mubr.bf16.gmra.mrb[32].mxu0 %v2847_v10  ;;  %v2415_v0 = vsel %vm1618_vm1, %v2407_v37, %v8117_v6  ;;  %v2417_v38 = vshrl.u32 %v4434_v58, 16  ;;  %v2957_v8 = vsel %vm1435_vm0, %v5648_v1, %v2743_v55  ;;  %v2550_v59 = vshll.u32 %v4453_v27, 16  ;;  %v4458_v37 = vld [vmem:[#allocation2 + $0xd0] sm:$0x1]  ;;  %v5652_v1 = vld [vmem:[#allocation2 + $0xe0] sm:$0xff] }
 0x173   : > { %3241 = vmatprep.mubr.bf16.mxu0 %v2915_v7  ;;  %v3015_v40 = vsel %vm1435_vm0, %v2415_v0, %v2793_v32  ;;  %v2691_v7 = vpop.permute.xlu0 %2690  ;;  %v1762_v14 = vsel %vm1618_vm1, %v1754_v44, %v6439_v15  ;;  %v2545_v12 = vrot.slane %v2543_v62, 1  ;;  %v2557_v49 = vshll.u32 %v4454_v25, 16 }
 0x174   : > { %v2745_v10 = vpop.permute.xlu1 %2744  ;;  %v2419_v4 = vrot.slane %v2417_v38, 7  ;;  %v2859_v6 = vsel %vm1435_vm0, %v1762_v14, %v2691_v7  ;;  %v2552_v23 = vrot.slane %v2550_v59, 1  ;;  %v2564_v31 = vshll.u32 %v4455_v47, 16  ;;  %v7517_v14 = vld [vmem:[#allocation2 + $0x140] sm:$0xff] }
 0x175   : > { %v2546_v43 = vsel %vm1827_vm2, %v8102_v35, %v2545_v12  ;;  %v2960_v33 = vsel %vm1435_vm0, %v5649_v29, %v2745_v10  ;;  %v2559_v2 = vrot.slane %v2557_v49, 1  ;;  %v4438_v35 = vld [vmem:[#allocation2 + $0x108] sm:$0x80]  ;;  %v2578_v56 = vshll.u32 %v4457_v48, 16  ;;  %v5656_v48 = vld [vmem:[#allocation2 + $0x110] sm:$0xff] }
 0x176   : > { %v3088_v60 = vld [vmem:[#allocation3 + $0x118] sm:$0xff]  ;;  %v2441_v5 = vshrl.u32 %v4438_v35, 16  ;;  %v2460_v44 = vshll.u32 %v7501_v26, 16  ;;  %v2469_v12 = vshrl.u32 %v7517_v14, 16 }
 0x177   : > { %3355 = vmatmul.mubr.bf16.gmra.mrb[28].mxu1 %v2951_v50  ;;  %5524 = vmatprep.subr.bf16.mxu0 %v3088_v60  ;;  %v2427_v50 = vsel %vm1618_vm1, %v2419_v4, %v6356_v21  ;;  %v2553_v21 = vsel %vm1827_vm2, %v8106_v17, %v2552_v23  ;;  %v2560_v41 = vsel %vm1827_vm2, %v6204_v19, %v2559_v2  ;;  %v2797_v20 = vpop.permute.xlu0 %2796  ;;  %v2457_v19 = vshrl.u32 %v7501_v26, 16  ;;  %v4442_v4 = vld [vmem:[#allocation2 + $0x138] sm:$0x80]  ;;  %v4461_v2 = vld [vmem:[#allocation2 + $0x118] sm:$0x1] }
 0x178   : > { %3362 = vmatprep.mubr.bf16.mxu1 %v3007_v52  ;;  %5525 = vmatpush3.bf16.msra.mxu0 %v3088_v60  ;;  %v2795_v46 = vpop.permute.xlu1 %2794  ;;  %v2429_v52 = vshrl.u32 %v4436_v9, 16  ;;  %v5650_v60 = vld [vmem:[#allocation2 + $0xc8] sm:$0xff]  ;;  %v2443_v32 = vrot.slane %v2441_v5, 7  ;;  %v2471_v49 = vrot.slane %v2469_v12, 7  ;;  %v2465_v29 = vshrl.u32 %v4442_v4, 16 }
 0x179   : > { %v3019_v53 = vsel %vm1435_vm0, %v2427_v50, %v2795_v46  ;;  %v2472_v46 = vshll.u32 %v7517_v14, 16 }
 0x17a   : > { %3242 = vmatmul.mubr.bf16.gmra.mrb[36].mxu0 %v2851_v22  ;;  %v2431_v55 = vrot.slane %v2429_v52, 7  ;;  %v4456_v22 = vld [vmem:[#allocation2 + $0xa0] sm:$0x1]  ;;  %v2451_v0 = vsel %vm1618_vm1, %v2443_v32, %v6439_v15  ;;  %v2467_v35 = vrot.slane %v2465_v29, 7  ;;  %v5658_v29 = vld [vmem:[#allocation2 + $0x128] sm:$0xff] }
 0x17b   : > { %3249 = vmatprep.mubr.bf16.mxu0 %v2919_v11  ;;  %v2571_v51 = vshll.u32 %v4456_v22, 16  ;;  %v2799_v62 = vpop.permute.xlu0 %2798  ;;  %v4460_v15 = vld [vmem:[#allocation2 + $0x100] sm:$0x1]  ;;  %v2474_v47 = vor.u32 %v2472_v46, %v2471_v49 }
 0x17c   : > { %v2747_v11 = vpop.permute.xlu1 %2746  ;;  %v2439_v18 = vsel %vm1618_vm1, %v2431_v55, %v6370_v3  ;;  %v4440_v3 = vld [vmem:[#allocation2 + $0x120] sm:$0x80]  ;;  %v7532_v55 = vld [vmem:[#allocation2 + $0x158] sm:$0xff] }
 0x17d   : > { %v2963_v61 = vsel %vm1435_vm0, %v5650_v60, %v2747_v11  ;;  %v3023_v17 = vsel %vm1435_vm0, %v2439_v18, %v2797_v20  ;;  %v2453_v38 = vshrl.u32 %v4440_v3, 16  ;;  %v2481_v22 = vshrl.u32 %v7532_v55, 16 }
 0x17f   : > { %3363 = vmatmul.mubr.bf16.gmra.mrb[32].mxu1 %v2954_v54  ;;  %v2566_v54 = vrot.slane %v2564_v31, 1  ;;  %v2455_v27 = vrot.slane %v2453_v38, 7  ;;  %v2801_v50 = vpop.permute.xlu0 %2800  ;;  %v4444_v31 = vld [vmem:[#allocation2 + $0x150] sm:$0x80]  ;;  %v2483_v60 = vrot.slane %v2481_v22, 7 }
 0x180   : > { %3370 = vmatprep.mubr.bf16.mxu1 %v3011_v39  ;;  %v2573_v39 = vrot.slane %v2571_v51, 1  ;;  %v2749_v24 = vpop.permute.xlu1 %2748  ;;  %v2610_v51 = vrot.slane %v2460_v44, 1 }
 0x181   : > { %v2567_v63 = vsel %vm1827_vm2, %v6221_v45, %v2566_v54  ;;  %v2966_v45 = vsel %vm1435_vm0, %v5652_v1, %v2749_v24  ;;  %v4446_v1 = vld [vmem:[#allocation2 + $0x168] sm:$0x80] }
 0x182   : > { %3250 = vmatmul.mubr.bf16.gmra.mrb[40].mxu0 %v2855_v28  ;;  %v2574_v58 = vsel %vm1827_vm2, %v8114_v42, %v2573_v39  ;;  %v2585_v28 = vshll.u32 %v4458_v37, 16  ;;  %v3027_v42 = vsel %vm1435_vm0, %v2451_v0, %v2799_v62  ;;  %v2477_v39 = vshrl.u32 %v4444_v31, 16  ;;  %v4464_v62 = vld [vmem:[#allocation2 + $0x160] sm:$0x1] }
 0x183   : > { %3257 = vmatprep.mubr.bf16.mxu0 %v2923_v16  ;;  %v2459_v16 = vrot.slane %v2457_v19, 7  ;;  %v2803_v54 = vpop.permute.xlu0 %2802  ;;  %v2627_v4 = vshll.u32 %v4464_v62, 16  ;;  %v4450_v62 = vld [vmem:[#allocation2 + $0x198] sm:$0x80] }
 0x184   : > { %v2587_v10 = vrot.slane %v2585_v28, 1  ;;  %v5657_v28 = vld [vmem:[#allocation2 + $0x170] sm:$0xff] }
 0x185   : > { %v2462_v7 = vor.u32 %v2460_v44, %v2459_v16  ;;  %v2493_v16 = vshrl.u32 %v5657_v28, 16  ;;  %v2479_v44 = vrot.slane %v2477_v39, 7 }
 0x186   : > { %v2588_v59 = vsel %vm1827_vm2, %v6301_v36, %v2587_v10 }
 0x187   : > { %3371 = vmatmul.mubr.bf16.gmra.mrb[36].mxu1 %v2957_v8  ;;  %v2580_v8 = vrot.slane %v2578_v56, 1  ;;  %v2463_v52 = vsel %vm1618_vm1, %v2455_v27, %v2462_v7  ;;  %v4463_v56 = vld [vmem:[#allocation2 + $0x148] sm:$0x1] }
 0x188   : > { %3378 = vmatprep.mubr.bf16.mxu1 %v3015_v40  ;;  %v4459_v40 = vld [vmem:[#allocation2 + $0xe8] sm:$0x1]  ;;  %v3031_v36 = vsel %vm1435_vm0, %v2463_v52, %v2801_v50 }
 0x189   : > { %v2581_v25 = vsel %vm1827_vm2, %v6291_v30, %v2580_v8  ;;  %v2592_v9 = vshll.u32 %v4459_v40, 16 }
 0x18a   : > { %3258 = vmatmul.mubr.bf16.gmra.mrb[44].mxu0 %v2859_v6  ;;  %v2751_v6 = vpop.permute.xlu1 %2750 }
 0x18b   : > { %5526 = vmatprep.mubr.msk.bf16.mxu0 %vm1435_vm0, %v2546_v43  ;;  %v2599_v43 = vshll.u32 %v4460_v15, 16  ;;  %v2594_v23 = vrot.slane %v2592_v9, 1 }
 0x18d   : > { %v2595_v11 = vsel %vm1827_vm2, %v6322_v13, %v2594_v23 }
 0x18e   : > { %v2753_v20 = vpop.permute.xlu1 %2752 }
 0x18f   : > { %3379 = vmatmul.mubr.bf16.gmra.mrb[40].mxu1 %v2960_v33  ;;  %v5654_v33 = vld [vmem:[#allocation2 + $0xf8] sm:$0xff]  ;;  %v2972_v13 = vsel %vm1435_vm0, %v5656_v48, %v2753_v20  ;;  %v5660_v48 = vld [vmem:[#allocation2 + $0x1a0] sm:$0xff] }
 0x190   : > { %3386 = vmatprep.mubr.bf16.mxu1 %v3019_v53  ;;  %v2969_v30 = vsel %vm1435_vm0, %v5654_v33, %v2751_v6  ;;  %v2601_v53 = vrot.slane %v2599_v43, 1  ;;  %v2495_v6 = vrot.slane %v2493_v16, 7  ;;  %v2805_v43 = vpop.permute.xlu0 %2804 }
 0x192   : > { %5527 = vmatmul.mubr.msk.bf16.vlgmr.msra.gmra.mrb[48].mxu0 %vm1435_vm0, %v2553_v21  ;;  %v4462_v21 = vld [vmem:[#allocation2 + $0x130] sm:$0x1]  ;;  %v2602_v18 = vsel %vm1827_vm2, %v6755_v34, %v2601_v53  ;;  %v2611_v34 = vor.u32 %v2610_v51, %v2457_v19  ;;  %v2620_v19 = vshll.u32 %v4463_v56, 16  ;;  %v2755_v27 = vpop.permute.xlu1 %2754  ;;  %v2629_v53 = vrot.slane %v2627_v4, 1 }
 0x193   : > { %5530 = vmatprep.mubr.msk.bf16.mxu0 %vm1435_vm0, %v2560_v41  ;;  %v2606_v41 = vshll.u32 %v4461_v2, 16  ;;  %v2613_v5 = vshll.u32 %v4462_v21, 16  ;;  %v2975_v33 = vsel %vm1435_vm0, %v5658_v29, %v2755_v27  ;;  %v4465_v2 = vld [vmem:[#allocation2 + $0x178] sm:$0x1] }
 0x194   : > { %v2634_v20 = vshll.u32 %v4465_v2, 16  ;;  %v5662_v27 = vld [vmem:[#allocation2 + $0x158] sm:$0xff] }
 0x195   : > { %v2608_v32 = vrot.slane %v2606_v41, 1 }
 0x197   : > { %3387 = vmatmul.mubr.bf16.gmra.mrb[44].mxu1 %v2963_v61  ;;  %v2484_v61 = vshll.u32 %v7532_v55, 16  ;;  %v2609_v26 = vsel %vm1827_vm2, %v6830_v57, %v2608_v32  ;;  %v2757_v55 = vpop.permute.xlu1 %2756  ;;  %v5661_v32 = vld [vmem:[#allocation2 + $0x140] sm:$0xff] }
 0x198   : > { %3394 = vmatprep.mubr.bf16.mxu1 %v3023_v17  ;;  %v2475_v17 = vsel %vm1618_vm1, %v2467_v35, %v2474_v47  ;;  %v5659_v35 = vld [vmem:[#allocation2 + $0x188] sm:$0xff] }
 0x199   : > { %v3035_v3 = vsel %vm1435_vm0, %v2475_v17, %v2803_v54  ;;  %v2624_v7 = vrot.slane %v2484_v61, 1  ;;  %v2505_v21 = vshrl.u32 %v5659_v35, 16  ;;  %v2508_v14 = vshll.u32 %v5659_v35, 16 }
 0x19a   : > { %5531 = vmatmul.mubr.msk.bf16.gmra.mrb[52].mxu0 %vm1435_vm0, %v2567_v63  ;;  %v2615_v63 = vrot.slane %v2613_v5, 1 }
 0x19b   : > { %5534 = vmatprep.mubr.msk.bf16.mxu0 %vm1435_vm0, %v2574_v58  ;;  %v2486_v58 = vor.u32 %v2484_v61, %v2483_v60  ;;  %v2625_v23 = vor.u32 %v2624_v7, %v2481_v22  ;;  %v2507_v60 = vrot.slane %v2505_v21, 7  ;;  %v2807_v61 = vpop.permute.xlu0 %2806 }
 0x19c   : > { %v2616_v15 = vsel %vm1827_vm2, %v2611_v34, %v2615_v63  ;;  %v2636_v34 = vrot.slane %v2634_v20, 1 }
 0x19d   : > { %v2487_v49 = vsel %vm1618_vm1, %v2479_v44, %v2486_v58  ;;  %v2630_v22 = vsel %vm1827_vm2, %v2625_v23, %v2629_v53  ;;  %v2510_v58 = vor.u32 %v2508_v14, %v2507_v60  ;;  %v5663_v53 = vld [vmem:[#allocation2 + $0x170] sm:$0xff] }
 0x19f   : > { %3395 = vmatmul.mubr.bf16.gmra.mrb[48].mxu1 %v2966_v45 }
 0x1a0   : > { %3402 = vmatprep.mubr.bf16.mxu1 %v3027_v42  ;;  %v2617_v42 = vrot.slane %v2472_v46, 1  ;;  %v2489_v46 = vshrl.u32 %v4446_v1, 16 }
 0x1a2   : > { %5535 = vmatmul.mubr.msk.bf16.gmra.mrb[56].mxu0 %vm1435_vm0, %v2581_v25  ;;  %v2618_v52 = vor.u32 %v2617_v42, %v2469_v12  ;;  %v2491_v31 = vrot.slane %v2489_v46, 7  ;;  %v4448_v12 = vld [vmem:[#allocation2 + $0x180] sm:$0x80] }
 0x1a3   : > { %5538 = vmatprep.mubr.msk.bf16.mxu0 %vm1435_vm0, %v2588_v59  ;;  %v2496_v59 = vshll.u32 %v5657_v28, 16  ;;  %v2501_v17 = vshrl.u32 %v4448_v12, 16  ;;  %v2517_v28 = vshrl.u32 %v5660_v48, 16 }
 0x1a5   : > { %v2498_v47 = vor.u32 %v2496_v59, %v2495_v6  ;;  %v2631_v41 = vrot.slane %v2496_v59, 1  ;;  %v2503_v44 = vrot.slane %v2501_v17, 7  ;;  %v2519_v42 = vrot.slane %v2517_v28, 7 }
 0x1a7   : > { %3403 = vmatmul.mubr.bf16.gmra.mrb[52].mxu1 %v2969_v30  ;;  %v2622_v30 = vrot.slane %v2620_v19, 1  ;;  %v2499_v54 = vsel %vm1618_vm1, %v2491_v31, %v2498_v47  ;;  %v2632_v39 = vor.u32 %v2631_v41, %v2493_v16  ;;  %v2511_v19 = vsel %vm1618_vm1, %v2503_v44, %v2510_v58 }
 0x1a8   : > { %3410 = vmatprep.mubr.bf16.mxu1 %v3031_v36  ;;  %v3039_v36 = vsel %vm1435_vm0, %v2487_v49, %v2805_v43  ;;  %v3043_v63 = vsel %vm1435_vm0, %v2499_v54, %v2807_v61 }
 0x1a9   : > { %v2623_v51 = vsel %vm1827_vm2, %v2618_v52, %v2622_v30  ;;  %v2637_v16 = vsel %vm1827_vm2, %v2632_v39, %v2636_v34 }
 0x1aa   : > { %5539 = vmatmul.mubr.msk.bf16.gmra.mrb[60].mxu0 %vm1435_vm0, %v2595_v11  ;;  %v4466_v11 = vld [vmem:[#allocation2 + $0x190] sm:$0x1] }
 0x1ab   : > { %5542 = vmatprep.mubr.msk.bf16.mxu0 %vm1435_vm0, %v2602_v18  ;;  %v2638_v18 = vrot.slane %v2508_v14, 1  ;;  %v2641_v5 = vshll.u32 %v4466_v11, 16 }
 0x1ad   : > { %v2643_v56 = vrot.slane %v2641_v5, 1 }
 0x1af   : > { %3411 = vmatmul.mubr.bf16.gmra.mrb[56].mxu1 %v2972_v13  ;;  %v2520_v13 = vshll.u32 %v5660_v48, 16 }
 0x1b0   : > { %3418 = vmatprep.mubr.bf16.mxu1 %v3035_v3  ;;  %v2639_v3 = vor.u32 %v2638_v18, %v2505_v21 }
 0x1b1   : > { %v5290_v37 = vpop.f32.mrb[0].mxu0  ;;  %v2522_v59 = vor.u32 %v2520_v13, %v2519_v42 }
 0x1b2   : > { %v5291_v24 = vpop.f32.mrb[1].mxu0  ;;  %5543 = vmatmul.mubr.msk.bf16.gmra.mrb[64].mxu0 %vm1435_vm0, %v2609_v26  ;;  %v2809_v26 = vpop.permute.xlu0 %2808 }
 0x1b3   : > { %v7549_v0 = vadd.f32 %v5291_v24, %v5290_v37  ;;  %v5293_v38 = vpop.f32.mrb[2].mxu0  ;;  %5546 = vmatprep.mubr.msk.bf16.mxu0 %vm1435_vm0, %v2616_v15  ;;  %v2978_v37 = vsel %vm1435_vm0, %v5661_v32, %v2757_v55  ;;  %v4467_v24 = vld [vmem:[#allocation2 + $0x1a8] sm:$0x1] }
 0x1b4   : > { %v5294_v45 = vpop.f32.mrb[3].mxu0  ;;  %v2648_v1 = vshll.u32 %v4467_v24, 16 }
 0x1b5   : > { %v5362_v8 = vpop.f32.mrb[0].mxu1  ;;  %v7553_v10 = vadd.f32 %v5294_v45, %v5293_v38  ;;  %v2645_v38 = vrot.slane %v2520_v13, 1  ;;  %v2759_v45 = vpop.permute.xlu1 %2758 }
 0x1b6   : > { %v5363_v40 = vpop.f32.mrb[1].mxu1  ;;  %v2981_v15 = vsel %vm1435_vm0, %v5662_v27, %v2759_v45  ;;  %v2650_v4 = vrot.slane %v2648_v1, 1  ;;  %v2811_v23 = vpop.permute.xlu0 %2810 }
 0x1b7   : > { %v7556_v25 = vadd.f32 %v5363_v40, %v5362_v8  ;;  %v5365_v9 = vpop.f32.mrb[2].mxu1  ;;  %3419 = vmatmul.mubr.bf16.gmra.mrb[60].mxu1 %v2975_v33  ;;  %v2644_v8 = vsel %vm1827_vm2, %v2639_v3, %v2643_v56  ;;  %v2513_v40 = vshrl.u32 %v4450_v62, 16  ;;  %v2646_v7 = vor.u32 %v2645_v38, %v2517_v28 }
 0x1b8   : > { %v5366_v50 = vpop.f32.mrb[3].mxu1  ;;  %3426 = vmatprep.mubr.bf16.mxu1 %v3039_v36 }
 0x1b9   : > { %v7560_v57 = vadd.f32 %v5366_v50, %v5365_v9  ;;  %v3047_v9 = vsel %vm1435_vm0, %v2511_v19, %v2809_v26  ;;  %v2515_v43 = vrot.slane %v2513_v40, 7  ;;  %v2651_v52 = vsel %vm1827_vm2, %v2646_v7, %v2650_v4 }
 0x1ba   : > { %5547 = vmatmul.mubr.msk.bf16.gmra.mrb[68].mxu0 %vm1435_vm0, %v2623_v51  ;;  %v5664_v51 = vld [vmem:[#allocation2 + $0x188] sm:$0xff] }
 0x1bb   : > { %5550 = vmatprep.mubr.msk.bf16.mxu0 %vm1435_vm0, %v2630_v22  ;;  %v2761_v33 = vpop.permute.xlu1 %2760  ;;  %v2523_v36 = vsel %vm1618_vm1, %v2515_v43, %v2522_v59 }
 0x1bc   : > { %v2984_v2 = vsel %vm1435_vm0, %v5663_v53, %v2761_v33  ;;  %v3051_v35 = vsel %vm1435_vm0, %v2523_v36, %v2811_v23 }
 0x1bf   : > { %3427 = vmatmul.mubr.bf16.gmra.mrb[64].mxu1 %v2978_v37 }
 0x1c0   : > { %3434 = vmatprep.mubr.bf16.mxu1 %v3043_v63 }
 0x1c2   : > { %5551 = vmatmul.mubr.msk.bf16.gmra.mrb[72].mxu0 %vm1435_vm0, %v2637_v16 }
 0x1c3   : > { %5554 = vmatprep.mubr.msk.bf16.mxu0 %vm1435_vm0, %v2644_v8 }
 0x1c6   : > { %v2763_v41 = vpop.permute.xlu1 %2762 }
 0x1c7   : > { %3435 = vmatmul.mubr.bf16.gmra.mrb[68].mxu1 %v2981_v15  ;;  %v2987_v20 = vsel %vm1435_vm0, %v5664_v51, %v2763_v41 }
 0x1c8   : > { %3442 = vmatprep.mubr.bf16.mxu1 %v3047_v9 }
 0x1ca   : > { %v5296_v6 = vpop.f32.mrb[4].mxu0  ;;  %5555 = vmatmul.mubr.msk.bf16.gmra.mrb[76].mxu0 %vm1435_vm0, %v2651_v52 }
 0x1cb   : > { %v5297_v49 = vpop.f32.mrb[5].mxu0 }
 0x1cc   : > { %v7583_v46 = vadd.f32 %v5297_v49, %v5296_v6  ;;  %v5299_v50 = vpop.f32.mrb[6].mxu0 }
 0x1cd   : > { %v5300_v29 = vpop.f32.mrb[7].mxu0 }
 0x1ce   : > { %v7586_v30 = vadd.f32 %v5300_v29, %v5299_v50 }
 0x1cf   : > { %3443 = vmatmul.mubr.bf16.gmra.mrb[72].mxu1 %v2984_v2 }
 0x1d0   : > { %3450 = vmatprep.mubr.bf16.mxu1 %v3051_v35 }
 0x1d1   : > { %v5368_v47 = vpop.f32.mrb[4].mxu1 }
 0x1d2   : > { %v5369_v21 = vpop.f32.mrb[5].mxu1 }
 0x1d3   : > { %v7592_v31 = vadd.f32 %v5369_v21, %v5368_v47  ;;  %v5371_v11 = vpop.f32.mrb[6].mxu1 }
 0x1d4   : > { %v5372_v14 = vpop.f32.mrb[7].mxu1 }
 0x1d5   : > { %v7594_v12 = vadd.f32 %v5372_v14, %v5371_v11 }
 0x1d7   : > { %3451 = vmatmul.mubr.bf16.gmra.mrb[76].mxu1 %v2987_v20 }
 0x1e7   : > { %v5302_v18 = vpop.f32.mrb[8].mxu0 }
 0x1e8   : > { %v5303_v55 = vpop.f32.mrb[9].mxu0 }
 0x1e9   : > { %v7597_v22 = vadd.f32 %v5303_v55, %v5302_v18  ;;  %v5305_v5 = vpop.f32.mrb[10].mxu0 }
 0x1ea   : > { %v5306_v60 = vpop.f32.mrb[11].mxu0 }
 0x1eb   : > { %v7599_v61 = vadd.f32 %v5306_v60, %v5305_v5 }
 0x1ee   : > { %v5374_v54 = vpop.f32.mrb[8].mxu1 }
 0x1ef   : > { %v5375_v17 = vpop.f32.mrb[9].mxu1 }
 0x1f0   : > { %v7601_v39 = vadd.f32 %v5375_v17, %v5374_v54  ;;  %v5377_v48 = vpop.f32.mrb[10].mxu1 }
 0x1f1   : > { %v5378_v13 = vpop.f32.mrb[11].mxu1 }
 0x1f2   : > { %v7603_v32 = vadd.f32 %v5378_v13, %v5377_v48 }
 0x204   : > { %v5308_v37 = vpop.f32.mrb[12].mxu0 }
 0x205   : > { %v5309_v34 = vpop.f32.mrb[13].mxu0 }
 0x206   : > { %v7605_v3 = vadd.f32 %v5309_v34, %v5308_v37  ;;  %v5311_v63 = vpop.f32.mrb[14].mxu0 }
 0x207   : > { %v5312_v56 = vpop.f32.mrb[15].mxu0 }
 0x208   : > { %v7607_v24 = vadd.f32 %v5312_v56, %v5311_v63 }
 0x211   : > { %v5380_v58 = vpop.f32.mrb[12].mxu1 }
 0x212   : > { %v5381_v28 = vpop.f32.mrb[13].mxu1 }
 0x213   : > { %v7609_v44 = vadd.f32 %v5381_v28, %v5380_v58  ;;  %v5383_v62 = vpop.f32.mrb[14].mxu1 }
 0x214   : > { %v5384_v38 = vpop.f32.mrb[15].mxu1 }
 0x215   : > { %v7611_v16 = vadd.f32 %v5384_v38, %v5383_v62 }
 0x225   : > { %v5314_v1 = vpop.f32.mrb[16].mxu0 }
 0x226   : > { %v5315_v45 = vpop.f32.mrb[17].mxu0 }
 0x227   : > { %v7613_v8 = vadd.f32 %v5315_v45, %v5314_v1  ;;  %v5317_v42 = vpop.f32.mrb[18].mxu0 }
 0x228   : > { %v5318_v26 = vpop.f32.mrb[19].mxu0 }
 0x229   : > { %v7615_v19 = vadd.f32 %v5318_v26, %v5317_v42 }
 0x22d   : > { %v5320_v40 = vpop.f32.mrb[20].mxu0 }
 0x22e   : > { %v5321_v7 = vpop.f32.mrb[21].mxu0 }
 0x22f   : > { %v7617_v27 = vadd.f32 %v5321_v7, %v5320_v40  ;;  %v5323_v15 = vpop.f32.mrb[22].mxu0 }
 0x230   : > { %v5324_v4 = vpop.f32.mrb[23].mxu0 }
 0x231   : > { %v7619_v6 = vadd.f32 %v5324_v4, %v5323_v15 }
 0x232   : > { %v5402_v9 = vpop.f32.mrb[16].mxu1 }
 0x233   : > { %v5403_v59 = vpop.f32.mrb[17].mxu1 }
 0x234   : > { %v5404_v43 = vadd.f32 %v5403_v59, %v5402_v9  ;;  %v5405_v49 = vpop.f32.mrb[18].mxu1 }
 0x235   : > { %v5406_v50 = vpop.f32.mrb[19].mxu1  ;;  %v5326_v29 = vpop.f32.mrb[24].mxu0 }
 0x236   : > { %v5407_v52 = vadd.f32 %v5406_v50, %v5405_v49  ;;  %v7622_v33 = vadd.f32 %v5404_v43, %v7549_v0  ;;  %v5327_v23 = vpop.f32.mrb[25].mxu0 }
 0x237   : > { %v7624_v36 = vadd.f32 %v5327_v23, %v5326_v29  ;;  %v5329_v53 = vpop.f32.mrb[26].mxu0 }
 0x238   : > { %v7627_v2 = vadd.f32 %v5407_v52, %v7553_v10  ;;  %v5330_v47 = vpop.f32.mrb[27].mxu0 }
 0x239   : > { %v7629_v21 = vadd.f32 %v5330_v47, %v5329_v53 }
 0x23a   : > { %v5408_v35 = vpop.f32.mrb[20].mxu1 }
 0x23b   : > { %v5409_v11 = vpop.f32.mrb[21].mxu1 }
 0x23c   : > { %v5410_v14 = vadd.f32 %v5409_v11, %v5408_v35  ;;  %v5411_v41 = vpop.f32.mrb[22].mxu1 }
 0x23d   : > { %v5412_v51 = vpop.f32.mrb[23].mxu1  ;;  %v5332_v18 = vpop.f32.mrb[28].mxu0 }
 0x23e   : > { %v5413_v20 = vadd.f32 %v5412_v51, %v5411_v41  ;;  %v7632_v0 = vadd.f32 %v5410_v14, %v7583_v46  ;;  %v5333_v55 = vpop.f32.mrb[29].mxu0 }
 0x23f   : > { %v7634_v5 = vadd.f32 %v5333_v55, %v5332_v18  ;;  %v5335_v10 = vpop.f32.mrb[30].mxu0 }
 0x240   : > { %v7637_v60 = vadd.f32 %v5413_v20, %v7586_v30  ;;  %v5336_v54 = vpop.f32.mrb[31].mxu0  ;;  %v5767_v30 = vmov 0.0  }
 0x241   : > { %v7639_v48 = vadd.f32 %v5336_v54, %v5335_v10  ;;  %1581 = vst.msk [vmem:[%s7647_s27] sm:$0x1] %vm1580_vm3, %v5767_v30 }
 0x242   : > { %v5414_v17 = vpop.f32.mrb[24].mxu1 }
 0x243   : > { %v5415_v13 = vpop.f32.mrb[25].mxu1 }
 0x244   : > { %v5416_v37 = vadd.f32 %v5415_v13, %v5414_v17  ;;  %v5417_v34 = vpop.f32.mrb[26].mxu1 }
 0x245   : > { %v5418_v63 = vpop.f32.mrb[27].mxu1  ;;  %v5338_v56 = vpop.f32.mrb[32].mxu0 }
 0x246   : > { %v5419_v46 = vadd.f32 %v5418_v63, %v5417_v34  ;;  %v7643_v58 = vadd.f32 %v5416_v37, %v7597_v22  ;;  %v5339_v28 = vpop.f32.mrb[33].mxu0 }
 0x247   : > { %v7651_v62 = vadd.f32 %v5339_v28, %v5338_v56  ;;  %v5341_v38 = vpop.f32.mrb[34].mxu0 }
 0x248   : > { %v7654_v1 = vadd.f32 %v5419_v46, %v7599_v61  ;;  %v5342_v45 = vpop.f32.mrb[35].mxu0 }
 0x249   : > { %v7656_v26 = vadd.f32 %v5342_v45, %v5341_v38 }
 0x24a   : > { %v5420_v42 = vpop.f32.mrb[28].mxu1 }
 0x24b   : > { %v5421_v22 = vpop.f32.mrb[29].mxu1 }
 0x24c   : > { %v5422_v40 = vadd.f32 %v5421_v22, %v5420_v42  ;;  %v5423_v7 = vpop.f32.mrb[30].mxu1 }
 0x24d   : > { %v5424_v15 = vpop.f32.mrb[31].mxu1  ;;  %v5344_v9 = vpop.f32.mrb[36].mxu0 }
 0x24e   : > { %v5425_v4 = vadd.f32 %v5424_v15, %v5423_v7  ;;  %v7659_v59 = vadd.f32 %v5422_v40, %v7605_v3  ;;  %v5345_v43 = vpop.f32.mrb[37].mxu0 }
 0x24f   : > { %v7661_v49 = vadd.f32 %v5345_v43, %v5344_v9  ;;  %v5347_v50 = vpop.f32.mrb[38].mxu0 }
 0x250   : > { %v7664_v61 = vadd.f32 %v5425_v4, %v7607_v24  ;;  %v5348_v52 = vpop.f32.mrb[39].mxu0 }
 0x251   : > { %v7666_v23 = vadd.f32 %v5348_v52, %v5347_v50  ;;  %v7700_v52 = vld [vmem:[%s7998_s4] ss:$0 sm:$0xff] }
 0x252   : > { %v5426_v29 = vpop.f32.mrb[32].mxu1 }
 0x253   : > { %v5427_v53 = vpop.f32.mrb[33].mxu1 }
 0x254   : > { %v5428_v47 = vadd.f32 %v5427_v53, %v5426_v29  ;;  %v5429_v35 = vpop.f32.mrb[34].mxu1 }
 0x255   : > { %v5430_v11 = vpop.f32.mrb[35].mxu1  ;;  %v5350_v41 = vpop.f32.mrb[40].mxu0 }
 0x256   : > { %v5431_v14 = vadd.f32 %v5430_v11, %v5429_v35  ;;  %v7669_v3 = vadd.f32 %v5428_v47, %v7613_v8  ;;  %v5351_v51 = vpop.f32.mrb[41].mxu0 }
 0x257   : > { %v7671_v20 = vadd.f32 %v5351_v51, %v5350_v41  ;;  %v5353_v18 = vpop.f32.mrb[42].mxu0 }
 0x258   : > { %v7674_v24 = vadd.f32 %v5431_v14, %v7615_v19  ;;  %v5354_v55 = vpop.f32.mrb[43].mxu0 }
 0x259   : > { %v7676_v54 = vadd.f32 %v5354_v55, %v5353_v18 }
 0x25a   : > { %v5432_v10 = vpop.f32.mrb[36].mxu1 }
 0x25b   : > { %v5433_v17 = vpop.f32.mrb[37].mxu1 }
 0x25c   : > { %v5434_v13 = vadd.f32 %v5433_v17, %v5432_v10  ;;  %v5435_v37 = vpop.f32.mrb[38].mxu1 }
 0x25d   : > { %v5436_v34 = vpop.f32.mrb[39].mxu1  ;;  %v5356_v46 = vpop.f32.mrb[44].mxu0 }
 0x25e   : > { %v5437_v63 = vadd.f32 %v5436_v34, %v5435_v37  ;;  %v7679_v8 = vadd.f32 %v5434_v13, %v7617_v27  ;;  %v5357_v56 = vpop.f32.mrb[45].mxu0  ;;  %v7691_v27 = vld [vmem:[%s7997_s3] ss:$0 sm:$0xff] }
 0x25f   : > { %v7681_v28 = vadd.f32 %v5357_v56, %v5356_v46  ;;  %v5359_v30 = vpop.f32.mrb[46].mxu0 }
 0x260   : > { %v7684_v19 = vadd.f32 %v5437_v63, %v7619_v6  ;;  %v5360_v38 = vpop.f32.mrb[47].mxu0 }
 0x261   : > { %v7686_v42 = vadd.f32 %v5360_v38, %v5359_v30 }
 0x262   : > { %v5438_v45 = vpop.f32.mrb[40].mxu1 }
 0x263   : > { %v5439_v22 = vpop.f32.mrb[41].mxu1 }
 0x264   : > { %v5440_v40 = vadd.f32 %v5439_v22, %v5438_v45  ;;  %v5441_v7 = vpop.f32.mrb[42].mxu1 }
 0x265   : > { %v5442_v15 = vpop.f32.mrb[43].mxu1  ;;  %v5528_v9 = vpop.f32.mrb[48].mxu0 }
 0x266   : > { %v5443_v4 = vadd.f32 %v5442_v15, %v5441_v7  ;;  %v7694_v43 = vadd.f32 %v5440_v40, %v7624_v36  ;;  %v3502_v6 = vadd.f32 %v5528_v9, %v7632_v0  ;;  %v3493_v50 = vpop.f32.mrb[49].mxu0 }
 0x267   : > { %v3494_v29 = vadd.f32 %v3493_v50, %v7622_v33  ;;  %v5529_v53 = vpop.f32.mrb[50].mxu0 }
 0x268   : > { %v7704_v47 = vadd.f32 %v5443_v4, %v7629_v21  ;;  %v3629_v35 = vmul.f32 %v7691_v27, %v3502_v6  ;;  %v3505_v11 = vadd.f32 %v5529_v53, %v7637_v60  ;;  %v3496_v36 = vpop.f32.mrb[51].mxu0 }
 0x269   : > { %v3627_v0 = vmul.f32 %v7691_v27, %v3494_v29  ;;  %v3497_v41 = vadd.f32 %v3496_v36, %v7627_v2 }
 0x26a   : > { %v5444_v14 = vpop.f32.mrb[44].mxu1  ;;  %v3668_v18 = vadd.f32 %v7700_v52, %v3629_v35  ;;  %v3630_v33 = vmul.f32 %v7691_v27, %v3505_v11 }
 0x26b   : > { %v5445_v51 = vpop.f32.mrb[45].mxu1  ;;  %v3666_v21 = vadd.f32 %v7700_v52, %v3627_v0  ;;  %v3628_v17 = vmul.f32 %v7691_v27, %v3497_v41 }
 0x26c   : > { %v5446_v55 = vadd.f32 %v5445_v51, %v5444_v14  ;;  %v5447_v10 = vpop.f32.mrb[46].mxu1  ;;  %v3700_v60 = vmax.f32 %v3668_v18, 0.0  ;;  %v3669_v37 = vadd.f32 %v7700_v52, %v3630_v33 }
 0x26d   : > { %v5448_v13 = vpop.f32.mrb[47].mxu1  ;;  %v3698_v2 = vmax.f32 %v3666_v21, 0.0  ;;  %v3667_v63 = vadd.f32 %v7700_v52, %v3628_v17  ;;  %v5532_v46 = vpop.f32.mrb[52].mxu0 }
 0x26e   : > { %v5449_v34 = vadd.f32 %v5448_v13, %v5447_v10  ;;  %v7723_v56 = vadd.f32 %v5446_v55, %v7634_v5  ;;  %v4525_v30 = vpack.c.bf16 %v3700_v60, %v3700_v60  ;;  %v3701_v38 = vmax.f32 %v3669_v37, 0.0  ;;  %v3509_v22 = vpop.f32.mrb[53].mxu0 }
 0x26f   : > { %v3518_v45 = vadd.f32 %v5532_v46, %v7659_v59  ;;  %v4523_v40 = vpack.c.bf16 %v3698_v2, %v3698_v2  ;;  %v3699_v7 = vmax.f32 %v3667_v63, 0.0  ;;  %v3510_v15 = vadd.f32 %v3509_v22, %v7643_v58  ;;  %v5533_v4 = vpop.f32.mrb[54].mxu0 }
 0x270   : > { %v7728_v9 = vadd.f32 %v5449_v34, %v7639_v48  ;;  %3861 = vst.msk [vmem:[%s7719_s19 + $0x8] sm:$0xf] %vm3858_vm4, %v4525_v30  ;;  %v3731_v6 = vpack.c.bf16 %v3701_v38, %v3700_v60  ;;  %v4526_v5 = vpack.c.bf16 %v3701_v38, %v3701_v38  ;;  %v3521_v29 = vadd.f32 %v5533_v4, %v7664_v61  ;;  %v3512_v59 = vpop.f32.mrb[55].mxu0 }
 0x271   : > { %v3633_v50 = vmul.f32 %v7691_v27, %v3518_v45  ;;  %3859 = vst.msk [vmem:[%s7719_s19] sm:$0xf] %vm3858_vm4, %v4523_v40  ;;  %v3730_v35 = vpack.c.bf16 %v3699_v7, %v3698_v2  ;;  %v4524_v58 = vpack.c.bf16 %v3699_v7, %v3699_v7  ;;  %v3631_v11 = vmul.f32 %v7691_v27, %v3510_v15 }
 0x272   : > { %v5450_v53 = vpop.f32.mrb[48].mxu1  ;;  %v3513_v48 = vadd.f32 %v3512_v59, %v7654_v1  ;;  %3862 = vst.msk [vmem:[%s7719_s19 + $0xc] sm:$0xf] %vm3858_vm4, %v4526_v5  ;;  %v3894_v14 = vunpack.c.l.bf16 %v3731_v6  ;;  %v3895_v0 = vunpack.c.h.bf16 %v3731_v6  ;;  %v3634_v61 = vmul.f32 %v7691_v27, %v3521_v29 }
 0x273   : > { %v5451_v36 = vpop.f32.mrb[49].mxu1  ;;  %v3672_v41 = vadd.f32 %v7700_v52, %v3633_v50  ;;  %3860 = vst.msk [vmem:[%s7719_s19 + $0x4] sm:$0xf] %vm3858_vm4, %v4524_v58  ;;  %v3892_v33 = vunpack.c.l.bf16 %v3730_v35  ;;  %v3893_v55 = vunpack.c.h.bf16 %v3730_v35  ;;  %v3670_v10 = vadd.f32 %v7700_v52, %v3631_v11 }
 0x274   : > { %v5452_v51 = vadd.f32 %v5451_v36, %v5450_v53  ;;  %v5453_v18 = vpop.f32.mrb[50].mxu1  ;;  %v3927_v21 = vsel %vm1435_vm0, %v3894_v14, 0.0  ;;  %v3929_v1 = vsel %vm1435_vm0, %v3895_v0, 0.0  ;;  %v3673_v60 = vadd.f32 %v7700_v52, %v3634_v61 }
 0x275   : > { %v5454_v17 = vpop.f32.mrb[51].mxu1  ;;  %v3704_v13 = vmax.f32 %v3672_v41, 0.0  ;;  %v3924_v37 = vsel %vm1435_vm0, %v3892_v33, 0.0  ;;  %v3925_v34 = vsel %vm1435_vm0, %v3893_v55, 0.0  ;;  %v3702_v63 = vmax.f32 %v3670_v10, 0.0  ;;  %v5536_v46 = vpop.f32.mrb[56].mxu0 }
 0x276   : > { %v7750_v2 = vadd.f32 %v5454_v17, %v5453_v18  ;;  %v3926_v30 = vadd.f32 %v3925_v34, %v3924_v37  ;;  %v3705_v45 = vmax.f32 %v3673_v60, 0.0  ;;  %v3632_v22 = vmul.f32 %v7691_v27, %v3513_v48  ;;  %v3525_v40 = vpop.f32.mrb[57].mxu0 }
 0x277   : > { %v4529_v38 = vpack.c.bf16 %v3704_v13, %v3704_v13  ;;  %v4527_v7 = vpack.c.bf16 %v3702_v63, %v3702_v63  ;;  %v3534_v15 = vadd.f32 %v5536_v46, %v7679_v8  ;;  %v3526_v4 = vadd.f32 %v3525_v40, %v7669_v3  ;;  %v5537_v6 = vpop.f32.mrb[58].mxu0 }
 0x278   : > { %v7756_v5 = vadd.f32 %v5452_v51, %v7651_v62  ;;  %v3928_v50 = vadd.f32 %v3927_v21, %v3926_v30  ;;  %v3733_v29 = vpack.c.bf16 %v3705_v45, %v3704_v13  ;;  %v4530_v59 = vpack.c.bf16 %v3705_v45, %v3705_v45  ;;  %v3528_v35 = vpop.f32.mrb[59].mxu0 }
 0x279   : > { %3865 = vst.msk [vmem:[%s7719_s19 + $0x18] sm:$0xf] %vm3858_vm4, %v4529_v38  ;;  %v3671_v53 = vadd.f32 %v7700_v52, %v3632_v22  ;;  %3863 = vst.msk [vmem:[%s7719_s19 + $0x10] sm:$0xf] %vm3858_vm4, %v4527_v7  ;;  %v3637_v8 = vmul.f32 %v7691_v27, %v3534_v15  ;;  %v3635_v3 = vmul.f32 %v7691_v27, %v3526_v4 }
 0x27a   : > { %v5456_v58 = vpop.f32.mrb[52].mxu1  ;;  %v3537_v11 = vadd.f32 %v5537_v6, %v7684_v19  ;;  %v3529_v62 = vadd.f32 %v3528_v35, %v7674_v24  ;;  %3866 = vst.msk [vmem:[%s7719_s19 + $0x1c] sm:$0xf] %vm3858_vm4, %v4530_v59  ;;  %v3898_v36 = vunpack.c.l.bf16 %v3733_v29  ;;  %v3930_v0 = vadd.f32 %v3929_v1, %v3928_v50 }
 0x27b   : > { %v5457_v48 = vpop.f32.mrb[53].mxu1  ;;  %v3703_v14 = vmax.f32 %v3671_v53, 0.0  ;;  %v3676_v51 = vadd.f32 %v7700_v52, %v3637_v8  ;;  %v3674_v18 = vadd.f32 %v7700_v52, %v3635_v3  ;;  %v3899_v55 = vunpack.c.h.bf16 %v3733_v29 }
 0x27c   : > { %v7769_v41 = vadd.f32 %v5457_v48, %v5456_v58  ;;  %v5459_v61 = vpop.f32.mrb[54].mxu1  ;;  %v3638_v33 = vmul.f32 %v7691_v27, %v3537_v11  ;;  %v3935_v19 = vsel %vm1435_vm0, %v3898_v36, 0.0  ;;  %v3636_v30 = vmul.f32 %v7691_v27, %v3529_v62 }
 0x27d   : > { %v3732_v24 = vpack.c.bf16 %v3703_v14, %v3702_v63  ;;  %v4528_v10 = vpack.c.bf16 %v3703_v14, %v3703_v14  ;;  %v5460_v21 = vpop.f32.mrb[55].mxu1  ;;  %v3708_v13 = vmax.f32 %v3676_v51, 0.0  ;;  %v3706_v1 = vmax.f32 %v3674_v18, 0.0  ;;  %v5540_v37 = vpop.f32.mrb[60].mxu0 }
 0x27e   : > { %v7775_v17 = vadd.f32 %v5460_v21, %v5459_v61  ;;  %v3677_v60 = vadd.f32 %v7700_v52, %v3638_v33  ;;  %v3550_v38 = vadd.f32 %v5540_v37, %v7723_v56  ;;  %v3541_v63 = vpop.f32.mrb[61].mxu0  ;;  %v3675_v50 = vadd.f32 %v7700_v52, %v3636_v30 }
 0x27f   : > { %3864 = vst.msk [vmem:[%s7719_s19 + $0x14] sm:$0xf] %vm3858_vm4, %v4528_v10  ;;  %v3896_v34 = vunpack.c.l.bf16 %v3732_v24  ;;  %v3897_v46 = vunpack.c.h.bf16 %v3732_v24  ;;  %v4533_v45 = vpack.c.bf16 %v3708_v13, %v3708_v13  ;;  %v4531_v22 = vpack.c.bf16 %v3706_v1, %v3706_v1  ;;  %v5541_v15 = vpop.f32.mrb[62].mxu0 }
 0x280   : > { %v3709_v40 = vmax.f32 %v3677_v60, 0.0  ;;  %v3542_v7 = vadd.f32 %v3541_v63, %v7694_v43  ;;  %v3641_v29 = vmul.f32 %v7691_v27, %v3550_v38  ;;  %v3544_v59 = vpop.f32.mrb[63].mxu0  ;;  %v3707_v3 = vmax.f32 %v3675_v50, 0.0 }
 0x281   : > { %v3931_v4 = vsel %vm1435_vm0, %v3896_v34, 0.0  ;;  %v3933_v6 = vsel %vm1435_vm0, %v3897_v46, 0.0  ;;  %3869 = vst.msk [vmem:[%s7719_s19 + $0x28] sm:$0xf] %vm3858_vm4, %v4533_v45  ;;  %3867 = vst.msk [vmem:[%s7719_s19 + $0x20] sm:$0xf] %vm3858_vm4, %v4531_v22  ;;  %v3553_v62 = vadd.f32 %v5541_v15, %v7728_v9  ;;  %v3545_v48 = vadd.f32 %v3544_v59, %v7704_v47 }
 0x282   : > { %v3932_v53 = vadd.f32 %v3931_v4, %v3930_v0  ;;  %v5462_v56 = vpop.f32.mrb[56].mxu1  ;;  %v7791_v35 = vpack.c.bf16 %v3709_v40, %v3708_v13  ;;  %v4534_v43 = vpack.c.bf16 %v3709_v40, %v3709_v40  ;;  %v3639_v58 = vmul.f32 %v7691_v27, %v3542_v7 }
 0x283   : > { %v5463_v8 = vpop.f32.mrb[57].mxu1  ;;  %v3680_v11 = vadd.f32 %v7700_v52, %v3641_v29  ;;  %v3937_v36 = vsel %vm1435_vm0, %v3899_v55, 0.0  ;;  %v3734_v18 = vpack.c.bf16 %v3707_v3, %v3706_v1  ;;  %v4532_v33 = vpack.c.bf16 %v3707_v3, %v3707_v3 }
 0x284   : > { %v3934_v14 = vadd.f32 %v3933_v6, %v3932_v53  ;;  %v5464_v0 = vadd.f32 %v5463_v8, %v5462_v56  ;;  %3870 = vst.msk [vmem:[%s7719_s19 + $0x2c] sm:$0xf] %vm3858_vm4, %v4534_v43  ;;  %v3902_v61 = vunpack.c.l.bf16 %v7791_v35  ;;  %v5465_v51 = vpop.f32.mrb[58].mxu1  ;;  %v3678_v21 = vadd.f32 %v7700_v52, %v3639_v58 }
 0x285   : > { %v5466_v24 = vpop.f32.mrb[59].mxu1  ;;  %v3712_v10 = vmax.f32 %v3680_v11, 0.0  ;;  %v3903_v9 = vunpack.c.h.bf16 %v7791_v35  ;;  %v5544_v60 = vpop.f32.mrb[64].mxu0  ;;  %3868 = vst.msk [vmem:[%s7719_s19 + $0x24] sm:$0xf] %vm3858_vm4, %v4532_v33  ;;  %v3900_v37 = vunpack.c.l.bf16 %v3734_v18  ;;  %v3901_v34 = vunpack.c.h.bf16 %v3734_v18 }
 0x286   : > { %v3936_v13 = vadd.f32 %v3935_v19, %v3934_v14  ;;  %v3943_v47 = vsel %vm1435_vm0, %v3902_v61, 0.0  ;;  %v7804_v55 = vadd.f32 %v5466_v24, %v5465_v51  ;;  %v3710_v1 = vmax.f32 %v3678_v21, 0.0  ;;  %v3557_v30 = vpop.f32.mrb[65].mxu0 }
 0x287   : > { %v4537_v46 = vpack.c.bf16 %v3712_v10, %v3712_v10  ;;  %v3642_v63 = vmul.f32 %v7691_v27, %v3553_v62  ;;  %v3640_v19 = vmul.f32 %v7691_v27, %v3545_v48  ;;  %v3405_v45 = vadd.f32 %v7769_v41, %v7661_v49  ;;  %v5545_v22 = vpop.f32.mrb[66].mxu0 }
 0x288   : > { %v3938_v38 = vadd.f32 %v3937_v36, %v3936_v13  ;;  %v3939_v40 = vsel %vm1435_vm0, %v3900_v37, 0.0  ;;  %v3941_v7 = vsel %vm1435_vm0, %v3901_v34, 0.0  ;;  %v4535_v15 = vpack.c.bf16 %v3710_v1, %v3710_v1  ;;  %v3560_v6 = vpop.f32.mrb[67].mxu0 }
 0x289   : > { %3873 = vst.msk [vmem:[%s7719_s19 + $0x38] sm:$0xf] %vm3858_vm4, %v4537_v46  ;;  %v3558_v4 = vadd.f32 %v3557_v30, %v7756_v5  ;;  %v3681_v59 = vadd.f32 %v7700_v52, %v3642_v63  ;;  %v3679_v53 = vadd.f32 %v7700_v52, %v3640_v19  ;;  %v3566_v56 = vadd.f32 %v5544_v60, %v3405_v45 }
 0x28a   : > { %v3940_v50 = vadd.f32 %v3939_v40, %v3938_v38  ;;  %v5468_v29 = vpop.f32.mrb[60].mxu1  ;;  %3871 = vst.msk [vmem:[%s7719_s19 + $0x30] sm:$0xf] %vm3858_vm4, %v4535_v15  ;;  %v3408_v35 = vadd.f32 %v7775_v17, %v7666_v23  ;;  %v3400_v43 = vadd.f32 %v7750_v2, %v7656_v26  ;;  %v3413_v5 = vadd.f32 %v5464_v0, %v7671_v20 }
 0x28b   : > { %v5469_v49 = vpop.f32.mrb[61].mxu1  ;;  %v3643_v41 = vmul.f32 %v7691_v27, %v3558_v4  ;;  %v3713_v3 = vmax.f32 %v3681_v59, 0.0  ;;  %v3711_v62 = vmax.f32 %v3679_v53, 0.0  ;;  %v3645_v36 = vmul.f32 %v7691_v27, %v3566_v56 }
 0x28c   : > { %v3942_v58 = vadd.f32 %v3941_v7, %v3940_v50  ;;  %v5470_v8 = vadd.f32 %v5469_v49, %v5468_v29  ;;  %v5471_v11 = vpop.f32.mrb[62].mxu1  ;;  %v3569_v61 = vadd.f32 %v5545_v22, %v3408_v35  ;;  %v3561_v51 = vadd.f32 %v3560_v6, %v3400_v43 }
 0x28d   : > { %v5472_v48 = vpop.f32.mrb[63].mxu1  ;;  %v3682_v14 = vadd.f32 %v7700_v52, %v3643_v41  ;;  %v3737_v23 = vpack.c.bf16 %v3713_v3, %v3712_v10  ;;  %v4538_v17 = vpack.c.bf16 %v3713_v3, %v3713_v3  ;;  %v3736_v26 = vpack.c.bf16 %v3711_v62, %v3710_v1  ;;  %v5548_v2 = vpop.f32.mrb[68].mxu0 }
 0x28e   : > { %v3944_v18 = vadd.f32 %v3943_v47, %v3942_v58  ;;  %v4536_v20 = vpack.c.bf16 %v3711_v62, %v3711_v62  ;;  %v5473_v0 = vadd.f32 %v5472_v48, %v5471_v11  ;;  %v3684_v33 = vadd.f32 %v7700_v52, %v3645_v36  ;;  %v3573_v21 = vpop.f32.mrb[69].mxu0 }
 0x28f   : > { %v3714_v24 = vmax.f32 %v3682_v14, 0.0  ;;  %v3945_v13 = vsel %vm1435_vm0, %v3903_v9, 0.0  ;;  %3874 = vst.msk [vmem:[%s7719_s19 + $0x3c] sm:$0xf] %vm3858_vm4, %v4538_v17  ;;  %v3906_v60 = vunpack.c.l.bf16 %v3737_v23  ;;  %v3904_v37 = vunpack.c.l.bf16 %v3736_v26  ;;  %v5549_v47 = vpop.f32.mrb[70].mxu0 }
 0x290   : > { %v3905_v34 = vunpack.c.h.bf16 %v3736_v26  ;;  %3872 = vst.msk [vmem:[%s7719_s19 + $0x34] sm:$0xf] %vm3858_vm4, %v4536_v20  ;;  %v3946_v10 = vadd.f32 %v3945_v13, %v3944_v18  ;;  %v3716_v46 = vmax.f32 %v3684_v33, 0.0  ;;  %v3646_v30 = vmul.f32 %v7691_v27, %v3569_v61  ;;  %v3576_v38 = vpop.f32.mrb[71].mxu0 }
 0x291   : > { %v4539_v1 = vpack.c.bf16 %v3714_v24, %v3714_v24  ;;  %v3907_v63 = vunpack.c.h.bf16 %v3737_v23  ;;  %v3951_v19 = vsel %vm1435_vm0, %v3906_v60, 0.0  ;;  %v3947_v9 = vsel %vm1435_vm0, %v3904_v37, 0.0 }
 0x292   : > { %v3949_v45 = vsel %vm1435_vm0, %v3905_v34, 0.0  ;;  %v5474_v22 = vpop.f32.mrb[64].mxu1  ;;  %v3948_v40 = vadd.f32 %v3947_v9, %v3946_v10  ;;  %v4541_v7 = vpack.c.bf16 %v3716_v46, %v3716_v46  ;;  %v3685_v4 = vadd.f32 %v7700_v52, %v3646_v30 }
 0x293   : > { %3875 = vst.msk [vmem:[%s7719_s19 + $0x40] sm:$0xf] %vm3858_vm4, %v4539_v1  ;;  %v5475_v15 = vpop.f32.mrb[65].mxu1  ;;  %v3644_v6 = vmul.f32 %v7691_v27, %v3561_v51  ;;  %v3421_v59 = vadd.f32 %v5470_v8, %v7681_v28  ;;  %v3574_v53 = vadd.f32 %v3573_v21, %v3413_v5  ;;  %v3424_v56 = vadd.f32 %v5473_v0, %v7686_v42 }
 0x294   : > { %v5476_v50 = vadd.f32 %v5475_v15, %v5474_v22  ;;  %v5477_v29 = vpop.f32.mrb[66].mxu1  ;;  %v3950_v49 = vadd.f32 %v3949_v45, %v3948_v40  ;;  %3877 = vst.msk [vmem:[%s7719_s19 + $0x48] sm:$0xf] %vm3858_vm4, %v4541_v7  ;;  %v3717_v41 = vmax.f32 %v3685_v4, 0.0  ;;  %v3416_v58 = vadd.f32 %v7804_v55, %v7676_v54 }
 0x295   : > { %v3683_v35 = vadd.f32 %v7700_v52, %v3644_v6  ;;  %v5478_v43 = vpop.f32.mrb[67].mxu1  ;;  %v3582_v11 = vadd.f32 %v5548_v2, %v3421_v59  ;;  %v3647_v62 = vmul.f32 %v7691_v27, %v3574_v53  ;;  %v3585_v48 = vadd.f32 %v5549_v47, %v3424_v56  ;;  %v5552_v28 = vpop.f32.mrb[72].mxu0 }
 0x296   : > { %v5479_v3 = vadd.f32 %v5478_v43, %v5477_v29  ;;  %v3952_v5 = vadd.f32 %v3951_v19, %v3950_v49  ;;  %v3739_v8 = vpack.c.bf16 %v3717_v41, %v3716_v46  ;;  %v4542_v42 = vpack.c.bf16 %v3717_v41, %v3717_v41  ;;  %v3589_v14 = vpop.f32.mrb[73].mxu0 }
 0x297   : > { %v3715_v36 = vmax.f32 %v3683_v35, 0.0  ;;  %v3649_v61 = vmul.f32 %v7691_v27, %v3582_v11  ;;  %v3686_v51 = vadd.f32 %v7700_v52, %v3647_v62  ;;  %v3650_v18 = vmul.f32 %v7691_v27, %v3585_v48  ;;  %v5553_v55 = vpop.f32.mrb[74].mxu0 }
 0x298   : > { %v3577_v54 = vadd.f32 %v3576_v38, %v3416_v58  ;;  %v3953_v23 = vsel %vm1435_vm0, %v3907_v63, 0.0  ;;  %3878 = vst.msk [vmem:[%s7719_s19 + $0x4c] sm:$0xf] %vm3858_vm4, %v4542_v42  ;;  %v3592_v2 = vpop.f32.mrb[75].mxu0  ;;  %v3910_v60 = vunpack.c.l.bf16 %v3739_v8  ;;  %v3911_v37 = vunpack.c.h.bf16 %v3739_v8 }
 0x299   : > { %v3738_v17 = vpack.c.bf16 %v3715_v36, %v3714_v24  ;;  %v4540_v26 = vpack.c.bf16 %v3715_v36, %v3715_v36  ;;  %v3954_v20 = vadd.f32 %v3953_v23, %v3952_v5  ;;  %v3688_v0 = vadd.f32 %v7700_v52, %v3649_v61 }
 0x29a   : > { %v5480_v33 = vpop.f32.mrb[68].mxu1  ;;  %v3718_v21 = vmax.f32 %v3686_v51, 0.0  ;;  %v3689_v13 = vadd.f32 %v7700_v52, %v3650_v18  ;;  %v3648_v9 = vmul.f32 %v7691_v27, %v3577_v54  ;;  %v3429_v22 = vadd.f32 %v5476_v50, %v7556_v25 }
 0x29b   : > { %3876 = vst.msk [vmem:[%s7719_s19 + $0x44] sm:$0xf] %vm3858_vm4, %v4540_v26  ;;  %v3908_v34 = vunpack.c.l.bf16 %v3738_v17  ;;  %v3909_v47 = vunpack.c.h.bf16 %v3738_v17  ;;  %v5481_v10 = vpop.f32.mrb[69].mxu1  ;;  %v3720_v46 = vmax.f32 %v3688_v0, 0.0  ;;  %v3959_v41 = vsel %vm1435_vm0, %v3910_v60, 0.0 }
 0x29c   : > { %v4543_v1 = vpack.c.bf16 %v3718_v21, %v3718_v21  ;;  %v5482_v24 = vadd.f32 %v5481_v10, %v5480_v33  ;;  %v3721_v30 = vmax.f32 %v3689_v13, 0.0  ;;  %v5483_v38 = vpop.f32.mrb[70].mxu1  ;;  %v3687_v29 = vadd.f32 %v7700_v52, %v3648_v9 }
 0x29d   : > { %v3955_v63 = vsel %vm1435_vm0, %v3908_v34, 0.0  ;;  %v3957_v19 = vsel %vm1435_vm0, %v3909_v47, 0.0  ;;  %v5484_v45 = vpop.f32.mrb[71].mxu1  ;;  %v4545_v7 = vpack.c.bf16 %v3720_v46, %v3720_v46  ;;  %v7869_v6 = vpop.f32.mrb[76].mxu0  ;;  %v3590_v56 = vadd.f32 %v3589_v14, %v3429_v22 }
 0x29e   : > { %v3956_v40 = vadd.f32 %v3955_v63, %v3954_v20  ;;  %3879 = vst.msk [vmem:[%s7719_s19 + $0x50] sm:$0xf] %vm3858_vm4, %v4543_v1  ;;  %v7867_v15 = vpack.c.bf16 %v3721_v30, %v3720_v46  ;;  %v4546_v4 = vpack.c.bf16 %v3721_v30, %v3721_v30  ;;  %v5485_v59 = vadd.f32 %v5484_v45, %v5483_v38  ;;  %v3605_v49 = vpop.f32.mrb[77].mxu0 }
 0x29f   : > { %v3437_v53 = vadd.f32 %v5482_v24, %v7592_v31  ;;  %3881 = vst.msk [vmem:[%s7719_s19 + $0x58] sm:$0xf] %vm3858_vm4, %v4545_v7  ;;  %v3432_v25 = vadd.f32 %v5479_v3, %v7560_v57  ;;  %v7879_v50 = vpop.f32.mrb[78].mxu0  ;;  %v3719_v43 = vmax.f32 %v3687_v29, 0.0  ;;  %v3651_v11 = vmul.f32 %v7691_v27, %v3590_v56 }
 0x2a0   : > { %v3958_v35 = vadd.f32 %v3957_v19, %v3956_v40  ;;  %3882 = vst.msk [vmem:[%s7719_s19 + $0x5c] sm:$0xf] %vm3858_vm4, %v4546_v4  ;;  %v3440_v62 = vadd.f32 %v5485_v59, %v7594_v12  ;;  %v3608_v31 = vpop.f32.mrb[79].mxu0  ;;  %v3961_v48 = vsel %vm1435_vm0, %v3911_v37, 0.0  ;;  %v3914_v8 = vunpack.c.l.bf16 %v7867_v15 }
 0x2a1   : > { %v3598_v58 = vadd.f32 %v5552_v28, %v3437_v53  ;;  %v3593_v36 = vadd.f32 %v3592_v2, %v3432_v25  ;;  %v3740_v14 = vpack.c.bf16 %v3719_v43, %v3718_v21  ;;  %v4544_v61 = vpack.c.bf16 %v3719_v43, %v3719_v43 }
 0x2a2   : > { %v3960_v5 = vadd.f32 %v3959_v41, %v3958_v35  ;;  %v5486_v42 = vpop.f32.mrb[72].mxu1  ;;  %v3690_v3 = vadd.f32 %v7700_v52, %v3651_v11  ;;  %v3601_v54 = vadd.f32 %v5553_v55, %v3440_v62  ;;  %v3915_v55 = vunpack.c.h.bf16 %v7867_v15 }
 0x2a3   : > { %v3653_v57 = vmul.f32 %v7691_v27, %v3598_v58  ;;  %v5487_v28 = vpop.f32.mrb[73].mxu1  ;;  %v3652_v23 = vmul.f32 %v7691_v27, %v3593_v36  ;;  %3880 = vst.msk [vmem:[%s7719_s19 + $0x54] sm:$0xf] %vm3858_vm4, %v4544_v61  ;;  %v3912_v17 = vunpack.c.l.bf16 %v3740_v14  ;;  %v3913_v26 = vunpack.c.h.bf16 %v3740_v14 }
 0x2a4   : > { %v3962_v51 = vadd.f32 %v3961_v48, %v3960_v5  ;;  %v5488_v18 = vadd.f32 %v5487_v28, %v5486_v42  ;;  %v5489_v12 = vpop.f32.mrb[74].mxu1  ;;  %v3722_v2 = vmax.f32 %v3690_v3, 0.0  ;;  %v3654_v33 = vmul.f32 %v7691_v27, %v3601_v54 }
 0x2a5   : > { %v3692_v20 = vadd.f32 %v7700_v52, %v3653_v57  ;;  %v5490_v0 = vpop.f32.mrb[75].mxu1  ;;  %v3691_v21 = vadd.f32 %v7700_v52, %v3652_v23  ;;  %v3963_v37 = vsel %vm1435_vm0, %v3912_v17, 0.0  ;;  %v3965_v30 = vsel %vm1435_vm0, %v3913_v26, 0.0 }
 0x2a6   : > { %v5491_v13 = vadd.f32 %v5490_v0, %v5489_v12  ;;  %v3445_v60 = vadd.f32 %v5488_v18, %v7601_v39  ;;  %v4547_v47 = vpack.c.bf16 %v3722_v2, %v3722_v2  ;;  %v3964_v10 = vadd.f32 %v3963_v37, %v3962_v51 }
 0x2a7   : > { %v3724_v34 = vmax.f32 %v3692_v20, 0.0  ;;  %v3693_v46 = vadd.f32 %v7700_v52, %v3654_v33  ;;  %v3723_v1 = vmax.f32 %v3691_v21, 0.0  ;;  %v3967_v40 = vsel %vm1435_vm0, %v3914_v8, 0.0 }
 0x2a8   : > { %v3606_v24 = vadd.f32 %v3605_v49, %v3445_v60  ;;  %3883 = vst.msk [vmem:[%s7719_s19 + $0x60] sm:$0xf] %vm3858_vm4, %v4547_v47  ;;  %v3448_v39 = vadd.f32 %v5491_v13, %v7603_v32  ;;  %v3966_v63 = vadd.f32 %v3965_v30, %v3964_v10  ;;  %v3969_v7 = vsel %vm1435_vm0, %v3915_v55, 0.0 }
 0x2a9   : > { %v4549_v38 = vpack.c.bf16 %v3724_v34, %v3724_v34  ;;  %v3725_v19 = vmax.f32 %v3693_v46, 0.0  ;;  %v3742_v9 = vpack.c.bf16 %v3723_v1, %v3722_v2  ;;  %v4548_v45 = vpack.c.bf16 %v3723_v1, %v3723_v1 }
 0x2aa   : > { %v5492_v22 = vpop.f32.mrb[76].mxu1  ;;  %v3655_v15 = vmul.f32 %v7691_v27, %v3606_v24  ;;  %v3609_v29 = vadd.f32 %v3608_v31, %v3448_v39  ;;  %v3968_v59 = vadd.f32 %v3967_v40, %v3966_v63 }
 0x2ab   : > { %3885 = vst.msk [vmem:[%s7719_s19 + $0x68] sm:$0xf] %vm3858_vm4, %v4549_v38  ;;  %v5493_v4 = vpop.f32.mrb[77].mxu1  ;;  %v3743_v53 = vpack.c.bf16 %v3725_v19, %v3724_v34  ;;  %v4550_v56 = vpack.c.bf16 %v3725_v19, %v3725_v19  ;;  %3884 = vst.msk [vmem:[%s7719_s19 + $0x64] sm:$0xf] %vm3858_vm4, %v4548_v45  ;;  %v3916_v32 = vunpack.c.l.bf16 %v3742_v9  ;;  %v3917_v41 = vunpack.c.h.bf16 %v3742_v9 }
 0x2ac   : > { %v5495_v49 = vpop.f32.mrb[78].mxu1  ;;  %v3694_v35 = vadd.f32 %v7700_v52, %v3655_v15  ;;  %v5494_v25 = vadd.f32 %v5493_v4, %v5492_v22  ;;  %v3656_v43 = vmul.f32 %v7691_v27, %v3609_v29  ;;  %v3970_v11 = vadd.f32 %v3969_v7, %v3968_v59  ;;  %v3891_v22 = vld [vmem:[%s7647_s27] sm:$0x1] }
 0x2ad   : > { %v5496_v58 = vpop.f32.mrb[79].mxu1  ;;  %3886 = vst.msk [vmem:[%s7719_s19 + $0x6c] sm:$0xf] %vm3858_vm4, %v4550_v56  ;;  %v3971_v62 = vsel %vm1435_vm0, %v3916_v32, 0.0  ;;  %v3918_v31 = vunpack.c.l.bf16 %v3743_v53  ;;  %v3919_v42 = vunpack.c.h.bf16 %v3743_v53  ;;  %v3973_v61 = vsel %vm1435_vm0, %v3917_v41, 0.0 }
 0x2ae   : > { %v3726_v48 = vmax.f32 %v3694_v35, 0.0  ;;  %v3453_v5 = vadd.f32 %v5494_v25, %v7609_v44  ;;  %v3695_v8 = vadd.f32 %v7700_v52, %v3656_v43  ;;  %v3972_v36 = vadd.f32 %v3971_v62, %v3970_v11 }
 0x2af   : > { %v5497_v14 = vadd.f32 %v5496_v58, %v5495_v49  ;;  %v3975_v54 = vsel %vm1435_vm0, %v3918_v31, 0.0  ;;  %v3977_v20 = vsel %vm1435_vm0, %v3919_v42, 0.0 }
 0x2b0   : > { %v4551_v57 = vpack.c.bf16 %v3726_v48, %v3726_v48  ;;  %v3614_v3 = vadd.f32 %v7869_v6, %v3453_v5  ;;  %v3727_v28 = vmax.f32 %v3695_v8, 0.0  ;;  %v3974_v51 = vadd.f32 %v3973_v61, %v3972_v36 }
 0x2b1   : > { %v3456_v18 = vadd.f32 %v5497_v14, %v7611_v16 }
 0x2b2   : > { %3887 = vst.msk [vmem:[%s7719_s19 + $0x70] sm:$0xf] %vm3858_vm4, %v4551_v57  ;;  %v3657_v44 = vmul.f32 %v7691_v27, %v3614_v3  ;;  %v3744_v12 = vpack.c.bf16 %v3727_v28, %v3726_v48  ;;  %v4552_v23 = vpack.c.bf16 %v3727_v28, %v3727_v28  ;;  %v3976_v17 = vadd.f32 %v3975_v54, %v3974_v51 }
 0x2b3   : > { %v3617_v26 = vadd.f32 %v7879_v50, %v3456_v18 }
 0x2b4   : > { %v3696_v6 = vadd.f32 %v7700_v52, %v3657_v44  ;;  %3888 = vst.msk [vmem:[%s7719_s19 + $0x74] sm:$0xf] %vm3858_vm4, %v4552_v23  ;;  %v3920_v16 = vunpack.c.l.bf16 %v3744_v12  ;;  %v3921_v2 = vunpack.c.h.bf16 %v3744_v12  ;;  %v3978_v0 = vadd.f32 %v3977_v20, %v3976_v17 }
 0x2b5   : > { %v3658_v33 = vmul.f32 %v7691_v27, %v3617_v26 }
 0x2b6   : > { %v3728_v21 = vmax.f32 %v3696_v6, 0.0  ;;  %v3979_v13 = vsel %vm1435_vm0, %v3920_v16, 0.0  ;;  %v3981_v37 = vsel %vm1435_vm0, %v3921_v2, 0.0 }
 0x2b7   : > { %v3980_v60 = vadd.f32 %v3979_v13, %v3978_v0  ;;  %v3697_v55 = vadd.f32 %v7700_v52, %v3658_v33 }
 0x2b8   : > { %v4553_v50 = vpack.c.bf16 %v3728_v21, %v3728_v21 }
 0x2b9   : > { %v3982_v34 = vadd.f32 %v3981_v37, %v3980_v60  ;;  %v3729_v47 = vmax.f32 %v3697_v55, 0.0 }
 0x2ba   : > { %3889 = vst.msk [vmem:[%s7719_s19 + $0x78] sm:$0xf] %vm3858_vm4, %v4553_v50 }
 0x2bb   : > { %v3745_v10 = vpack.c.bf16 %v3729_v47, %v3728_v21  ;;  %v4554_v46 = vpack.c.bf16 %v3729_v47, %v3729_v47 }
 0x2bd   : > { %3890 = vst.msk [vmem:[%s7719_s19 + $0x7c] sm:$0xf] %vm3858_vm4, %v4554_v46  ;;  %v3922_v27 = vunpack.c.l.bf16 %v3745_v10  ;;  %v3923_v1 = vunpack.c.h.bf16 %v3745_v10 }
 0x2bf   : > { %v3983_v24 = vsel %vm1435_vm0, %v3922_v27, 0.0  ;;  %v3985_v30 = vsel %vm1435_vm0, %v3923_v1, 0.0 }
 0x2c0   : > { %v3984_v52 = vadd.f32 %v3983_v24, %v3982_v34 }
 0x2c2   : > { %v3986_v38 = vadd.f32 %v3985_v30, %v3984_v52 }
 0x2c4   : > { %v3987_v39 = vrot.slane %v3986_v38, 4 }
 0x2c6   : > { %v3988_v63 = vadd.f32 %v3987_v39, %v3986_v38 }
 0x2c8   : > { %v3989_v19 = vrot.slane %v3988_v63, 2 }
 0x2ca   : > { %v3990_v9 = vadd.f32 %v3989_v19, %v3988_v63 }
 0x2cc   : > { %v3991_v45 = vrot.slane %v3990_v9, 1 }
 0x2ce   : > { %v3992_v40 = vadd.f32 %v3991_v45, %v3990_v9 }
 0x2d0   : > { %v3993_v7 = vadd.f32 %v3992_v40, %v3891_v22 }
 0x2d2   : > { %3995 = vst.msk [vmem:[%s7647_s27] sm:$0x1] %vm1580_vm3, %v3993_v7 }
 0x2d3   : > { %5693 = shalt.err (!%p5690_p3)
}
 0x2d4   : > { %s5694_s14 = scalar_lea.hbm %s7943_s30, 16  ;;  %s5698_s15 = scalar_lea.hbm %s8000_s6, 32 }
 0x2d5   : > { %p5695_p5 = scmp.ne.s32.totalorder %s7943_s30, %s5694_s14  ;;  %p5699_p9 = scmp.lt.u32.totalorder %s7943_s30, %s8000_s6 }
 0x2d6   : > { %p5700_p12 = scmp.lt.u32.totalorder %s5698_s15, %s5694_s14  ;;  %p5702_p11 = scmp.lt.u32.totalorder %s5694_s14, %s7943_s30 }
 0x2d7   : > { %p5696_p6 = pnand %p5695_p5, %p5844_p4 }
 0x2d8   : > { %p5701_p10 = por %p5700_p12, %p5699_p9 }
 0x2d9   : > { %p5697_p7 = pneg %p5696_p6 }
 0x2da   : > { %p5703_p13 = por %p5702_p11, %p5701_p10 }
 0x2dc   : > { %p5704_p0 = pnand %p5703_p13, %p5697_p7 }
 0x2de   : > { %5707 = shalt.err (!%p5704_p0)
}
 0x2df   : > { %5578 = dma.vmem_to_hbm [thread:$0]  (%p5844_p4), %s7945_s8, 16, %s7943_s30, %s4006_s18  }
 0x2e0 PF: > { %p5590_p1 = scmp.ge.s32.totalorder %s5762_s26, 2  ;;  %s4046_s17 = sand.u32 1, %s5742_s21  }
 0x2e1   : > { %s4047_s20 = scalar_lea.sflag [#allocation5], %s4046_s17 }
 0x2e2   : > { %p5585_p2 = pnand %p5590_p1, %p5851_p8 }
 0x2e4   : > { %5737 = dma.done.wait (!%p5585_p2), %s4047_s20, 16  }
 0x2e5   : > { %5739 = vsyncadd (!%p5585_p2), %s4047_s20, 4294967280  ;;  %s21_s26 = sadd.s32 1, %s5762_s26   ;;  %s8118_s21 = smov %s5746_s22 }
 0x2e6   : > { %p18_p3 = scmp.ge.s32.totalorder %s21_s26, 4   ;;  %s8119_s22 = smov %s5750_s23 }
 0x2e7   : > { %s8120_s23 = smov %s5857_s10  ;;  %s8121_s24 = smov %s5758_s25 }
 0x2e8   : > { %s8122_s25 = smov %s8124_s29  ;;  %20 = sbr.rel (!%p18_p3) target bundleno = 5 (0x5), region = 104 }
 0x2ef   :  { %4051 = vsyncpa [#allocation5], 1 }
 0x2f0   :  { %4053 = vsyncpa [#allocation5 + $0x1], 1 }
 0x2f1   :  { %4054 = vsyncpa [#allocation6], 1 }
 0x2f2   :  { %4056 = vsyncpa [#allocation6 + $0x1], 1 }

</bundles_post_ra>
